<compile_context>
chip_gen: v6e
topology: v6e:2x2x1
jax: 0.10.0
libtpu: 0.0.40
codegen_flags: <defaults>
</compile_context>

<pallas_src>
import functools
import math

import jax
import jax.numpy as jnp
import numpy as np
from jax import lax
from jax.experimental import pallas as pl
from jax.experimental.pallas import tpu as pltpu

# Make the f32 MXU path and the pure-JAX reference numerically comparable.
jax.config.update("jax_default_matmul_precision", "highest")


# ----------------------------------------------------------------------------
# Helpers
# ----------------------------------------------------------------------------
def _pick_tile(dim, target, align):
    """Largest tile <= target that is a multiple of `align` and divides `dim`
    (or the full dim if dim <= target / no aligned divisor exists)."""
    if dim <= target:
        return dim
    t = (target // align) * align
    while t >= align:
        if dim % t == 0:
            return t
        t -= align
    return dim


# ----------------------------------------------------------------------------
# Tiled linear kernel: y = x @ w_t + b (+ residual) (+ ReLU)
#   w_t is the pre-transposed (Din, Dout) weight, bias stays f32,
#   accumulation in f32, output written in `out_dtype`.
# ----------------------------------------------------------------------------
def _linear_kernel(*refs, relu, has_residual):
    if has_residual:
        x_ref, w_ref, b_ref, r_ref, o_ref, acc_ref = refs
    else:
        x_ref, w_ref, b_ref, o_ref, acc_ref = refs
        r_ref = None
    k = pl.program_id(2)

    @pl.when(k == 0)
    def _init():
        acc_ref[...] = jnp.zeros_like(acc_ref)

    acc_ref[...] += jnp.dot(x_ref[...], w_ref[...],
                            preferred_element_type=jnp.float32)

    @pl.when(k == pl.num_programs(2) - 1)
    def _finalize():
        y = acc_ref[...] + b_ref[...]
        if relu:
            y = jnp.maximum(y, 0.0)
        if has_residual:
            y = y + r_ref[...]
        o_ref[...] = y.astype(o_ref.dtype)


def linear(x2d, w_t, b, *, mdtype=jnp.float32, relu=False, residual=None,
           out_dtype=jnp.float32):
    """PyTorch nn.Linear semantics: y = x2d @ W^T + b, with w_t == W^T."""
    x2d = x2d.astype(mdtype)
    w_t = w_t.astype(mdtype)
    M, Din = x2d.shape
    Dout = w_t.shape[1]
    # bf16 operands need sublane multiples of 16; f32 needs 8.
    sub_align = 8 if jnp.dtype(mdtype).itemsize >= 4 else 16
    tm = _pick_tile(M, 512, sub_align)
    tn = _pick_tile(Dout, 512, 128)
    tk = _pick_tile(Din, 512, 128)
    # Worst case live VMEM (f32, residual): ~9 MiB -> fits every gen's default.

    has_residual = residual is not None
    in_specs = [
        pl.BlockSpec((tm, tk), lambda i, j, k: (i, k)),
        pl.BlockSpec((tk, tn), lambda i, j, k: (k, j)),
        pl.BlockSpec((1, tn), lambda i, j, k: (0, j)),
    ]
    inputs = [x2d, w_t, b.reshape(1, Dout).astype(jnp.float32)]
    if has_residual:
        # Residual block index ignores k -> DMA'd once per output tile.
        in_specs.append(pl.BlockSpec((tm, tn), lambda i, j, k: (i, j)))
        inputs.append(residual.astype(jnp.float32))

    return pl.pallas_call(
        functools.partial(_linear_kernel, relu=relu, has_residual=has_residual),
        out_shape=jax.ShapeDtypeStruct((M, Dout), out_dtype),
        grid_spec=pltpu.PrefetchScalarGridSpec(
            num_scalar_prefetch=0,
            grid=(M // tm, Dout // tn, Din // tk),
            in_specs=in_specs,
            out_specs=pl.BlockSpec((tm, tn), lambda i, j, k: (i, j)),
            scratch_shapes=[pltpu.VMEM((tm, tn), jnp.float32)],
        ),
        compiler_params=pltpu.CompilerParams(
            dimension_semantics=("parallel", "parallel", "arbitrary")),
    )(*inputs)


# ----------------------------------------------------------------------------
# Multi-head attention kernel: grid = (B, H, n_q, n_kv), online softmax over
# kv tiles.  Scores & softmax stats live in transposed (kv, q) orientation so
# the PV matmul (TN dot_general) yields the (d_k, tq) output tile directly --
# this is exactly the module's transpose(-1,-2) merge layout, no XLU transpose.
# ----------------------------------------------------------------------------
def _mha_kernel(*refs, scale, compute_dtype, has_mask):
    if has_mask:
        q_ref, k_ref, v_ref, m_ref, o_ref, m_sc, l_sc, acc_sc = refs
    else:
        q_ref, k_ref, v_ref, o_ref, m_sc, l_sc, acc_sc = refs
        m_ref = None
    ki = pl.program_id(3)

    @pl.when(ki == 0)
    def _init():
        m_sc[...] = jnp.full_like(m_sc, -jnp.inf)
        l_sc[...] = jnp.zeros_like(l_sc)
        acc_sc[...] = jnp.zeros_like(acc_sc)

    # Fold 1/sqrt(d_k) into q once per tile; keep elementwise math in f32.
    qh = (q_ref[0, 0].astype(jnp.float32) * scale).astype(compute_dtype)  # (tq,dk)
    kh = k_ref[0, 0]                                                       # (tkv,dk)
    # Transposed scores: (tkv, tq) = k @ q^T  (NT matmul on the MXU).
    s_t = lax.dot_general(kh, qh, (((1,), (1,)), ((), ())),
                          preferred_element_type=jnp.float32)
    if has_mask:
        keep = m_ref[0] != 0                                               # int8 mask
        s_t = jnp.where(keep, s_t, -1e9)

    m_prev = m_sc[...]                                                     # (1, tq)
    m_new = jnp.maximum(m_prev, jnp.max(s_t, axis=0, keepdims=True))
    alpha = jnp.exp(m_prev - m_new)                                        # (1, tq)
    p_t = jnp.exp(s_t - m_new)                                             # (tkv, tq)
    l_sc[...] = alpha * l_sc[...] + jnp.sum(p_t, axis=0, keepdims=True)
    # acc (d_k, tq) += v^T @ p_t   (TN dot_general -> transposed PV directly).
    pv_t = lax.dot_general(v_ref[0, 0], p_t.astype(compute_dtype),
                           (((0,), (0,)), ((), ())),
                           preferred_element_type=jnp.float32)
    acc_sc[...] = alpha * acc_sc[...] + pv_t
    m_sc[...] = m_new

    @pl.when(ki == pl.num_programs(3) - 1)
    def _finalize():
        inv = pl.reciprocal(l_sc[...], approx=True)                        # EUP
        o_ref[0, 0] = (acc_sc[...] * inv).astype(o_ref.dtype)


def _attention(q, k, v, mask_t, *, scale, compute_dtype, out_dtype):
    """q,k,v: (B, H, S, d_k).  mask_t: (1 or B, S_kv, S_q) int8 or None.
    Returns (B, H, d_k, S_q) -- the module's pre-view merge layout."""
    B, H, S_q, d_k = q.shape
    S_kv = k.shape[2]
    tq = _pick_tile(S_q, 256, 128)     # lane dim of the output -> 128-multiples
    tkv = _pick_tile(S_kv, 512, 128)

    in_specs = [
        pl.BlockSpec((1, 1, tq, d_k), lambda b, h, qi, ki: (b, h, qi, 0)),
        pl.BlockSpec((1, 1, tkv, d_k), lambda b, h, qi, ki: (b, h, ki, 0)),
        pl.BlockSpec((1, 1, tkv, d_k), lambda b, h, qi, ki: (b, h, ki, 0)),
    ]
    inputs = [q, k, v]
    has_mask = mask_t is not None
    if has_mask:
        if mask_t.shape[0] == 1:
            m_map = lambda b, h, qi, ki: (0, ki, qi)
        else:
            m_map = lambda b, h, qi, ki: (b, ki, qi)
        in_specs.append(pl.BlockSpec((1, tkv, tq), m_map))
        inputs.append(mask_t)

    kern = functools.partial(_mha_kernel, scale=scale,
                             compute_dtype=compute_dtype, has_mask=has_mask)
    return pl.pallas_call(
        kern,
        out_shape=jax.ShapeDtypeStruct((B, H, d_k, S_q), out_dtype),
        grid_spec=pltpu.PrefetchScalarGridSpec(
            num_scalar_prefetch=0,
            grid=(B, H, S_q // tq, S_kv // tkv),
            in_specs=in_specs,
            out_specs=pl.BlockSpec((1, 1, d_k, tq),
                                   lambda b, h, qi, ki: (b, h, 0, qi)),
            scratch_shapes=[pltpu.VMEM((1, tq), jnp.float32),     # running max
                            pltpu.VMEM((1, tq), jnp.float32),     # running sum
                            pltpu.VMEM((d_k, tq), jnp.float32)],  # acc (transposed)
        ),
        compiler_params=pltpu.CompilerParams(
            dimension_semantics=("parallel", "parallel", "parallel",
                                 "arbitrary")),
    )(*inputs)


def _prep_mask(mask, S_q, S_kv):
    """Return a compact int8 mask in transposed (kv, q) layout, batch dim 1 or B.
    None stays None (mask logic is then skipped at compile time)."""
    if mask is None:
        return None
    m = jnp.asarray(mask).reshape((-1, S_q, S_kv))     # (1|B, S_q, S_kv)
    return (jnp.swapaxes(m, -1, -2) != 0).astype(jnp.int8)


def self_attention(x, mask, p, num_heads, mdtype, residual):
    B, S, D = x.shape
    d_k = D // num_heads
    # Fused Q/K/V projection, written directly in mdtype.
    qkv = linear(x.reshape(B * S, D), p["w_qkv_t"], p["b_qkv"],
                 mdtype=mdtype, out_dtype=mdtype)
    qkv = qkv.reshape(B, S, 3, num_heads, d_k).transpose(2, 0, 3, 1, 4)
    q, k, v = qkv[0], qkv[1], qkv[2]                   # (B, H, S, d_k)
    attn_t = _attention(q, k, v, _prep_mask(mask, S, S),
                        scale=1.0 / math.sqrt(d_k),
                        compute_dtype=mdtype, out_dtype=mdtype)
    # Module's merge: transpose(-1,-2).view(B,S,D) == row-major reshape here.
    merged = attn_t.reshape(B * S, D)
    # Output projection with the residual add fused into the epilogue.
    return linear(merged, p["w_o_t"], p["b_o"], mdtype=mdtype,
                  residual=residual, out_dtype=jnp.float32)


def cross_attention(x, enc, mask, p, num_heads, mdtype, residual):
    B, S, D = x.shape
    S_e = enc.shape[1]
    d_k = D // num_heads
    qp = linear(x.reshape(B * S, D), p["w_q_t"], p["b_q"],
                mdtype=mdtype, out_dtype=mdtype)
    q = qp.reshape(B, S, num_heads, d_k).transpose(0, 2, 1, 3)
    kv = linear(enc.reshape(B * S_e, D), p["w_kv_t"], p["b_kv"],
                mdtype=mdtype, out_dtype=mdtype)
    kv = kv.reshape(B, S_e, 2, num_heads, d_k).transpose(2, 0, 3, 1, 4)
    k, v = kv[0], kv[1]
    attn_t = _attention(q, k, v, _prep_mask(mask, S, S_e),
                        scale=1.0 / math.sqrt(d_k),
                        compute_dtype=mdtype, out_dtype=mdtype)
    return linear(attn_t.reshape(B * S, D), p["w_o_t"], p["b_o"], mdtype=mdtype,
                  residual=residual, out_dtype=jnp.float32)


# ----------------------------------------------------------------------------
# LayerNorm over the whole (S, D) of each batch element (no affine, eps=1e-5),
# as a two-pass tiled pair of kernels: stats accumulate, then normalize.
# (The residual add is already fused into the preceding linear's epilogue.)
# ----------------------------------------------------------------------------
def _ln_stats_kernel(x_ref, sum_ref, sq_ref):
    @pl.when(pl.program_id(1) == 0)
    def _init():
        sum_ref[...] = jnp.zeros_like(sum_ref)
        sq_ref[...] = jnp.zeros_like(sq_ref)

    x = x_ref[0].astype(jnp.float32)
    sum_ref[...] += jnp.sum(x)
    sq_ref[...] += jnp.sum(x * x)


def _ln_norm_kernel(x_ref, sum_ref, sq_ref, o_ref, *, inv_n, eps):
    mu = sum_ref[0, 0, 0] * inv_n
    var = sq_ref[0, 0, 0] * inv_n - mu * mu
    inv = lax.rsqrt(var + eps)
    x = x_ref[0].astype(jnp.float32)
    o_ref[0] = ((x - mu) * inv).astype(o_ref.dtype)


def layer_norm(x, eps=1e-5):
    B, S, D = x.shape
    # Keep each (ts, D) f32 tile at a few MiB so the kernel fits every gen.
    ts = _pick_tile(S, max(8, min(512, (1 << 20) // max(D, 1))), 8)
    n_s = S // ts
    x_spec = pl.BlockSpec((1, ts, D), lambda b, s: (b, s, 0))
    stat_spec = pl.BlockSpec((1, 1, 128), lambda b, s: (b, 0, 0))
    stats_shape = jax.ShapeDtypeStruct((B, 1, 128), jnp.float32)

    sums, sqs = pl.pallas_call(
        _ln_stats_kernel,
        out_shape=(stats_shape, stats_shape),
        grid_spec=pltpu.PrefetchScalarGridSpec(
            num_scalar_prefetch=0, grid=(B, n_s),
            in_specs=[x_spec], out_specs=[stat_spec, stat_spec]),
        compiler_params=pltpu.CompilerParams(
            dimension_semantics=("parallel", "arbitrary")),
    )(x)

    return pl.pallas_call(
        functools.partial(_ln_norm_kernel, inv_n=1.0 / float(S * D), eps=eps),
        out_shape=jax.ShapeDtypeStruct((B, S, D), jnp.float32),
        grid_spec=pltpu.PrefetchScalarGridSpec(
            num_scalar_prefetch=0, grid=(B, n_s),
            in_specs=[x_spec, stat_spec, stat_spec],
            out_specs=x_spec),
        compiler_params=pltpu.CompilerParams(
            dimension_semantics=("parallel", "parallel")),
    )(x, sums, sqs)


# ----------------------------------------------------------------------------
# Full DecoderLayer forward
# ----------------------------------------------------------------------------
def decoder_layer(x, encoder_output, encoder_mask, decoder_mask, params,
                  num_heads, mdtype=jnp.float32):
    B, S, D = x.shape

    resid = x.reshape(B * S, D)
    h = self_attention(x, decoder_mask, params["self_attention"], num_heads,
                       mdtype, residual=resid)
    x1 = layer_norm(h.reshape(B, S, D))

    resid = x1.reshape(B * S, D)
    h = cross_attention(x1, encoder_output, encoder_mask,
                        params["cross_attention"], num_heads, mdtype,
                        residual=resid)
    x2 = layer_norm(h.reshape(B, S, D))

    resid = x2.reshape(B * S, D)
    ff = params["feed_forward"]
    hidden = linear(x2.reshape(B * S, D), ff["w1_t"], ff["b1"], mdtype=mdtype,
                    relu=True, out_dtype=mdtype)
    h = linear(hidden, ff["w2_t"], ff["b2"], mdtype=mdtype,
               residual=resid, out_dtype=jnp.float32)
    return layer_norm(h.reshape(B, S, D))


# ----------------------------------------------------------------------------
# Parameter construction (PyTorch-style raw weights + prepared kernel layout)
# ----------------------------------------------------------------------------
def init_raw_params(key, D, d_ff):
    ks = jax.random.split(key, 20)

    def lin_init(kw, kb, dout, din):
        w = jax.random.normal(kw, (dout, din), jnp.float32) * 0.05
        b = jax.random.normal(kb, (dout,), jnp.float32) * 0.05
        return w, b

    def mha_init(k8):
        w_q, b_q = lin_init(k8[0], k8[1], D, D)
        w_k, b_k = lin_init(k8[2], k8[3], D, D)
        w_v, b_v = lin_init(k8[4], k8[5], D, D)
        w_o, b_o = lin_init(k8[6], k8[7], D, D)
        return dict(w_q=w_q, b_q=b_q, w_k=w_k, b_k=b_k,
                    w_v=w_v, b_v=b_v, w_o=w_o, b_o=b_o)

    sa = mha_init(ks[0:8])
    ca = mha_init(ks[8:16])
    w1, b1 = lin_init(ks[16], ks[17], d_ff, D)
    w2, b2 = lin_init(ks[18], ks[19], D, d_ff)
    return dict(self_attention=sa, cross_attention=ca,
                feed_forward=dict(w1=w1, b1=b1, w2=w2, b2=b2))


def prepare_params(raw, mdtype=jnp.float32):
    """Pre-transpose / fuse / cast weights once; biases stay f32."""
    sa, ca, ff = raw["self_attention"], raw["cross_attention"], raw["feed_forward"]
    sa_p = dict(
        w_qkv_t=jnp.concatenate([sa["w_q"], sa["w_k"], sa["w_v"]],
                                axis=0).T.astype(mdtype),
        b_qkv=jnp.concatenate([sa["b_q"], sa["b_k"], sa["b_v"]]),
        w_o_t=sa["w_o"].T.astype(mdtype), b_o=sa["b_o"])
    ca_p = dict(
        w_q_t=ca["w_q"].T.astype(mdtype), b_q=ca["b_q"],
        w_kv_t=jnp.concatenate([ca["w_k"], ca["w_v"]], axis=0).T.astype(mdtype),
        b_kv=jnp.concatenate([ca["b_k"], ca["b_v"]]),
        w_o_t=ca["w_o"].T.astype(mdtype), b_o=ca["b_o"])
    ff_p = dict(w1_t=ff["w1"].T.astype(mdtype), b1=ff["b1"],
                w2_t=ff["w2"].T.astype(mdtype), b2=ff["b2"])
    return dict(self_attention=sa_p, cross_attention=ca_p, feed_forward=ff_p)


# ----------------------------------------------------------------------------
# Pure-JAX reference (mirrors the PyTorch module exactly)
# ----------------------------------------------------------------------------
def reference_decoder_layer(x, enc, enc_mask, dec_mask, raw, num_heads):
    def lin(t, w, b):
        return t @ w.T + b

    def ln(t, eps=1e-5):
        mu = jnp.mean(t, axis=(1, 2), keepdims=True)
        var = jnp.mean(jnp.square(t - mu), axis=(1, 2), keepdims=True)
        return (t - mu) / jnp.sqrt(var + eps)

    def mha(q, k, v, mask, p):
        B, S_q, D = q.shape
        d_k = D // num_heads
        qp = lin(q, p["w_q"], p["b_q"])
        kp = lin(k, p["w_k"], p["b_k"])
        vp = lin(v, p["w_v"], p["b_v"])
        qh = qp.reshape(B, S_q, num_heads, d_k).transpose(0, 2, 1, 3)
        kh = kp.reshape(B, -1, num_heads, d_k).transpose(0, 2, 1, 3)
        vh = vp.reshape(B, -1, num_heads, d_k).transpose(0, 2, 1, 3)
        scores = jnp.einsum("bhqd,bhkd->bhqk", qh, kh) / math.sqrt(d_k)
        if mask is not None:
            m = jnp.asarray(mask)
            if m.ndim == 2:
                m = m[None]
            scores = jnp.where(m[:, None, :, :] == 0, -1e9, scores)
        attn = jnp.einsum("bhqk,bhkd->bhqd",
                          jax.nn.softmax(scores, axis=-1), vh)
        merged = jnp.swapaxes(attn, -1, -2).reshape(B, S_q, D)
        return lin(merged, p["w_o"], p["b_o"])

    h = ln(x + mha(x, x, x, dec_mask, raw["self_attention"]))
    h = ln(h + mha(h, enc, enc, enc_mask, raw["cross_attention"]))
    ff = raw["feed_forward"]
    f = jnp.maximum(lin(h, ff["w1"], ff["b1"]), 0.0)
    f = lin(f, ff["w2"], ff["b2"])
    return ln(h + f)


# ----------------------------------------------------------------------------
if __name__ == "__main__":
    B, S_DEC, S_ENC, D, H, D_FF = 2, 8, 16, 32, 4, 64

    key = jax.random.PRNGKey(0)
    k_par, k_x, k_enc = jax.random.split(key, 3)
    raw = init_raw_params(k_par, D, D_FF)
    params_f32 = prepare_params(raw, jnp.float32)
    params_bf16 = prepare_params(raw, jnp.bfloat16)

    x = jax.random.normal(k_x, (B, S_DEC, D), jnp.float32)
    enc = jax.random.normal(k_enc, (B, S_ENC, D), jnp.float32)

    # Causal decoder mask; encoder padding mask (last 4 encoder positions pad).
    dec_mask = jnp.tril(jnp.ones((S_DEC, S_DEC), jnp.int32))
    enc_keep = (jnp.arange(S_ENC) < S_ENC - 4).astype(jnp.int32)
    enc_mask = jnp.broadcast_to(enc_keep[None, None, :], (B, S_DEC, S_ENC))

    # f32 path (reference-accurate)
    fwd = jax.jit(functools.partial(decoder_layer, num_heads=H,
                                    mdtype=jnp.float32))
    out = jax.block_until_ready(fwd(x, enc, enc_mask, dec_mask, params_f32))

    ref = reference_decoder_layer(x, enc, enc_mask, dec_mask, raw, H)
    np.testing.assert_allclose(np.asarray(out), np.asarray(ref),
                               rtol=1e-3, atol=1e-3)

    # bf16 MXU fast path: bf16 operands, f32 accumulation & f32 softmax/LN math.
    fwd_bf16 = jax.jit(functools.partial(decoder_layer, num_heads=H,
                                         mdtype=jnp.bfloat16))
    out_bf16 = jax.block_until_ready(
        fwd_bf16(x, enc, enc_mask, dec_mask, params_bf16))
    np.testing.assert_allclose(np.asarray(out_bf16), np.asarray(ref),
                               rtol=0.0, atol=1e-1)

    print("KERNEL_OK")
</pallas_src>

<mosaic_0001>
module attributes {stable_mosaic.version = 11 : i64} {
  func.func @_linear_kernel(%arg0: i32, %arg1: i32, %arg2: i32, %arg3: memref<16x32xf32, #tpu.memory_space<vmem>>, %arg4: memref<32x96xf32, #tpu.memory_space<vmem>>, %arg5: memref<1x96xf32, #tpu.memory_space<vmem>>, %arg6: memref<16x96xf32, #tpu.memory_space<vmem>>, %arg7: memref<16x96xf32, #tpu.memory_space<vmem>>) attributes {dimension_semantics = [#tpu.dimension_semantics<parallel>, #tpu.dimension_semantics<parallel>, #tpu.dimension_semantics<arbitrary>], iteration_bounds = array<i64: 1, 1, 1>, scalar_prefetch = 0 : i64, scratch_operands = 1 : i64, tpu.core_type = #tpu.core_type<tc>, window_params = [{transform_indices = @transform_0, window_bounds = array<i64: 16, 32>}, {transform_indices = @transform_1, window_bounds = array<i64: 32, 96>}, {transform_indices = @transform_2, window_bounds = array<i64: 1, 96>}, {transform_indices = @transform_3, window_bounds = array<i64: 16, 96>}]} {
    %c0_i32 = arith.constant 0 : i32
    %0 = arith.cmpi eq, %arg2, %c0_i32 : i32
    %1 = arith.extui %0 : i1 to i32
    %c0_i32_0 = arith.constant 0 : i32
    %2 = arith.cmpi ne, %1, %c0_i32_0 : i32
    scf.if %2 {
      %cst_10 = arith.constant 0.000000e+00 : f32
      %12 = vector.broadcast %cst_10 : f32 to vector<16x96xf32>
      %c0_11 = arith.constant 0 : index
      %c0_12 = arith.constant 0 : index
      %13 = vector.load %arg7[%c0_11, %c0_12] : memref<16x96xf32, #tpu.memory_space<vmem>>, vector<16x96xf32>
      tpu.vector_store %arg7[%c0_11, %c0_12], %12 {strides = array<i32>} : memref<16x96xf32, #tpu.memory_space<vmem>>, vector<16x96xf32>,
    } else {
    }
    %c0 = arith.constant 0 : index
    %c0_1 = arith.constant 0 : index
    %3 = vector.load %arg7[%c0, %c0_1] : memref<16x96xf32, #tpu.memory_space<vmem>>, vector<16x96xf32>
    %c0_2 = arith.constant 0 : index
    %c0_3 = arith.constant 0 : index
    %4 = vector.load %arg3[%c0_2, %c0_3] : memref<16x32xf32, #tpu.memory_space<vmem>>, vector<16x32xf32>
    %c0_4 = arith.constant 0 : index
    %c0_5 = arith.constant 0 : index
    %5 = vector.load %arg4[%c0_4, %c0_5] : memref<32x96xf32, #tpu.memory_space<vmem>>, vector<32x96xf32>
    %cst = arith.constant dense<0.000000e+00> : vector<16x96xf32>
    %6 = tpu.matmul %4, %5, %cst {dimension_numbers = #tpu.dot_dimension_numbers<[1], [0], [0], [1], [0, 0, 1, 1], [], []>, precision = #tpu.contract_precision<fp32>} : vector<16x32xf32>, vector<32x96xf32>, vector<16x96xf32> -> vector<16x96xf32>
    %7 = arith.addf %3, %6 : vector<16x96xf32>
    %c0_6 = arith.constant 0 : index
    %c0_7 = arith.constant 0 : index
    %8 = vector.load %arg7[%c0_6, %c0_7] : memref<16x96xf32, #tpu.memory_space<vmem>>, vector<16x96xf32>
    tpu.vector_store %arg7[%c0_6, %c0_7], %7 {strides = array<i32>} : memref<16x96xf32, #tpu.memory_space<vmem>>, vector<16x96xf32>,
    %c0_i32_8 = arith.constant 0 : i32
    %9 = arith.cmpi eq, %arg2, %c0_i32_8 : i32
    %10 = arith.extui %9 : i1 to i32
    %c0_i32_9 = arith.constant 0 : i32
    %11 = arith.cmpi ne, %10, %c0_i32_9 : i32
    scf.if %11 {
      %c0_10 = arith.constant 0 : index
      %c0_11 = arith.constant 0 : index
      %12 = vector.load %arg7[%c0_10, %c0_11] : memref<16x96xf32, #tpu.memory_space<vmem>>, vector<16x96xf32>
      %c0_12 = arith.constant 0 : index
      %c0_13 = arith.constant 0 : index
      %13 = vector.load %arg5[%c0_12, %c0_13] : memref<1x96xf32, #tpu.memory_space<vmem>>, vector<1x96xf32>
      %14 = vector.broadcast %13 : vector<1x96xf32> to vector<16x96xf32>
      %15 = arith.addf %12, %14 : vector<16x96xf32>
      %c0_14 = arith.constant 0 : index
      %c0_15 = arith.constant 0 : index
      %16 = vector.load %arg6[%c0_14, %c0_15] : memref<16x96xf32, #tpu.memory_space<vmem>>, vector<16x96xf32>
      tpu.vector_store %arg6[%c0_14, %c0_15], %15 {strides = array<i32>} : memref<16x96xf32, #tpu.memory_space<vmem>>, vector<16x96xf32>,
    } else {
    }
    return
  }
  func.func @transform_0(%arg0: i32, %arg1: i32, %arg2: i32) -> (i32, i32) {
    %c0_i32 = arith.constant 0 : i32
    return %arg0, %arg2 : i32, i32
  }
  func.func @transform_1(%arg0: i32, %arg1: i32, %arg2: i32) -> (i32, i32) {
    %c0_i32 = arith.constant 0 : i32
    return %arg2, %arg1 : i32, i32
  }
  func.func @transform_2(%arg0: i32, %arg1: i32, %arg2: i32) -> (i32, i32) {
    %c0_i32 = arith.constant 0 : i32
    %c0_i32_0 = arith.constant 0 : i32
    return %c0_i32, %arg1 : i32, i32
  }
  func.func @transform_3(%arg0: i32, %arg1: i32, %arg2: i32) -> (i32, i32) {
    %c0_i32 = arith.constant 0 : i32
    return %arg0, %arg1 : i32, i32
  }
}

module attributes {stable_mosaic.version = 11 : i64} {
  func.func @_mha_kernel(%arg0: i32, %arg1: i32, %arg2: i32, %arg3: i32, %arg4: memref<1x1x8x8xf32, #tpu.memory_space<vmem>>, %arg5: memref<1x1x8x8xf32, #tpu.memory_space<vmem>>, %arg6: memref<1x1x8x8xf32, #tpu.memory_space<vmem>>, %arg7: memref<1x8x8xi8, #tpu.memory_space<vmem>>, %arg8: memref<1x1x8x8xf32, #tpu.memory_space<vmem>>, %arg9: memref<1x8xf32, #tpu.memory_space<vmem>>, %arg10: memref<1x8xf32, #tpu.memory_space<vmem>>, %arg11: memref<8x8xf32, #tpu.memory_space<vmem>>) attributes {dimension_semantics = [#tpu.dimension_semantics<parallel>, #tpu.dimension_semantics<parallel>, #tpu.dimension_semantics<parallel>, #tpu.dimension_semantics<arbitrary>], iteration_bounds = array<i64: 2, 4, 1, 1>, scalar_prefetch = 0 : i64, scratch_operands = 3 : i64, tpu.core_type = #tpu.core_type<tc>, window_params = [{transform_indices = @transform_0, window_bounds = array<i64: 1, 1, 8, 8>}, {transform_indices = @transform_1, window_bounds = array<i64: 1, 1, 8, 8>}, {transform_indices = @transform_2, window_bounds = array<i64: 1, 1, 8, 8>}, {transform_indices = @transform_3, window_bounds = array<i64: 1, 8, 8>}, {transform_indices = @transform_4, window_bounds = array<i64: 1, 1, 8, 8>}]} {
    %c0_i32 = arith.constant 0 : i32
    %0 = arith.cmpi eq, %arg3, %c0_i32 : i32
    %1 = arith.extui %0 : i1 to i32
    %c0_i32_0 = arith.constant 0 : i32
    %2 = arith.cmpi ne, %1, %c0_i32_0 : i32
    scf.if %2 {
      %cst_34 = arith.constant 0xFF800000 : f32
      %43 = vector.broadcast %cst_34 : f32 to vector<1x8xf32>
      %c0_35 = arith.constant 0 : index
      %c0_36 = arith.constant 0 : index
      %44 = vector.load %arg9[%c0_35, %c0_36] : memref<1x8xf32, #tpu.memory_space<vmem>>, vector<1x8xf32>
      tpu.vector_store %arg9[%c0_35, %c0_36], %43 {strides = array<i32>} : memref<1x8xf32, #tpu.memory_space<vmem>>, vector<1x8xf32>,
      %cst_37 = arith.constant 0.000000e+00 : f32
      %45 = vector.broadcast %cst_37 : f32 to vector<1x8xf32>
      %c0_38 = arith.constant 0 : index
      %c0_39 = arith.constant 0 : index
      %46 = vector.load %arg10[%c0_38, %c0_39] : memref<1x8xf32, #tpu.memory_space<vmem>>, vector<1x8xf32>
      tpu.vector_store %arg10[%c0_38, %c0_39], %45 {strides = array<i32>} : memref<1x8xf32, #tpu.memory_space<vmem>>, vector<1x8xf32>,
      %cst_40 = arith.constant 0.000000e+00 : f32
      %47 = vector.broadcast %cst_40 : f32 to vector<8x8xf32>
      %c0_41 = arith.constant 0 : index
      %c0_42 = arith.constant 0 : index
      %48 = vector.load %arg11[%c0_41, %c0_42] : memref<8x8xf32, #tpu.memory_space<vmem>>, vector<8x8xf32>
      tpu.vector_store %arg11[%c0_41, %c0_42], %47 {strides = array<i32>} : memref<8x8xf32, #tpu.memory_space<vmem>>, vector<8x8xf32>,
    } else {
    }
    %c0 = arith.constant 0 : index
    %c0_1 = arith.constant 0 : index
    %c0_2 = arith.constant 0 : index
    %c0_3 = arith.constant 0 : index
    %3 = vector.load %arg4[%c0, %c0_1, %c0_2, %c0_3] : memref<1x1x8x8xf32, #tpu.memory_space<vmem>>, vector<1x1x8x8xf32>
    %4 = vector.shape_cast %3 : vector<1x1x8x8xf32> to vector<8x8xf32>
    %cst = arith.constant 0.353553385 : f32
    %5 = vector.broadcast %cst : f32 to vector<8x8xf32>
    %6 = arith.mulf %4, %5 : vector<8x8xf32>
    %c0_4 = arith.constant 0 : index
    %c0_5 = arith.constant 0 : index
    %c0_6 = arith.constant 0 : index
    %c0_7 = arith.constant 0 : index
    %7 = vector.load %arg5[%c0_4, %c0_5, %c0_6, %c0_7] : memref<1x1x8x8xf32, #tpu.memory_space<vmem>>, vector<1x1x8x8xf32>
    %8 = vector.shape_cast %7 : vector<1x1x8x8xf32> to vector<8x8xf32>
    %cst_8 = arith.constant dense<0.000000e+00> : vector<8x8xf32>
    %9 = tpu.matmul %8, %6, %cst_8 {dimension_numbers = #tpu.dot_dimension_numbers<[1], [1], [0], [0], [0, 0, 1, 0], [], []>, precision = #tpu.contract_precision<fp32>} : vector<8x8xf32>, vector<8x8xf32>, vector<8x8xf32> -> vector<8x8xf32>
    %c0_9 = arith.constant 0 : index
    %c0_10 = arith.constant 0 : index
    %c0_11 = arith.constant 0 : index
    %10 = vector.load %arg7[%c0_9, %c0_10, %c0_11] : memref<1x8x8xi8, #tpu.memory_space<vmem>>, vector<1x8x8xi8>
    %11 = vector.shape_cast %10 : vector<1x8x8xi8> to vector<8x8xi8>
    %c0_i8 = arith.constant 0 : i8
    %12 = vector.broadcast %c0_i8 : i8 to vector<8x8xi8>
    %13 = arith.cmpi ne, %11, %12 : vector<8x8xi8>
    %cst_12 = arith.constant -1.000000e+09 : f32
    %14 = vector.broadcast %cst_12 : f32 to vector<8x8xf32>
    %15 = arith.select %13, %9, %14 : vector<8x8xi1>, vector<8x8xf32>
    %c0_13 = arith.constant 0 : index
    %c0_14 = arith.constant 0 : index
    %16 = vector.load %arg9[%c0_13, %c0_14] : memref<1x8xf32, #tpu.memory_space<vmem>>, vector<1x8xf32>
    %cst_15 = arith.constant dense<0xFF800000> : vector<8xf32>
    %17 = vector.multi_reduction <maximumf>, %15, %cst_15 [0] : vector<8x8xf32> to vector<8xf32>
    %18 = vector.shape_cast %17 : vector<8xf32> to vector<1x8xf32>
    %19 = arith.maximumf %16, %18 : vector<1x8xf32>
    %20 = arith.subf %16, %19 : vector<1x8xf32>
    %21 = math.exp %20 : vector<1x8xf32>
    %22 = vector.broadcast %19 : vector<1x8xf32> to vector<8x8xf32>
    %23 = arith.subf %15, %22 : vector<8x8xf32>
    %24 = math.exp %23 : vector<8x8xf32>
    %c0_16 = arith.constant 0 : index
    %c0_17 = arith.constant 0 : index
    %25 = vector.load %arg10[%c0_16, %c0_17] : memref<1x8xf32, #tpu.memory_space<vmem>>, vector<1x8xf32>
    %26 = arith.mulf %21, %25 : vector<1x8xf32>
    %cst_18 = arith.constant dense<0.000000e+00> : vector<8xf32>
    %27 = vector.multi_reduction <add>, %24, %cst_18 [0] : vector<8x8xf32> to vector<8xf32>
    %28 = vector.shape_cast %27 : vector<8xf32> to vector<1x8xf32>
    %29 = arith.addf %26, %28 : vector<1x8xf32>
    %c0_19 = arith.constant 0 : index
    %c0_20 = arith.constant 0 : index
    %30 = vector.load %arg10[%c0_19, %c0_20] : memref<1x8xf32, #tpu.memory_space<vmem>>, vector<1x8xf32>
    tpu.vector_store %arg10[%c0_19, %c0_20], %29 {strides = array<i32>} : memref<1x8xf32, #tpu.memory_space<vmem>>, vector<1x8xf32>,
    %c0_21 = arith.constant 0 : index
    %c0_22 = arith.constant 0 : index
    %c0_23 = arith.constant 0 : index
    %c0_24 = arith.constant 0 : index
    %31 = vector.load %arg6[%c0_21, %c0_22, %c0_23, %c0_24] : memref<1x1x8x8xf32, #tpu.memory_space<vmem>>, vector<1x1x8x8xf32>
    %32 = vector.shape_cast %31 : vector<1x1x8x8xf32> to vector<8x8xf32>
    %cst_25 = arith.constant dense<0.000000e+00> : vector<8x8xf32>
    %33 = tpu.matmul %32, %24, %cst_25 {dimension_numbers = #tpu.dot_dimension_numbers<[0], [0], [1], [1], [0, 1, 1, 1], [], []>, precision = #tpu.contract_precision<fp32>} : vector<8x8xf32>, vector<8x8xf32>, vector<8x8xf32> -> vector<8x8xf32>
    %c0_26 = arith.constant 0 : index
    %c0_27 = arith.constant 0 : index
    %34 = vector.load %arg11[%c0_26, %c0_27] : memref<8x8xf32, #tpu.memory_space<vmem>>, vector<8x8xf32>
    %35 = vector.broadcast %21 : vector<1x8xf32> to vector<8x8xf32>
    %36 = arith.mulf %35, %34 : vector<8x8xf32>
    %37 = arith.addf %36, %33 : vector<8x8xf32>
    %c0_28 = arith.constant 0 : index
    %c0_29 = arith.constant 0 : index
    %38 = vector.load %arg11[%c0_28, %c0_29] : memref<8x8xf32, #tpu.memory_space<vmem>>, vector<8x8xf32>
    tpu.vector_store %arg11[%c0_28, %c0_29], %37 {strides = array<i32>} : memref<8x8xf32, #tpu.memory_space<vmem>>, vector<8x8xf32>,
    %c0_30 = arith.constant 0 : index
    %c0_31 = arith.constant 0 : index
    %39 = vector.load %arg9[%c0_30, %c0_31] : memref<1x8xf32, #tpu.memory_space<vmem>>, vector<1x8xf32>
    tpu.vector_store %arg9[%c0_30, %c0_31], %19 {strides = array<i32>} : memref<1x8xf32, #tpu.memory_space<vmem>>, vector<1x8xf32>,
    %c0_i32_32 = arith.constant 0 : i32
    %40 = arith.cmpi eq, %arg3, %c0_i32_32 : i32
    %41 = arith.extui %40 : i1 to i32
    %c0_i32_33 = arith.constant 0 : i32
    %42 = arith.cmpi ne, %41, %c0_i32_33 : i32
    scf.if %42 {
      %c0_34 = arith.constant 0 : index
      %c0_35 = arith.constant 0 : index
      %43 = vector.load %arg10[%c0_34, %c0_35] : memref<1x8xf32, #tpu.memory_space<vmem>>, vector<1x8xf32>
      %44 = tpu.reciprocal %43 {approx = true} : vector<1x8xf32> -> vector<1x8xf32>
      %c0_36 = arith.constant 0 : index
      %c0_37 = arith.constant 0 : index
      %45 = vector.load %arg11[%c0_36, %c0_37] : memref<8x8xf32, #tpu.memory_space<vmem>>, vector<8x8xf32>
      %46 = vector.broadcast %44 : vector<1x8xf32> to vector<8x8xf32>
      %47 = arith.mulf %45, %46 : vector<8x8xf32>
      %c0_38 = arith.constant 0 : index
      %c0_39 = arith.constant 0 : index
      %c0_40 = arith.constant 0 : index
      %c0_41 = arith.constant 0 : index
      %48 = vector.load %arg8[%c0_38, %c0_39, %c0_40, %c0_41] : memref<1x1x8x8xf32, #tpu.memory_space<vmem>>, vector<1x1x8x8xf32>
      %49 = vector.shape_cast %48 : vector<1x1x8x8xf32> to vector<8x8xf32>
      %50 = vector.shape_cast %47 : vector<8x8xf32> to vector<1x1x8x8xf32>
      tpu.vector_store %arg8[%c0_38, %c0_39, %c0_40, %c0_41], %50 {strides = array<i32>} : memref<1x1x8x8xf32, #tpu.memory_space<vmem>>, vector<1x1x8x8xf32>,
    } else {
    }
    return
  }
  func.func @transform_0(%arg0: i32, %arg1: i32, %arg2: i32, %arg3: i32) -> (i32, i32, i32, i32) {
    %c0_i32 = arith.constant 0 : i32
    %c0_i32_0 = arith.constant 0 : i32
    return %arg0, %arg1, %arg2, %c0_i32 : i32, i32, i32, i32
  }
  func.func @transform_1(%arg0: i32, %arg1: i32, %arg2: i32, %arg3: i32) -> (i32, i32, i32, i32) {
    %c0_i32 = arith.constant 0 : i32
    %c0_i32_0 = arith.constant 0 : i32
    return %arg0, %arg1, %arg3, %c0_i32 : i32, i32, i32, i32
  }
  func.func @transform_2(%arg0: i32, %arg1: i32, %arg2: i32, %arg3: i32) -> (i32, i32, i32, i32) {
    %c0_i32 = arith.constant 0 : i32
    %c0_i32_0 = arith.constant 0 : i32
    return %arg0, %arg1, %arg3, %c0_i32 : i32, i32, i32, i32
  }
  func.func @transform_3(%arg0: i32, %arg1: i32, %arg2: i32, %arg3: i32) -> (i32, i32, i32) {
    %c0_i32 = arith.constant 0 : i32
    %c0_i32_0 = arith.constant 0 : i32
    return %c0_i32, %arg3, %arg2 : i32, i32, i32
  }
  func.func @transform_4(%arg0: i32, %arg1: i32, %arg2: i32, %arg3: i32) -> (i32, i32, i32, i32) {
    %c0_i32 = arith.constant 0 : i32
    %c0_i32_0 = arith.constant 0 : i32
    return %arg0, %arg1, %c0_i32, %arg2 : i32, i32, i32, i32
  }
}

module attributes {stable_mosaic.version = 11 : i64} {
  func.func @_ln_stats_kernel(%arg0: i32, %arg1: i32, %arg2: memref<1x8x32xf32, #tpu.memory_space<vmem>>, %arg3: memref<1x1x128xf32, #tpu.memory_space<vmem>>, %arg4: memref<1x1x128xf32, #tpu.memory_space<vmem>>) attributes {dimension_semantics = [#tpu.dimension_semantics<parallel>, #tpu.dimension_semantics<arbitrary>], iteration_bounds = array<i64: 2, 1>, scalar_prefetch = 0 : i64, scratch_operands = 0 : i64, tpu.core_type = #tpu.core_type<tc>, window_params = [{transform_indices = @transform_0, window_bounds = array<i64: 1, 8, 32>}, {transform_indices = @transform_1, window_bounds = array<i64: 1, 1, 128>}, {transform_indices = @transform_2, window_bounds = array<i64: 1, 1, 128>}]} {
    %c0_i32 = arith.constant 0 : i32
    %0 = arith.cmpi eq, %arg1, %c0_i32 : i32
    %1 = arith.extui %0 : i1 to i32
    %c0_i32_0 = arith.constant 0 : i32
    %2 = arith.cmpi ne, %1, %c0_i32_0 : i32
    scf.if %2 {
      %cst_16 = arith.constant 0.000000e+00 : f32
      %22 = vector.broadcast %cst_16 : f32 to vector<1x1x128xf32>
      %c0_17 = arith.constant 0 : index
      %c0_18 = arith.constant 0 : index
      %c0_19 = arith.constant 0 : index
      %23 = vector.load %arg3[%c0_17, %c0_18, %c0_19] : memref<1x1x128xf32, #tpu.memory_space<vmem>>, vector<1x1x128xf32>
      tpu.vector_store %arg3[%c0_17, %c0_18, %c0_19], %22 {strides = array<i32>} : memref<1x1x128xf32, #tpu.memory_space<vmem>>, vector<1x1x128xf32>,
      %cst_20 = arith.constant 0.000000e+00 : f32
      %24 = vector.broadcast %cst_20 : f32 to vector<1x1x128xf32>
      %c0_21 = arith.constant 0 : index
      %c0_22 = arith.constant 0 : index
      %c0_23 = arith.constant 0 : index
      %25 = vector.load %arg4[%c0_21, %c0_22, %c0_23] : memref<1x1x128xf32, #tpu.memory_space<vmem>>, vector<1x1x128xf32>
      tpu.vector_store %arg4[%c0_21, %c0_22, %c0_23], %24 {strides = array<i32>} : memref<1x1x128xf32, #tpu.memory_space<vmem>>, vector<1x1x128xf32>,
    } else {
    }
    %c0 = arith.constant 0 : index
    %c0_1 = arith.constant 0 : index
    %c0_2 = arith.constant 0 : index
    %3 = vector.load %arg2[%c0, %c0_1, %c0_2] : memref<1x8x32xf32, #tpu.memory_space<vmem>>, vector<1x8x32xf32>
    %4 = vector.shape_cast %3 : vector<1x8x32xf32> to vector<8x32xf32>
    %c0_3 = arith.constant 0 : index
    %c0_4 = arith.constant 0 : index
    %c0_5 = arith.constant 0 : index
    %5 = vector.load %arg3[%c0_3, %c0_4, %c0_5] : memref<1x1x128xf32, #tpu.memory_space<vmem>>, vector<1x1x128xf32>
    %6 = vector.shape_cast %4 : vector<8x32xf32> to vector<1x8x32xf32>
    %cst = arith.constant dense<0.000000e+00> : vector<1xf32>
    %7 = vector.multi_reduction <add>, %6, %cst [1, 2] : vector<1x8x32xf32> to vector<1xf32>
    %8 = vector.shape_cast %7 : vector<1xf32> to vector<1x1x1xf32>
    %9 = vector.extract %8[0, 0, 0] : f32 from vector<1x1x1xf32>
    %10 = vector.broadcast %9 : f32 to vector<1x1x128xf32>
    %11 = arith.addf %5, %10 : vector<1x1x128xf32>
    %c0_6 = arith.constant 0 : index
    %c0_7 = arith.constant 0 : index
    %c0_8 = arith.constant 0 : index
    %12 = vector.load %arg3[%c0_6, %c0_7, %c0_8] : memref<1x1x128xf32, #tpu.memory_space<vmem>>, vector<1x1x128xf32>
    tpu.vector_store %arg3[%c0_6, %c0_7, %c0_8], %11 {strides = array<i32>} : memref<1x1x128xf32, #tpu.memory_space<vmem>>, vector<1x1x128xf32>,
    %c0_9 = arith.constant 0 : index
    %c0_10 = arith.constant 0 : index
    %c0_11 = arith.constant 0 : index
    %13 = vector.load %arg4[%c0_9, %c0_10, %c0_11] : memref<1x1x128xf32, #tpu.memory_space<vmem>>, vector<1x1x128xf32>
    %14 = arith.mulf %4, %4 : vector<8x32xf32>
    %15 = vector.shape_cast %14 : vector<8x32xf32> to vector<1x8x32xf32>
    %cst_12 = arith.constant dense<0.000000e+00> : vector<1xf32>
    %16 = vector.multi_reduction <add>, %15, %cst_12 [1, 2] : vector<1x8x32xf32> to vector<1xf32>
    %17 = vector.shape_cast %16 : vector<1xf32> to vector<1x1x1xf32>
    %18 = vector.extract %17[0, 0, 0] : f32 from vector<1x1x1xf32>
    %19 = vector.broadcast %18 : f32 to vector<1x1x128xf32>
    %20 = arith.addf %13, %19 : vector<1x1x128xf32>
    %c0_13 = arith.constant 0 : index
    %c0_14 = arith.constant 0 : index
    %c0_15 = arith.constant 0 : index
    %21 = vector.load %arg4[%c0_13, %c0_14, %c0_15] : memref<1x1x128xf32, #tpu.memory_space<vmem>>, vector<1x1x128xf32>
    tpu.vector_store %arg4[%c0_13, %c0_14, %c0_15], %20 {strides = array<i32>} : memref<1x1x128xf32, #tpu.memory_space<vmem>>, vector<1x1x128xf32>,
    return
  }
  func.func @transform_0(%arg0: i32, %arg1: i32) -> (i32, i32, i32) {
    %c0_i32 = arith.constant 0 : i32
    %c0_i32_0 = arith.constant 0 : i32
    return %arg0, %arg1, %c0_i32 : i32, i32, i32
  }
  func.func @transform_1(%arg0: i32, %arg1: i32) -> (i32, i32, i32) {
    %c0_i32 = arith.constant 0 : i32
    %c0_i32_0 = arith.constant 0 : i32
    %c0_i32_1 = arith.constant 0 : i32
    return %arg0, %c0_i32, %c0_i32_0 : i32, i32, i32
  }
  func.func @transform_2(%arg0: i32, %arg1: i32) -> (i32, i32, i32) {
    %c0_i32 = arith.constant 0 : i32
    %c0_i32_0 = arith.constant 0 : i32
    %c0_i32_1 = arith.constant 0 : i32
    return %arg0, %c0_i32, %c0_i32_0 : i32, i32, i32
  }
}

module attributes {stable_mosaic.version = 11 : i64} {
  func.func @_linear_kernel(%arg0: i32, %arg1: i32, %arg2: i32, %arg3: memref<16x32xf32, #tpu.memory_space<vmem>>, %arg4: memref<32x32xf32, #tpu.memory_space<vmem>>, %arg5: memref<1x32xf32, #tpu.memory_space<vmem>>, %arg6: memref<16x32xf32, #tpu.memory_space<vmem>>, %arg7: memref<16x32xf32, #tpu.memory_space<vmem>>, %arg8: memref<16x32xf32, #tpu.memory_space<vmem>>) attributes {dimension_semantics = [#tpu.dimension_semantics<parallel>, #tpu.dimension_semantics<parallel>, #tpu.dimension_semantics<arbitrary>], iteration_bounds = array<i64: 1, 1, 1>, scalar_prefetch = 0 : i64, scratch_operands = 1 : i64, tpu.core_type = #tpu.core_type<tc>, window_params = [{transform_indices = @transform_0, window_bounds = array<i64: 16, 32>}, {transform_indices = @transform_1, window_bounds = array<i64: 32, 32>}, {transform_indices = @transform_2, window_bounds = array<i64: 1, 32>}, {transform_indices = @transform_3, window_bounds = array<i64: 16, 32>}, {transform_indices = @transform_4, window_bounds = array<i64: 16, 32>}]} {
    %c0_i32 = arith.constant 0 : i32
    %0 = arith.cmpi eq, %arg2, %c0_i32 : i32
    %1 = arith.extui %0 : i1 to i32
    %c0_i32_0 = arith.constant 0 : i32
    %2 = arith.cmpi ne, %1, %c0_i32_0 : i32
    scf.if %2 {
      %cst_10 = arith.constant 0.000000e+00 : f32
      %12 = vector.broadcast %cst_10 : f32 to vector<16x32xf32>
      %c0_11 = arith.constant 0 : index
      %c0_12 = arith.constant 0 : index
      %13 = vector.load %arg8[%c0_11, %c0_12] : memref<16x32xf32, #tpu.memory_space<vmem>>, vector<16x32xf32>
      tpu.vector_store %arg8[%c0_11, %c0_12], %12 {strides = array<i32>} : memref<16x32xf32, #tpu.memory_space<vmem>>, vector<16x32xf32>,
    } else {
    }
    %c0 = arith.constant 0 : index
    %c0_1 = arith.constant 0 : index
    %3 = vector.load %arg8[%c0, %c0_1] : memref<16x32xf32, #tpu.memory_space<vmem>>, vector<16x32xf32>
    %c0_2 = arith.constant 0 : index
    %c0_3 = arith.constant 0 : index
    %4 = vector.load %arg3[%c0_2, %c0_3] : memref<16x32xf32, #tpu.memory_space<vmem>>, vector<16x32xf32>
    %c0_4 = arith.constant 0 : index
    %c0_5 = arith.constant 0 : index
    %5 = vector.load %arg4[%c0_4, %c0_5] : memref<32x32xf32, #tpu.memory_space<vmem>>, vector<32x32xf32>
    %cst = arith.constant dense<0.000000e+00> : vector<16x32xf32>
    %6 = tpu.matmul %4, %5, %cst {dimension_numbers = #tpu.dot_dimension_numbers<[1], [0], [0], [1], [0, 0, 1, 1], [], []>, precision = #tpu.contract_precision<fp32>} : vector<16x32xf32>, vector<32x32xf32>, vector<16x32xf32> -> vector<16x32xf32>
    %7 = arith.addf %3, %6 : vector<16x32xf32>
    %c0_6 = arith.constant 0 : index
    %c0_7 = arith.constant 0 : index
    %8 = vector.load %arg8[%c0_6, %c0_7] : memref<16x32xf32, #tpu.memory_space<vmem>>, vector<16x32xf32>
    tpu.vector_store %arg8[%c0_6, %c0_7], %7 {strides = array<i32>} : memref<16x32xf32, #tpu.memory_space<vmem>>, vector<16x32xf32>,
    %c0_i32_8 = arith.constant 0 : i32
    %9 = arith.cmpi eq, %arg2, %c0_i32_8 : i32
    %10 = arith.extui %9 : i1 to i32
    %c0_i32_9 = arith.constant 0 : i32
    %11 = arith.cmpi ne, %10, %c0_i32_9 : i32
    scf.if %11 {
      %c0_10 = arith.constant 0 : index
      %c0_11 = arith.constant 0 : index
      %12 = vector.load %arg8[%c0_10, %c0_11] : memref<16x32xf32, #tpu.memory_space<vmem>>, vector<16x32xf32>
      %c0_12 = arith.constant 0 : index
      %c0_13 = arith.constant 0 : index
      %13 = vector.load %arg5[%c0_12, %c0_13] : memref<1x32xf32, #tpu.memory_space<vmem>>, vector<1x32xf32>
      %14 = vector.broadcast %13 : vector<1x32xf32> to vector<16x32xf32>
      %15 = arith.addf %12, %14 : vector<16x32xf32>
      %c0_14 = arith.constant 0 : index
      %c0_15 = arith.constant 0 : index
      %16 = vector.load %arg6[%c0_14, %c0_15] : memref<16x32xf32, #tpu.memory_space<vmem>>, vector<16x32xf32>
      %17 = arith.addf %15, %16 : vector<16x32xf32>
      %c0_16 = arith.constant 0 : index
      %c0_17 = arith.constant 0 : index
      %18 = vector.load %arg7[%c0_16, %c0_17] : memref<16x32xf32, #tpu.memory_space<vmem>>, vector<16x32xf32>
      tpu.vector_store %arg7[%c0_16, %c0_17], %17 {strides = array<i32>} : memref<16x32xf32, #tpu.memory_space<vmem>>, vector<16x32xf32>,
    } else {
    }
    return
  }
  func.func @transform_0(%arg0: i32, %arg1: i32, %arg2: i32) -> (i32, i32) {
    %c0_i32 = arith.constant 0 : i32
    return %arg0, %arg2 : i32, i32
  }
  func.func @transform_1(%arg0: i32, %arg1: i32, %arg2: i32) -> (i32, i32) {
    %c0_i32 = arith.constant 0 : i32
    return %arg2, %arg1 : i32, i32
  }
  func.func @transform_2(%arg0: i32, %arg1: i32, %arg2: i32) -> (i32, i32) {
    %c0_i32 = arith.constant 0 : i32
    %c0_i32_0 = arith.constant 0 : i32
    return %c0_i32, %arg1 : i32, i32
  }
  func.func @transform_3(%arg0: i32, %arg1: i32, %arg2: i32) -> (i32, i32) {
    %c0_i32 = arith.constant 0 : i32
    return %arg0, %arg1 : i32, i32
  }
  func.func @transform_4(%arg0: i32, %arg1: i32, %arg2: i32) -> (i32, i32) {
    %c0_i32 = arith.constant 0 : i32
    return %arg0, %arg1 : i32, i32
  }
}

module attributes {stable_mosaic.version = 11 : i64} {
  func.func @_ln_norm_kernel(%arg0: i32, %arg1: i32, %arg2: memref<1x8x32xf32, #tpu.memory_space<vmem>>, %arg3: memref<1x1x128xf32, #tpu.memory_space<vmem>>, %arg4: memref<1x1x128xf32, #tpu.memory_space<vmem>>, %arg5: memref<1x8x32xf32, #tpu.memory_space<vmem>>) attributes {dimension_semantics = [#tpu.dimension_semantics<parallel>, #tpu.dimension_semantics<parallel>], iteration_bounds = array<i64: 2, 1>, scalar_prefetch = 0 : i64, scratch_operands = 0 : i64, tpu.core_type = #tpu.core_type<tc>, window_params = [{transform_indices = @transform_0, window_bounds = array<i64: 1, 8, 32>}, {transform_indices = @transform_1, window_bounds = array<i64: 1, 1, 128>}, {transform_indices = @transform_2, window_bounds = array<i64: 1, 1, 128>}, {transform_indices = @transform_3, window_bounds = array<i64: 1, 8, 32>}]} {
    %c0 = arith.constant 0 : index
    %c0_0 = arith.constant 0 : index
    %c0_1 = arith.constant 0 : index
    %0 = vector.load %arg3[%c0, %c0_0, %c0_1] : memref<1x1x128xf32, #tpu.memory_space<vmem>>, vector<1x1x1xf32>
    %1 = vector.extract %0[0, 0, 0] : f32 from vector<1x1x1xf32>
    %cst = arith.constant 3.906250e-03 : f32
    %2 = arith.mulf %1, %cst : f32
    %c0_2 = arith.constant 0 : index
    %c0_3 = arith.constant 0 : index
    %c0_4 = arith.constant 0 : index
    %3 = vector.load %arg4[%c0_2, %c0_3, %c0_4] : memref<1x1x128xf32, #tpu.memory_space<vmem>>, vector<1x1x1xf32>
    %4 = vector.extract %3[0, 0, 0] : f32 from vector<1x1x1xf32>
    %cst_5 = arith.constant 3.906250e-03 : f32
    %5 = arith.mulf %4, %cst_5 : f32
    %6 = arith.mulf %2, %2 : f32
    %7 = arith.subf %5, %6 : f32
    %cst_6 = arith.constant 9.99999974E-6 : f32
    %8 = arith.addf %7, %cst_6 : f32
    %9 = math.rsqrt %8 : f32
    %c0_7 = arith.constant 0 : index
    %c0_8 = arith.constant 0 : index
    %c0_9 = arith.constant 0 : index
    %10 = vector.load %arg2[%c0_7, %c0_8, %c0_9] : memref<1x8x32xf32, #tpu.memory_space<vmem>>, vector<1x8x32xf32>
    %11 = vector.shape_cast %10 : vector<1x8x32xf32> to vector<8x32xf32>
    %12 = vector.broadcast %2 : f32 to vector<8x32xf32>
    %13 = arith.subf %11, %12 : vector<8x32xf32>
    %14 = vector.broadcast %9 : f32 to vector<8x32xf32>
    %15 = arith.mulf %13, %14 : vector<8x32xf32>
    %c0_10 = arith.constant 0 : index
    %c0_11 = arith.constant 0 : index
    %c0_12 = arith.constant 0 : index
    %16 = vector.load %arg5[%c0_10, %c0_11, %c0_12] : memref<1x8x32xf32, #tpu.memory_space<vmem>>, vector<1x8x32xf32>
    %17 = vector.shape_cast %16 : vector<1x8x32xf32> to vector<8x32xf32>
    %18 = vector.shape_cast %15 : vector<8x32xf32> to vector<1x8x32xf32>
    tpu.vector_store %arg5[%c0_10, %c0_11, %c0_12], %18 {strides = array<i32>} : memref<1x8x32xf32, #tpu.memory_space<vmem>>, vector<1x8x32xf32>,
    return
  }
  func.func @transform_0(%arg0: i32, %arg1: i32) -> (i32, i32, i32) {
    %c0_i32 = arith.constant 0 : i32
    %c0_i32_0 = arith.constant 0 : i32
    return %arg0, %arg1, %c0_i32 : i32, i32, i32
  }
  func.func @transform_1(%arg0: i32, %arg1: i32) -> (i32, i32, i32) {
    %c0_i32 = arith.constant 0 : i32
    %c0_i32_0 = arith.constant 0 : i32
    %c0_i32_1 = arith.constant 0 : i32
    return %arg0, %c0_i32, %c0_i32_0 : i32, i32, i32
  }
  func.func @transform_2(%arg0: i32, %arg1: i32) -> (i32, i32, i32) {
    %c0_i32 = arith.constant 0 : i32
    %c0_i32_0 = arith.constant 0 : i32
    %c0_i32_1 = arith.constant 0 : i32
    return %arg0, %c0_i32, %c0_i32_0 : i32, i32, i32
  }
  func.func @transform_3(%arg0: i32, %arg1: i32) -> (i32, i32, i32) {
    %c0_i32 = arith.constant 0 : i32
    %c0_i32_0 = arith.constant 0 : i32
    return %arg0, %arg1, %c0_i32 : i32, i32, i32
  }
}

module attributes {stable_mosaic.version = 11 : i64} {
  func.func @_linear_kernel(%arg0: i32, %arg1: i32, %arg2: i32, %arg3: memref<16x32xf32, #tpu.memory_space<vmem>>, %arg4: memref<32x32xf32, #tpu.memory_space<vmem>>, %arg5: memref<1x32xf32, #tpu.memory_space<vmem>>, %arg6: memref<16x32xf32, #tpu.memory_space<vmem>>, %arg7: memref<16x32xf32, #tpu.memory_space<vmem>>) attributes {dimension_semantics = [#tpu.dimension_semantics<parallel>, #tpu.dimension_semantics<parallel>, #tpu.dimension_semantics<arbitrary>], iteration_bounds = array<i64: 1, 1, 1>, scalar_prefetch = 0 : i64, scratch_operands = 1 : i64, tpu.core_type = #tpu.core_type<tc>, window_params = [{transform_indices = @transform_0, window_bounds = array<i64: 16, 32>}, {transform_indices = @transform_1, window_bounds = array<i64: 32, 32>}, {transform_indices = @transform_2, window_bounds = array<i64: 1, 32>}, {transform_indices = @transform_3, window_bounds = array<i64: 16, 32>}]} {
    %c0_i32 = arith.constant 0 : i32
    %0 = arith.cmpi eq, %arg2, %c0_i32 : i32
    %1 = arith.extui %0 : i1 to i32
    %c0_i32_0 = arith.constant 0 : i32
    %2 = arith.cmpi ne, %1, %c0_i32_0 : i32
    scf.if %2 {
      %cst_10 = arith.constant 0.000000e+00 : f32
      %12 = vector.broadcast %cst_10 : f32 to vector<16x32xf32>
      %c0_11 = arith.constant 0 : index
      %c0_12 = arith.constant 0 : index
      %13 = vector.load %arg7[%c0_11, %c0_12] : memref<16x32xf32, #tpu.memory_space<vmem>>, vector<16x32xf32>
      tpu.vector_store %arg7[%c0_11, %c0_12], %12 {strides = array<i32>} : memref<16x32xf32, #tpu.memory_space<vmem>>, vector<16x32xf32>,
    } else {
    }
    %c0 = arith.constant 0 : index
    %c0_1 = arith.constant 0 : index
    %3 = vector.load %arg7[%c0, %c0_1] : memref<16x32xf32, #tpu.memory_space<vmem>>, vector<16x32xf32>
    %c0_2 = arith.constant 0 : index
    %c0_3 = arith.constant 0 : index
    %4 = vector.load %arg3[%c0_2, %c0_3] : memref<16x32xf32, #tpu.memory_space<vmem>>, vector<16x32xf32>
    %c0_4 = arith.constant 0 : index
    %c0_5 = arith.constant 0 : index
    %5 = vector.load %arg4[%c0_4, %c0_5] : memref<32x32xf32, #tpu.memory_space<vmem>>, vector<32x32xf32>
    %cst = arith.constant dense<0.000000e+00> : vector<16x32xf32>
    %6 = tpu.matmul %4, %5, %cst {dimension_numbers = #tpu.dot_dimension_numbers<[1], [0], [0], [1], [0, 0, 1, 1], [], []>, precision = #tpu.contract_precision<fp32>} : vector<16x32xf32>, vector<32x32xf32>, vector<16x32xf32> -> vector<16x32xf32>
    %7 = arith.addf %3, %6 : vector<16x32xf32>
    %c0_6 = arith.constant 0 : index
    %c0_7 = arith.constant 0 : index
    %8 = vector.load %arg7[%c0_6, %c0_7] : memref<16x32xf32, #tpu.memory_space<vmem>>, vector<16x32xf32>
    tpu.vector_store %arg7[%c0_6, %c0_7], %7 {strides = array<i32>} : memref<16x32xf32, #tpu.memory_space<vmem>>, vector<16x32xf32>,
    %c0_i32_8 = arith.constant 0 : i32
    %9 = arith.cmpi eq, %arg2, %c0_i32_8 : i32
    %10 = arith.extui %9 : i1 to i32
    %c0_i32_9 = arith.constant 0 : i32
    %11 = arith.cmpi ne, %10, %c0_i32_9 : i32
    scf.if %11 {
      %c0_10 = arith.constant 0 : index
      %c0_11 = arith.constant 0 : index
      %12 = vector.load %arg7[%c0_10, %c0_11] : memref<16x32xf32, #tpu.memory_space<vmem>>, vector<16x32xf32>
      %c0_12 = arith.constant 0 : index
      %c0_13 = arith.constant 0 : index
      %13 = vector.load %arg5[%c0_12, %c0_13] : memref<1x32xf32, #tpu.memory_space<vmem>>, vector<1x32xf32>
      %14 = vector.broadcast %13 : vector<1x32xf32> to vector<16x32xf32>
      %15 = arith.addf %12, %14 : vector<16x32xf32>
      %c0_14 = arith.constant 0 : index
      %c0_15 = arith.constant 0 : index
      %16 = vector.load %arg6[%c0_14, %c0_15] : memref<16x32xf32, #tpu.memory_space<vmem>>, vector<16x32xf32>
      tpu.vector_store %arg6[%c0_14, %c0_15], %15 {strides = array<i32>} : memref<16x32xf32, #tpu.memory_space<vmem>>, vector<16x32xf32>,
    } else {
    }
    return
  }
  func.func @transform_0(%arg0: i32, %arg1: i32, %arg2: i32) -> (i32, i32) {
    %c0_i32 = arith.constant 0 : i32
    return %arg0, %arg2 : i32, i32
  }
  func.func @transform_1(%arg0: i32, %arg1: i32, %arg2: i32) -> (i32, i32) {
    %c0_i32 = arith.constant 0 : i32
    return %arg2, %arg1 : i32, i32
  }
  func.func @transform_2(%arg0: i32, %arg1: i32, %arg2: i32) -> (i32, i32) {
    %c0_i32 = arith.constant 0 : i32
    %c0_i32_0 = arith.constant 0 : i32
    return %c0_i32, %arg1 : i32, i32
  }
  func.func @transform_3(%arg0: i32, %arg1: i32, %arg2: i32) -> (i32, i32) {
    %c0_i32 = arith.constant 0 : i32
    return %arg0, %arg1 : i32, i32
  }
}

module attributes {stable_mosaic.version = 11 : i64} {
  func.func @_linear_kernel(%arg0: i32, %arg1: i32, %arg2: i32, %arg3: memref<32x32xf32, #tpu.memory_space<vmem>>, %arg4: memref<32x64xf32, #tpu.memory_space<vmem>>, %arg5: memref<1x64xf32, #tpu.memory_space<vmem>>, %arg6: memref<32x64xf32, #tpu.memory_space<vmem>>, %arg7: memref<32x64xf32, #tpu.memory_space<vmem>>) attributes {dimension_semantics = [#tpu.dimension_semantics<parallel>, #tpu.dimension_semantics<parallel>, #tpu.dimension_semantics<arbitrary>], iteration_bounds = array<i64: 1, 1, 1>, scalar_prefetch = 0 : i64, scratch_operands = 1 : i64, tpu.core_type = #tpu.core_type<tc>, window_params = [{transform_indices = @transform_0, window_bounds = array<i64: 32, 32>}, {transform_indices = @transform_1, window_bounds = array<i64: 32, 64>}, {transform_indices = @transform_2, window_bounds = array<i64: 1, 64>}, {transform_indices = @transform_3, window_bounds = array<i64: 32, 64>}]} {
    %c0_i32 = arith.constant 0 : i32
    %0 = arith.cmpi eq, %arg2, %c0_i32 : i32
    %1 = arith.extui %0 : i1 to i32
    %c0_i32_0 = arith.constant 0 : i32
    %2 = arith.cmpi ne, %1, %c0_i32_0 : i32
    scf.if %2 {
      %cst_10 = arith.constant 0.000000e+00 : f32
      %12 = vector.broadcast %cst_10 : f32 to vector<32x64xf32>
      %c0_11 = arith.constant 0 : index
      %c0_12 = arith.constant 0 : index
      %13 = vector.load %arg7[%c0_11, %c0_12] : memref<32x64xf32, #tpu.memory_space<vmem>>, vector<32x64xf32>
      tpu.vector_store %arg7[%c0_11, %c0_12], %12 {strides = array<i32>} : memref<32x64xf32, #tpu.memory_space<vmem>>, vector<32x64xf32>,
    } else {
    }
    %c0 = arith.constant 0 : index
    %c0_1 = arith.constant 0 : index
    %3 = vector.load %arg7[%c0, %c0_1] : memref<32x64xf32, #tpu.memory_space<vmem>>, vector<32x64xf32>
    %c0_2 = arith.constant 0 : index
    %c0_3 = arith.constant 0 : index
    %4 = vector.load %arg3[%c0_2, %c0_3] : memref<32x32xf32, #tpu.memory_space<vmem>>, vector<32x32xf32>
    %c0_4 = arith.constant 0 : index
    %c0_5 = arith.constant 0 : index
    %5 = vector.load %arg4[%c0_4, %c0_5] : memref<32x64xf32, #tpu.memory_space<vmem>>, vector<32x64xf32>
    %cst = arith.constant dense<0.000000e+00> : vector<32x64xf32>
    %6 = tpu.matmul %4, %5, %cst {dimension_numbers = #tpu.dot_dimension_numbers<[1], [0], [0], [1], [0, 0, 1, 1], [], []>, precision = #tpu.contract_precision<fp32>} : vector<32x32xf32>, vector<32x64xf32>, vector<32x64xf32> -> vector<32x64xf32>
    %7 = arith.addf %3, %6 : vector<32x64xf32>
    %c0_6 = arith.constant 0 : index
    %c0_7 = arith.constant 0 : index
    %8 = vector.load %arg7[%c0_6, %c0_7] : memref<32x64xf32, #tpu.memory_space<vmem>>, vector<32x64xf32>
    tpu.vector_store %arg7[%c0_6, %c0_7], %7 {strides = array<i32>} : memref<32x64xf32, #tpu.memory_space<vmem>>, vector<32x64xf32>,
    %c0_i32_8 = arith.constant 0 : i32
    %9 = arith.cmpi eq, %arg2, %c0_i32_8 : i32
    %10 = arith.extui %9 : i1 to i32
    %c0_i32_9 = arith.constant 0 : i32
    %11 = arith.cmpi ne, %10, %c0_i32_9 : i32
    scf.if %11 {
      %c0_10 = arith.constant 0 : index
      %c0_11 = arith.constant 0 : index
      %12 = vector.load %arg7[%c0_10, %c0_11] : memref<32x64xf32, #tpu.memory_space<vmem>>, vector<32x64xf32>
      %c0_12 = arith.constant 0 : index
      %c0_13 = arith.constant 0 : index
      %13 = vector.load %arg5[%c0_12, %c0_13] : memref<1x64xf32, #tpu.memory_space<vmem>>, vector<1x64xf32>
      %14 = vector.broadcast %13 : vector<1x64xf32> to vector<32x64xf32>
      %15 = arith.addf %12, %14 : vector<32x64xf32>
      %c0_14 = arith.constant 0 : index
      %c0_15 = arith.constant 0 : index
      %16 = vector.load %arg6[%c0_14, %c0_15] : memref<32x64xf32, #tpu.memory_space<vmem>>, vector<32x64xf32>
      tpu.vector_store %arg6[%c0_14, %c0_15], %15 {strides = array<i32>} : memref<32x64xf32, #tpu.memory_space<vmem>>, vector<32x64xf32>,
    } else {
    }
    return
  }
  func.func @transform_0(%arg0: i32, %arg1: i32, %arg2: i32) -> (i32, i32) {
    %c0_i32 = arith.constant 0 : i32
    return %arg0, %arg2 : i32, i32
  }
  func.func @transform_1(%arg0: i32, %arg1: i32, %arg2: i32) -> (i32, i32) {
    %c0_i32 = arith.constant 0 : i32
    return %arg2, %arg1 : i32, i32
  }
  func.func @transform_2(%arg0: i32, %arg1: i32, %arg2: i32) -> (i32, i32) {
    %c0_i32 = arith.constant 0 : i32
    %c0_i32_0 = arith.constant 0 : i32
    return %c0_i32, %arg1 : i32, i32
  }
  func.func @transform_3(%arg0: i32, %arg1: i32, %arg2: i32) -> (i32, i32) {
    %c0_i32 = arith.constant 0 : i32
    return %arg0, %arg1 : i32, i32
  }
}

module attributes {stable_mosaic.version = 11 : i64} {
  func.func @_linear_kernel(%arg0: i32, %arg1: i32, %arg2: i32, %arg3: memref<16x32xf32, #tpu.memory_space<vmem>>, %arg4: memref<32x64xf32, #tpu.memory_space<vmem>>, %arg5: memref<1x64xf32, #tpu.memory_space<vmem>>, %arg6: memref<16x64xf32, #tpu.memory_space<vmem>>, %arg7: memref<16x64xf32, #tpu.memory_space<vmem>>) attributes {dimension_semantics = [#tpu.dimension_semantics<parallel>, #tpu.dimension_semantics<parallel>, #tpu.dimension_semantics<arbitrary>], iteration_bounds = array<i64: 1, 1, 1>, scalar_prefetch = 0 : i64, scratch_operands = 1 : i64, tpu.core_type = #tpu.core_type<tc>, window_params = [{transform_indices = @transform_0, window_bounds = array<i64: 16, 32>}, {transform_indices = @transform_1, window_bounds = array<i64: 32, 64>}, {transform_indices = @transform_2, window_bounds = array<i64: 1, 64>}, {transform_indices = @transform_3, window_bounds = array<i64: 16, 64>}]} {
    %c0_i32 = arith.constant 0 : i32
    %0 = arith.cmpi eq, %arg2, %c0_i32 : i32
    %1 = arith.extui %0 : i1 to i32
    %c0_i32_0 = arith.constant 0 : i32
    %2 = arith.cmpi ne, %1, %c0_i32_0 : i32
    scf.if %2 {
      %cst_10 = arith.constant 0.000000e+00 : f32
      %12 = vector.broadcast %cst_10 : f32 to vector<16x64xf32>
      %c0_11 = arith.constant 0 : index
      %c0_12 = arith.constant 0 : index
      %13 = vector.load %arg7[%c0_11, %c0_12] : memref<16x64xf32, #tpu.memory_space<vmem>>, vector<16x64xf32>
      tpu.vector_store %arg7[%c0_11, %c0_12], %12 {strides = array<i32>} : memref<16x64xf32, #tpu.memory_space<vmem>>, vector<16x64xf32>,
    } else {
    }
    %c0 = arith.constant 0 : index
    %c0_1 = arith.constant 0 : index
    %3 = vector.load %arg7[%c0, %c0_1] : memref<16x64xf32, #tpu.memory_space<vmem>>, vector<16x64xf32>
    %c0_2 = arith.constant 0 : index
    %c0_3 = arith.constant 0 : index
    %4 = vector.load %arg3[%c0_2, %c0_3] : memref<16x32xf32, #tpu.memory_space<vmem>>, vector<16x32xf32>
    %c0_4 = arith.constant 0 : index
    %c0_5 = arith.constant 0 : index
    %5 = vector.load %arg4[%c0_4, %c0_5] : memref<32x64xf32, #tpu.memory_space<vmem>>, vector<32x64xf32>
    %cst = arith.constant dense<0.000000e+00> : vector<16x64xf32>
    %6 = tpu.matmul %4, %5, %cst {dimension_numbers = #tpu.dot_dimension_numbers<[1], [0], [0], [1], [0, 0, 1, 1], [], []>, precision = #tpu.contract_precision<fp32>} : vector<16x32xf32>, vector<32x64xf32>, vector<16x64xf32> -> vector<16x64xf32>
    %7 = arith.addf %3, %6 : vector<16x64xf32>
    %c0_6 = arith.constant 0 : index
    %c0_7 = arith.constant 0 : index
    %8 = vector.load %arg7[%c0_6, %c0_7] : memref<16x64xf32, #tpu.memory_space<vmem>>, vector<16x64xf32>
    tpu.vector_store %arg7[%c0_6, %c0_7], %7 {strides = array<i32>} : memref<16x64xf32, #tpu.memory_space<vmem>>, vector<16x64xf32>,
    %c0_i32_8 = arith.constant 0 : i32
    %9 = arith.cmpi eq, %arg2, %c0_i32_8 : i32
    %10 = arith.extui %9 : i1 to i32
    %c0_i32_9 = arith.constant 0 : i32
    %11 = arith.cmpi ne, %10, %c0_i32_9 : i32
    scf.if %11 {
      %c0_10 = arith.constant 0 : index
      %c0_11 = arith.constant 0 : index
      %12 = vector.load %arg7[%c0_10, %c0_11] : memref<16x64xf32, #tpu.memory_space<vmem>>, vector<16x64xf32>
      %c0_12 = arith.constant 0 : index
      %c0_13 = arith.constant 0 : index
      %13 = vector.load %arg5[%c0_12, %c0_13] : memref<1x64xf32, #tpu.memory_space<vmem>>, vector<1x64xf32>
      %14 = vector.broadcast %13 : vector<1x64xf32> to vector<16x64xf32>
      %15 = arith.addf %12, %14 : vector<16x64xf32>
      %cst_14 = arith.constant 0.000000e+00 : f32
      %16 = vector.broadcast %cst_14 : f32 to vector<16x64xf32>
      %17 = arith.maximumf %15, %16 : vector<16x64xf32>
      %c0_15 = arith.constant 0 : index
      %c0_16 = arith.constant 0 : index
      %18 = vector.load %arg6[%c0_15, %c0_16] : memref<16x64xf32, #tpu.memory_space<vmem>>, vector<16x64xf32>
      tpu.vector_store %arg6[%c0_15, %c0_16], %17 {strides = array<i32>} : memref<16x64xf32, #tpu.memory_space<vmem>>, vector<16x64xf32>,
    } else {
    }
    return
  }
  func.func @transform_0(%arg0: i32, %arg1: i32, %arg2: i32) -> (i32, i32) {
    %c0_i32 = arith.constant 0 : i32
    return %arg0, %arg2 : i32, i32
  }
  func.func @transform_1(%arg0: i32, %arg1: i32, %arg2: i32) -> (i32, i32) {
    %c0_i32 = arith.constant 0 : i32
    return %arg2, %arg1 : i32, i32
  }
  func.func @transform_2(%arg0: i32, %arg1: i32, %arg2: i32) -> (i32, i32) {
    %c0_i32 = arith.constant 0 : i32
    %c0_i32_0 = arith.constant 0 : i32
    return %c0_i32, %arg1 : i32, i32
  }
  func.func @transform_3(%arg0: i32, %arg1: i32, %arg2: i32) -> (i32, i32) {
    %c0_i32 = arith.constant 0 : i32
    return %arg0, %arg1 : i32, i32
  }
}

module attributes {stable_mosaic.version = 11 : i64} {
  func.func @_mha_kernel(%arg0: i32, %arg1: i32, %arg2: i32, %arg3: i32, %arg4: memref<1x1x8x8xf32, #tpu.memory_space<vmem>>, %arg5: memref<1x1x16x8xf32, #tpu.memory_space<vmem>>, %arg6: memref<1x1x16x8xf32, #tpu.memory_space<vmem>>, %arg7: memref<1x16x8xi8, #tpu.memory_space<vmem>>, %arg8: memref<1x1x8x8xf32, #tpu.memory_space<vmem>>, %arg9: memref<1x8xf32, #tpu.memory_space<vmem>>, %arg10: memref<1x8xf32, #tpu.memory_space<vmem>>, %arg11: memref<8x8xf32, #tpu.memory_space<vmem>>) attributes {dimension_semantics = [#tpu.dimension_semantics<parallel>, #tpu.dimension_semantics<parallel>, #tpu.dimension_semantics<parallel>, #tpu.dimension_semantics<arbitrary>], iteration_bounds = array<i64: 2, 4, 1, 1>, scalar_prefetch = 0 : i64, scratch_operands = 3 : i64, tpu.core_type = #tpu.core_type<tc>, window_params = [{transform_indices = @transform_0, window_bounds = array<i64: 1, 1, 8, 8>}, {transform_indices = @transform_1, window_bounds = array<i64: 1, 1, 16, 8>}, {transform_indices = @transform_2, window_bounds = array<i64: 1, 1, 16, 8>}, {transform_indices = @transform_3, window_bounds = array<i64: 1, 16, 8>}, {transform_indices = @transform_4, window_bounds = array<i64: 1, 1, 8, 8>}]} {
    %c0_i32 = arith.constant 0 : i32
    %0 = arith.cmpi eq, %arg3, %c0_i32 : i32
    %1 = arith.extui %0 : i1 to i32
    %c0_i32_0 = arith.constant 0 : i32
    %2 = arith.cmpi ne, %1, %c0_i32_0 : i32
    scf.if %2 {
      %cst_34 = arith.constant 0xFF800000 : f32
      %43 = vector.broadcast %cst_34 : f32 to vector<1x8xf32>
      %c0_35 = arith.constant 0 : index
      %c0_36 = arith.constant 0 : index
      %44 = vector.load %arg9[%c0_35, %c0_36] : memref<1x8xf32, #tpu.memory_space<vmem>>, vector<1x8xf32>
      tpu.vector_store %arg9[%c0_35, %c0_36], %43 {strides = array<i32>} : memref<1x8xf32, #tpu.memory_space<vmem>>, vector<1x8xf32>,
      %cst_37 = arith.constant 0.000000e+00 : f32
      %45 = vector.broadcast %cst_37 : f32 to vector<1x8xf32>
      %c0_38 = arith.constant 0 : index
      %c0_39 = arith.constant 0 : index
      %46 = vector.load %arg10[%c0_38, %c0_39] : memref<1x8xf32, #tpu.memory_space<vmem>>, vector<1x8xf32>
      tpu.vector_store %arg10[%c0_38, %c0_39], %45 {strides = array<i32>} : memref<1x8xf32, #tpu.memory_space<vmem>>, vector<1x8xf32>,
      %cst_40 = arith.constant 0.000000e+00 : f32
      %47 = vector.broadcast %cst_40 : f32 to vector<8x8xf32>
      %c0_41 = arith.constant 0 : index
      %c0_42 = arith.constant 0 : index
      %48 = vector.load %arg11[%c0_41, %c0_42] : memref<8x8xf32, #tpu.memory_space<vmem>>, vector<8x8xf32>
      tpu.vector_store %arg11[%c0_41, %c0_42], %47 {strides = array<i32>} : memref<8x8xf32, #tpu.memory_space<vmem>>, vector<8x8xf32>,
    } else {
    }
    %c0 = arith.constant 0 : index
    %c0_1 = arith.constant 0 : index
    %c0_2 = arith.constant 0 : index
    %c0_3 = arith.constant 0 : index
    %3 = vector.load %arg4[%c0, %c0_1, %c0_2, %c0_3] : memref<1x1x8x8xf32, #tpu.memory_space<vmem>>, vector<1x1x8x8xf32>
    %4 = vector.shape_cast %3 : vector<1x1x8x8xf32> to vector<8x8xf32>
    %cst = arith.constant 0.353553385 : f32
    %5 = vector.broadcast %cst : f32 to vector<8x8xf32>
    %6 = arith.mulf %4, %5 : vector<8x8xf32>
    %c0_4 = arith.constant 0 : index
    %c0_5 = arith.constant 0 : index
    %c0_6 = arith.constant 0 : index
    %c0_7 = arith.constant 0 : index
    %7 = vector.load %arg5[%c0_4, %c0_5, %c0_6, %c0_7] : memref<1x1x16x8xf32, #tpu.memory_space<vmem>>, vector<1x1x16x8xf32>
    %8 = vector.shape_cast %7 : vector<1x1x16x8xf32> to vector<16x8xf32>
    %cst_8 = arith.constant dense<0.000000e+00> : vector<16x8xf32>
    %9 = tpu.matmul %8, %6, %cst_8 {dimension_numbers = #tpu.dot_dimension_numbers<[1], [1], [0], [0], [0, 0, 1, 0], [], []>, precision = #tpu.contract_precision<fp32>} : vector<16x8xf32>, vector<8x8xf32>, vector<16x8xf32> -> vector<16x8xf32>
    %c0_9 = arith.constant 0 : index
    %c0_10 = arith.constant 0 : index
    %c0_11 = arith.constant 0 : index
    %10 = vector.load %arg7[%c0_9, %c0_10, %c0_11] : memref<1x16x8xi8, #tpu.memory_space<vmem>>, vector<1x16x8xi8>
    %11 = vector.shape_cast %10 : vector<1x16x8xi8> to vector<16x8xi8>
    %c0_i8 = arith.constant 0 : i8
    %12 = vector.broadcast %c0_i8 : i8 to vector<16x8xi8>
    %13 = arith.cmpi ne, %11, %12 : vector<16x8xi8>
    %cst_12 = arith.constant -1.000000e+09 : f32
    %14 = vector.broadcast %cst_12 : f32 to vector<16x8xf32>
    %15 = arith.select %13, %9, %14 : vector<16x8xi1>, vector<16x8xf32>
    %c0_13 = arith.constant 0 : index
    %c0_14 = arith.constant 0 : index
    %16 = vector.load %arg9[%c0_13, %c0_14] : memref<1x8xf32, #tpu.memory_space<vmem>>, vector<1x8xf32>
    %cst_15 = arith.constant dense<0xFF800000> : vector<8xf32>
    %17 = vector.multi_reduction <maximumf>, %15, %cst_15 [0] : vector<16x8xf32> to vector<8xf32>
    %18 = vector.shape_cast %17 : vector<8xf32> to vector<1x8xf32>
    %19 = arith.maximumf %16, %18 : vector<1x8xf32>
    %20 = arith.subf %16, %19 : vector<1x8xf32>
    %21 = math.exp %20 : vector<1x8xf32>
    %22 = vector.broadcast %19 : vector<1x8xf32> to vector<16x8xf32>
    %23 = arith.subf %15, %22 : vector<16x8xf32>
    %24 = math.exp %23 : vector<16x8xf32>
    %c0_16 = arith.constant 0 : index
    %c0_17 = arith.constant 0 : index
    %25 = vector.load %arg10[%c0_16, %c0_17] : memref<1x8xf32, #tpu.memory_space<vmem>>, vector<1x8xf32>
    %26 = arith.mulf %21, %25 : vector<1x8xf32>
    %cst_18 = arith.constant dense<0.000000e+00> : vector<8xf32>
    %27 = vector.multi_reduction <add>, %24, %cst_18 [0] : vector<16x8xf32> to vector<8xf32>
    %28 = vector.shape_cast %27 : vector<8xf32> to vector<1x8xf32>
    %29 = arith.addf %26, %28 : vector<1x8xf32>
    %c0_19 = arith.constant 0 : index
    %c0_20 = arith.constant 0 : index
    %30 = vector.load %arg10[%c0_19, %c0_20] : memref<1x8xf32, #tpu.memory_space<vmem>>, vector<1x8xf32>
    tpu.vector_store %arg10[%c0_19, %c0_20], %29 {strides = array<i32>} : memref<1x8xf32, #tpu.memory_space<vmem>>, vector<1x8xf32>,
    %c0_21 = arith.constant 0 : index
    %c0_22 = arith.constant 0 : index
    %c0_23 = arith.constant 0 : index
    %c0_24 = arith.constant 0 : index
    %31 = vector.load %arg6[%c0_21, %c0_22, %c0_23, %c0_24] : memref<1x1x16x8xf32, #tpu.memory_space<vmem>>, vector<1x1x16x8xf32>
    %32 = vector.shape_cast %31 : vector<1x1x16x8xf32> to vector<16x8xf32>
    %cst_25 = arith.constant dense<0.000000e+00> : vector<8x8xf32>
    %33 = tpu.matmul %32, %24, %cst_25 {dimension_numbers = #tpu.dot_dimension_numbers<[0], [0], [1], [1], [0, 1, 1, 1], [], []>, precision = #tpu.contract_precision<fp32>} : vector<16x8xf32>, vector<16x8xf32>, vector<8x8xf32> -> vector<8x8xf32>
    %c0_26 = arith.constant 0 : index
    %c0_27 = arith.constant 0 : index
    %34 = vector.load %arg11[%c0_26, %c0_27] : memref<8x8xf32, #tpu.memory_space<vmem>>, vector<8x8xf32>
    %35 = vector.broadcast %21 : vector<1x8xf32> to vector<8x8xf32>
    %36 = arith.mulf %35, %34 : vector<8x8xf32>
    %37 = arith.addf %36, %33 : vector<8x8xf32>
    %c0_28 = arith.constant 0 : index
    %c0_29 = arith.constant 0 : index
    %38 = vector.load %arg11[%c0_28, %c0_29] : memref<8x8xf32, #tpu.memory_space<vmem>>, vector<8x8xf32>
    tpu.vector_store %arg11[%c0_28, %c0_29], %37 {strides = array<i32>} : memref<8x8xf32, #tpu.memory_space<vmem>>, vector<8x8xf32>,
    %c0_30 = arith.constant 0 : index
    %c0_31 = arith.constant 0 : index
    %39 = vector.load %arg9[%c0_30, %c0_31] : memref<1x8xf32, #tpu.memory_space<vmem>>, vector<1x8xf32>
    tpu.vector_store %arg9[%c0_30, %c0_31], %19 {strides = array<i32>} : memref<1x8xf32, #tpu.memory_space<vmem>>, vector<1x8xf32>,
    %c0_i32_32 = arith.constant 0 : i32
    %40 = arith.cmpi eq, %arg3, %c0_i32_32 : i32
    %41 = arith.extui %40 : i1 to i32
    %c0_i32_33 = arith.constant 0 : i32
    %42 = arith.cmpi ne, %41, %c0_i32_33 : i32
    scf.if %42 {
      %c0_34 = arith.constant 0 : index
      %c0_35 = arith.constant 0 : index
      %43 = vector.load %arg10[%c0_34, %c0_35] : memref<1x8xf32, #tpu.memory_space<vmem>>, vector<1x8xf32>
      %44 = tpu.reciprocal %43 {approx = true} : vector<1x8xf32> -> vector<1x8xf32>
      %c0_36 = arith.constant 0 : index
      %c0_37 = arith.constant 0 : index
      %45 = vector.load %arg11[%c0_36, %c0_37] : memref<8x8xf32, #tpu.memory_space<vmem>>, vector<8x8xf32>
      %46 = vector.broadcast %44 : vector<1x8xf32> to vector<8x8xf32>
      %47 = arith.mulf %45, %46 : vector<8x8xf32>
      %c0_38 = arith.constant 0 : index
      %c0_39 = arith.constant 0 : index
      %c0_40 = arith.constant 0 : index
      %c0_41 = arith.constant 0 : index
      %48 = vector.load %arg8[%c0_38, %c0_39, %c0_40, %c0_41] : memref<1x1x8x8xf32, #tpu.memory_space<vmem>>, vector<1x1x8x8xf32>
      %49 = vector.shape_cast %48 : vector<1x1x8x8xf32> to vector<8x8xf32>
      %50 = vector.shape_cast %47 : vector<8x8xf32> to vector<1x1x8x8xf32>
      tpu.vector_store %arg8[%c0_38, %c0_39, %c0_40, %c0_41], %50 {strides = array<i32>} : memref<1x1x8x8xf32, #tpu.memory_space<vmem>>, vector<1x1x8x8xf32>,
    } else {
    }
    return
  }
  func.func @transform_0(%arg0: i32, %arg1: i32, %arg2: i32, %arg3: i32) -> (i32, i32, i32, i32) {
    %c0_i32 = arith.constant 0 : i32
    %c0_i32_0 = arith.constant 0 : i32
    return %arg0, %arg1, %arg2, %c0_i32 : i32, i32, i32, i32
  }
  func.func @transform_1(%arg0: i32, %arg1: i32, %arg2: i32, %arg3: i32) -> (i32, i32, i32, i32) {
    %c0_i32 = arith.constant 0 : i32
    %c0_i32_0 = arith.constant 0 : i32
    return %arg0, %arg1, %arg3, %c0_i32 : i32, i32, i32, i32
  }
  func.func @transform_2(%arg0: i32, %arg1: i32, %arg2: i32, %arg3: i32) -> (i32, i32, i32, i32) {
    %c0_i32 = arith.constant 0 : i32
    %c0_i32_0 = arith.constant 0 : i32
    return %arg0, %arg1, %arg3, %c0_i32 : i32, i32, i32, i32
  }
  func.func @transform_3(%arg0: i32, %arg1: i32, %arg2: i32, %arg3: i32) -> (i32, i32, i32) {
    %c0_i32 = arith.constant 0 : i32
    return %arg0, %arg3, %arg2 : i32, i32, i32
  }
  func.func @transform_4(%arg0: i32, %arg1: i32, %arg2: i32, %arg3: i32) -> (i32, i32, i32, i32) {
    %c0_i32 = arith.constant 0 : i32
    %c0_i32_0 = arith.constant 0 : i32
    return %arg0, %arg1, %c0_i32, %arg2 : i32, i32, i32, i32
  }
}

module attributes {stable_mosaic.version = 11 : i64} {
  func.func @_linear_kernel(%arg0: i32, %arg1: i32, %arg2: i32, %arg3: memref<16x64xf32, #tpu.memory_space<vmem>>, %arg4: memref<64x32xf32, #tpu.memory_space<vmem>>, %arg5: memref<1x32xf32, #tpu.memory_space<vmem>>, %arg6: memref<16x32xf32, #tpu.memory_space<vmem>>, %arg7: memref<16x32xf32, #tpu.memory_space<vmem>>, %arg8: memref<16x32xf32, #tpu.memory_space<vmem>>) attributes {dimension_semantics = [#tpu.dimension_semantics<parallel>, #tpu.dimension_semantics<parallel>, #tpu.dimension_semantics<arbitrary>], iteration_bounds = array<i64: 1, 1, 1>, scalar_prefetch = 0 : i64, scratch_operands = 1 : i64, tpu.core_type = #tpu.core_type<tc>, window_params = [{transform_indices = @transform_0, window_bounds = array<i64: 16, 64>}, {transform_indices = @transform_1, window_bounds = array<i64: 64, 32>}, {transform_indices = @transform_2, window_bounds = array<i64: 1, 32>}, {transform_indices = @transform_3, window_bounds = array<i64: 16, 32>}, {transform_indices = @transform_4, window_bounds = array<i64: 16, 32>}]} {
    %c0_i32 = arith.constant 0 : i32
    %0 = arith.cmpi eq, %arg2, %c0_i32 : i32
    %1 = arith.extui %0 : i1 to i32
    %c0_i32_0 = arith.constant 0 : i32
    %2 = arith.cmpi ne, %1, %c0_i32_0 : i32
    scf.if %2 {
      %cst_10 = arith.constant 0.000000e+00 : f32
      %12 = vector.broadcast %cst_10 : f32 to vector<16x32xf32>
      %c0_11 = arith.constant 0 : index
      %c0_12 = arith.constant 0 : index
      %13 = vector.load %arg8[%c0_11, %c0_12] : memref<16x32xf32, #tpu.memory_space<vmem>>, vector<16x32xf32>
      tpu.vector_store %arg8[%c0_11, %c0_12], %12 {strides = array<i32>} : memref<16x32xf32, #tpu.memory_space<vmem>>, vector<16x32xf32>,
    } else {
    }
    %c0 = arith.constant 0 : index
    %c0_1 = arith.constant 0 : index
    %3 = vector.load %arg8[%c0, %c0_1] : memref<16x32xf32, #tpu.memory_space<vmem>>, vector<16x32xf32>
    %c0_2 = arith.constant 0 : index
    %c0_3 = arith.constant 0 : index
    %4 = vector.load %arg3[%c0_2, %c0_3] : memref<16x64xf32, #tpu.memory_space<vmem>>, vector<16x64xf32>
    %c0_4 = arith.constant 0 : index
    %c0_5 = arith.constant 0 : index
    %5 = vector.load %arg4[%c0_4, %c0_5] : memref<64x32xf32, #tpu.memory_space<vmem>>, vector<64x32xf32>
    %cst = arith.constant dense<0.000000e+00> : vector<16x32xf32>
    %6 = tpu.matmul %4, %5, %cst {dimension_numbers = #tpu.dot_dimension_numbers<[1], [0], [0], [1], [0, 0, 1, 1], [], []>, precision = #tpu.contract_precision<fp32>} : vector<16x64xf32>, vector<64x32xf32>, vector<16x32xf32> -> vector<16x32xf32>
    %7 = arith.addf %3, %6 : vector<16x32xf32>
    %c0_6 = arith.constant 0 : index
    %c0_7 = arith.constant 0 : index
    %8 = vector.load %arg8[%c0_6, %c0_7] : memref<16x32xf32, #tpu.memory_space<vmem>>, vector<16x32xf32>
    tpu.vector_store %arg8[%c0_6, %c0_7], %7 {strides = array<i32>} : memref<16x32xf32, #tpu.memory_space<vmem>>, vector<16x32xf32>,
    %c0_i32_8 = arith.constant 0 : i32
    %9 = arith.cmpi eq, %arg2, %c0_i32_8 : i32
    %10 = arith.extui %9 : i1 to i32
    %c0_i32_9 = arith.constant 0 : i32
    %11 = arith.cmpi ne, %10, %c0_i32_9 : i32
    scf.if %11 {
      %c0_10 = arith.constant 0 : index
      %c0_11 = arith.constant 0 : index
      %12 = vector.load %arg8[%c0_10, %c0_11] : memref<16x32xf32, #tpu.memory_space<vmem>>, vector<16x32xf32>
      %c0_12 = arith.constant 0 : index
      %c0_13 = arith.constant 0 : index
      %13 = vector.load %arg5[%c0_12, %c0_13] : memref<1x32xf32, #tpu.memory_space<vmem>>, vector<1x32xf32>
      %14 = vector.broadcast %13 : vector<1x32xf32> to vector<16x32xf32>
      %15 = arith.addf %12, %14 : vector<16x32xf32>
      %c0_14 = arith.constant 0 : index
      %c0_15 = arith.constant 0 : index
      %16 = vector.load %arg6[%c0_14, %c0_15] : memref<16x32xf32, #tpu.memory_space<vmem>>, vector<16x32xf32>
      %17 = arith.addf %15, %16 : vector<16x32xf32>
      %c0_16 = arith.constant 0 : index
      %c0_17 = arith.constant 0 : index
      %18 = vector.load %arg7[%c0_16, %c0_17] : memref<16x32xf32, #tpu.memory_space<vmem>>, vector<16x32xf32>
      tpu.vector_store %arg7[%c0_16, %c0_17], %17 {strides = array<i32>} : memref<16x32xf32, #tpu.memory_space<vmem>>, vector<16x32xf32>,
    } else {
    }
    return
  }
  func.func @transform_0(%arg0: i32, %arg1: i32, %arg2: i32) -> (i32, i32) {
    %c0_i32 = arith.constant 0 : i32
    return %arg0, %arg2 : i32, i32
  }
  func.func @transform_1(%arg0: i32, %arg1: i32, %arg2: i32) -> (i32, i32) {
    %c0_i32 = arith.constant 0 : i32
    return %arg2, %arg1 : i32, i32
  }
  func.func @transform_2(%arg0: i32, %arg1: i32, %arg2: i32) -> (i32, i32) {
    %c0_i32 = arith.constant 0 : i32
    %c0_i32_0 = arith.constant 0 : i32
    return %c0_i32, %arg1 : i32, i32
  }
  func.func @transform_3(%arg0: i32, %arg1: i32, %arg2: i32) -> (i32, i32) {
    %c0_i32 = arith.constant 0 : i32
    return %arg0, %arg1 : i32, i32
  }
  func.func @transform_4(%arg0: i32, %arg1: i32, %arg2: i32) -> (i32, i32) {
    %c0_i32 = arith.constant 0 : i32
    return %arg0, %arg1 : i32, i32
  }
}

module attributes {stable_mosaic.version = 11 : i64} {
  func.func @_ln_norm_kernel(%arg0: i32, %arg1: i32, %arg2: memref<1x8x32xf32, #tpu.memory_space<vmem>>, %arg3: memref<1x1x128xf32, #tpu.memory_space<vmem>>, %arg4: memref<1x1x128xf32, #tpu.memory_space<vmem>>, %arg5: memref<1x8x32xf32, #tpu.memory_space<vmem>>) attributes {dimension_semantics = [#tpu.dimension_semantics<parallel>, #tpu.dimension_semantics<parallel>], iteration_bounds = array<i64: 2, 1>, scalar_prefetch = 0 : i64, scratch_operands = 0 : i64, tpu.core_type = #tpu.core_type<tc>, window_params = [{transform_indices = @transform_0, window_bounds = array<i64: 1, 8, 32>}, {transform_indices = @transform_1, window_bounds = array<i64: 1, 1, 128>}, {transform_indices = @transform_2, window_bounds = array<i64: 1, 1, 128>}, {transform_indices = @transform_3, window_bounds = array<i64: 1, 8, 32>}]} {
    %c0 = arith.constant 0 : index
    %c0_0 = arith.constant 0 : index
    %c0_1 = arith.constant 0 : index
    %0 = vector.load %arg3[%c0, %c0_0, %c0_1] : memref<1x1x128xf32, #tpu.memory_space<vmem>>, vector<1x1x1xf32>
    %1 = vector.extract %0[0, 0, 0] : f32 from vector<1x1x1xf32>
    %cst = arith.constant 3.906250e-03 : f32
    %2 = arith.mulf %1, %cst : f32
    %c0_2 = arith.constant 0 : index
    %c0_3 = arith.constant 0 : index
    %c0_4 = arith.constant 0 : index
    %3 = vector.load %arg4[%c0_2, %c0_3, %c0_4] : memref<1x1x128xf32, #tpu.memory_space<vmem>>, vector<1x1x1xf32>
    %4 = vector.extract %3[0, 0, 0] : f32 from vector<1x1x1xf32>
    %cst_5 = arith.constant 3.906250e-03 : f32
    %5 = arith.mulf %4, %cst_5 : f32
    %6 = arith.mulf %2, %2 : f32
    %7 = arith.subf %5, %6 : f32
    %cst_6 = arith.constant 9.99999974E-6 : f32
    %8 = arith.addf %7, %cst_6 : f32
    %9 = math.rsqrt %8 : f32
    %c0_7 = arith.constant 0 : index
    %c0_8 = arith.constant 0 : index
    %c0_9 = arith.constant 0 : index
    %10 = vector.load %arg2[%c0_7, %c0_8, %c0_9] : memref<1x8x32xf32, #tpu.memory_space<vmem>>, vector<1x8x32xf32>
    %11 = vector.shape_cast %10 : vector<1x8x32xf32> to vector<8x32xf32>
    %12 = vector.broadcast %2 : f32 to vector<8x32xf32>
    %13 = arith.subf %11, %12 : vector<8x32xf32>
    %14 = vector.broadcast %9 : f32 to vector<8x32xf32>
    %15 = arith.mulf %13, %14 : vector<8x32xf32>
    %c0_10 = arith.constant 0 : index
    %c0_11 = arith.constant 0 : index
    %c0_12 = arith.constant 0 : index
    %16 = vector.load %arg5[%c0_10, %c0_11, %c0_12] : memref<1x8x32xf32, #tpu.memory_space<vmem>>, vector<1x8x32xf32>
    %17 = vector.shape_cast %16 : vector<1x8x32xf32> to vector<8x32xf32>
    %18 = vector.shape_cast %15 : vector<8x32xf32> to vector<1x8x32xf32>
    tpu.vector_store %arg5[%c0_10, %c0_11, %c0_12], %18 {strides = array<i32>} : memref<1x8x32xf32, #tpu.memory_space<vmem>>, vector<1x8x32xf32>,
    return
  }
  func.func @transform_0(%arg0: i32, %arg1: i32) -> (i32, i32, i32) {
    %c0_i32 = arith.constant 0 : i32
    %c0_i32_0 = arith.constant 0 : i32
    return %arg0, %arg1, %c0_i32 : i32, i32, i32
  }
  func.func @transform_1(%arg0: i32, %arg1: i32) -> (i32, i32, i32) {
    %c0_i32 = arith.constant 0 : i32
    %c0_i32_0 = arith.constant 0 : i32
    %c0_i32_1 = arith.constant 0 : i32
    return %arg0, %c0_i32, %c0_i32_0 : i32, i32, i32
  }
  func.func @transform_2(%arg0: i32, %arg1: i32) -> (i32, i32, i32) {
    %c0_i32 = arith.constant 0 : i32
    %c0_i32_0 = arith.constant 0 : i32
    %c0_i32_1 = arith.constant 0 : i32
    return %arg0, %c0_i32, %c0_i32_0 : i32, i32, i32
  }
  func.func @transform_3(%arg0: i32, %arg1: i32) -> (i32, i32, i32) {
    %c0_i32 = arith.constant 0 : i32
    %c0_i32_0 = arith.constant 0 : i32
    return %arg0, %arg1, %c0_i32 : i32, i32, i32
  }
}

</mosaic_0001>

<bundles_post_ra>
// kernel: decoder_layer.15
= control target key start
LH: loop header
LB: loop body
LE: loop exit
PB: predicated region body
PF: predicated region fallthrough
CT: control target
= control target key end

     0   :  { %8 = vsyncpa [#allocation4], 0  ;;  %s733_s12 = smov [#allocation3]   ;;  %s829_s0 = inlined_call_operand.vmem [shape: f32[16,32], index: 0, kind: input, shape index: {}]   ;;  %s830_s1 = inlined_call_operand.hbm [shape: f32[32,96], index: 1, kind: input, shape index: {}]   ;;  %s831_s2 = inlined_call_operand.vmem [shape: f32[1,96], index: 2, kind: input, shape index: {}]   ;;  %s832_s3 = inlined_call_operand.vmem [shape: f32[16,96], index: 3, kind: output, shape index: {}]  }
   0x1   :  { %s16_s13 = sshll.u32 %s733_s12, 4  ;;  %s17_s13 = int_to_ptr.vmem [resolvable:$true] %s16_s13 }
   0x2   :  { %s719_s14 = scalar_lea.vmem %s17_s13, 512  ;;  %p724_p1 = scmp.lt.s32.totalorder %s17_s13, %s17_s13 }
   0x3   :  { %p720_p0 = scmp.ne.s32.totalorder %s17_s13, %s719_s14  ;;  %p725_p2 = scmp.lt.s32.totalorder %s719_s14, %s719_s14 }
   0x5   :  { %p726_p3 = por %p725_p2, %p724_p1 }
   0x7   :  { %p727_p4 = pnand %p726_p3, %p720_p0 }
   0x9   :  { %730 = shalt.err (!%p727_p4)
}
   0xa   :  { %s734_s15 = smov 128   ;;  %s735_s16 = smov 8  }
   0xb   :  { %22 = dma.hbm_to_vmem [thread:$0]  %s830_s1, 512, %s17_s13, [#allocation4], %s734_s15, %s734_s15, %s735_s16  }
   0xc   :  { %731 = dma.done.wait [#allocation4], 512  }
   0xd   :  { %732 = vsyncadd [#allocation4], 4294966784  ;;  %vm43_vm0 = vcmask 261120   ;;  %v42_v0 = vld [vmem:[#allocation3 + $0x18] sm:$0xff]  ;;  %v41_v1 = vld [vmem:[#allocation3 + $0x10] sm:$0xff]  ;;  %vm32_vm1 = vcmask 785408  }
   0xe   :  { %v40_v2 = vld [vmem:[#allocation3 + $0x8] sm:$0xff]  ;;  %v760_v3 = vand.u32 4294901760, %v42_v0  ;;  %v762_v4 = vand.u32 4294901760, %v41_v1  ;;  %v39_v6 = vld [vmem:[#allocation3] sm:$0xff]  ;;  %v37_v7 = vld [vmem:[%s829_s0] sm:$0xff]  ;;  %v736_v38 = vmov 0.0  }
   0xf   :  { %v764_v5 = vand.u32 4294901760, %v40_v2  ;;  %v38_v8 = vld [vmem:[%s829_s0 + $0x8] sm:$0xff]  ;;  %v772_v9 = vand.u32 4294901760, %v39_v6  ;;  %v45_v10 = vsel %vm43_vm0, %v37_v7, 0  ;;  %34 = vst.msk [vmem:[#allocation2 + $0x8] sm:$0xff] %vm32_vm1, %v736_v38  ;;  %33 = vst.msk [vmem:[#allocation2] sm:$0xff] %vm32_vm1, %v736_v38 }
  0x10   :  { %v48_v11 = vsel %vm43_vm0, %v38_v8, 0  ;;  %641 = vmatprep.subr.mxu0 %v760_v3  ;;  %v165_v12 = vsub.f32 %v42_v0, %v760_v3  ;;  %v776_v13 = vand.u32 4294901760, %v45_v10  ;;  %v172_v15 = vsub.f32 %v41_v1, %v762_v4  ;;  %v604_v1 = vld [vmem:[%s831_s2] ss:$0 sm:$0xff] }
  0x11   :  { %v778_v14 = vand.u32 4294901760, %v48_v11  ;;  %642 = vmatpush3.msra.mxu0 %v760_v3  ;;  %v179_v16 = vsub.f32 %v40_v2, %v764_v5  ;;  %v186_v17 = vsub.f32 %v39_v6, %v772_v9 }
  0x12   :  { %643 = vmatprep.subr.mxu0 %v762_v4  ;;  %v166_v18 = vand.u32 4294901760, %v165_v12  ;;  %v120_v19 = vsub.f32 %v45_v10, %v776_v13  ;;  %v173_v20 = vand.u32 4294901760, %v172_v15  ;;  %660 = vmatprep.mubr.f32.mxu1 %v776_v13 }
  0x13   :  { %v130_v21 = vsub.f32 %v48_v11, %v778_v14  ;;  %644 = vmatpush3.msra.mxu0 %v762_v4  ;;  %v180_v22 = vand.u32 4294901760, %v179_v16  ;;  %v187_v23 = vand.u32 4294901760, %v186_v17 }
  0x14   :  { %645 = vmatprep.subr.mxu0 %v764_v5  ;;  %v167_v24 = vsub.f32 %v165_v12, %v166_v18  ;;  %v121_v25 = vand.u32 4294901760, %v120_v19  ;;  %v174_v26 = vsub.f32 %v172_v15, %v173_v20 }
  0x15   :  { %v131_v27 = vand.u32 4294901760, %v130_v21  ;;  %646 = vmatpush3.msra.mxu0 %v764_v5  ;;  %v181_v28 = vsub.f32 %v179_v16, %v180_v22  ;;  %v188_v29 = vsub.f32 %v186_v17, %v187_v23 }
  0x16   :  { %647 = vmatprep.subr.mxu0 %v772_v9  ;;  %v168_v30 = vand.u32 4294901760, %v167_v24  ;;  %v122_v31 = vsub.f32 %v120_v19, %v121_v25  ;;  %v175_v32 = vand.u32 4294901760, %v174_v26  ;;  %v36_v56 = vld [vmem:[#allocation2 + $0x8] sm:$0xff]  ;;  %v35_v60 = vld [vmem:[#allocation2] sm:$0xff] }
  0x17   :  { %v132_v33 = vsub.f32 %v130_v21, %v131_v27  ;;  %648 = vmatpush3.msra.mxu0 %v772_v9  ;;  %v182_v36 = vand.u32 4294901760, %v181_v28  ;;  %v189_v37 = vand.u32 4294901760, %v188_v29 }
  0x18   :  { %652 = vmatprep.subr.mxu1 %v168_v30  ;;  %v123_v34 = vand.u32 4294901760, %v122_v31  ;;  %663 = vmatprep.subr.mxu0 %v165_v12 }
  0x19   :  { %v133_v35 = vand.u32 4294901760, %v132_v33  ;;  %653 = vmatpush3.msra.mxu1 %v168_v30 }
  0x1a   :  { %649 = vmatprep.mubr.f32.mxu0 %v123_v34  ;;  %654 = vmatprep.subr.mxu1 %v175_v32 }
  0x1b   :  { %650 = vmatmul.mubr.f32.vlgmr.msra.gmra.mxu0 %v133_v35  ;;  %655 = vmatpush3.msra.mxu1 %v175_v32 }
  0x1c   :  { %664 = vmatpush3.msra.mxu0 %v165_v12  ;;  %656 = vmatprep.subr.mxu1 %v182_v36 }
  0x1d   :  { %665 = vmatprep.subr.mxu0 %v172_v15  ;;  %657 = vmatpush3.msra.mxu1 %v182_v36 }
  0x1e   :  { %666 = vmatpush3.msra.mxu0 %v172_v15  ;;  %658 = vmatprep.subr.mxu1 %v189_v37 }
  0x1f   :  { %667 = vmatprep.subr.mxu0 %v179_v16  ;;  %659 = vmatpush3.msra.mxu1 %v189_v37 }
  0x20   :  { %668 = vmatpush3.msra.mxu0 %v179_v16  ;;  %661 = vmatmul.mubr.f32.vlgmr.msra.gmra.mxu1 %v778_v14 }
  0x21   :  { %669 = vmatprep.subr.mxu0 %v186_v17  ;;  %674 = vmatprep.subr.mxu1 %v760_v3 }
  0x22   :  { %670 = vmatpush3.msra.mxu0 %v186_v17  ;;  %671 = vmatprep.mubr.f32.mxu0 %v120_v19 }
  0x23   :  { %675 = vmatpush3.msra.mxu1 %v760_v3  ;;  %672 = vmatmul.mubr.f32.vlgmr.msra.gmra.mxu0 %v130_v21 }
  0x24   :  { %676 = vmatprep.subr.mxu1 %v762_v4  ;;  %685 = vmatprep.subr.mxu0 %v166_v18 }
  0x25   :  { %677 = vmatpush3.msra.mxu1 %v762_v4  ;;  %686 = vmatpush3.msra.mxu0 %v166_v18 }
  0x26   :  { %678 = vmatprep.subr.mxu1 %v764_v5  ;;  %687 = vmatprep.subr.mxu0 %v173_v20 }
  0x27   :  { %679 = vmatpush3.msra.mxu1 %v764_v5  ;;  %688 = vmatpush3.msra.mxu0 %v173_v20 }
  0x28   :  { %680 = vmatprep.subr.mxu1 %v772_v9  ;;  %689 = vmatprep.subr.mxu0 %v180_v22 }
  0x29   :  { %681 = vmatpush3.msra.mxu1 %v772_v9  ;;  %682 = vmatprep.mubr.f32.mxu1 %v121_v25 }
  0x2a   :  { %690 = vmatpush3.msra.mxu0 %v180_v22  ;;  %683 = vmatmul.mubr.f32.vlgmr.msra.gmra.mxu1 %v131_v27 }
  0x2b   :  { %691 = vmatprep.subr.mxu0 %v187_v23  ;;  %696 = vmatprep.subr.mxu1 %v760_v3 }
  0x2c   :  { %692 = vmatpush3.msra.mxu0 %v187_v23  ;;  %693 = vmatprep.mubr.f32.mxu0 %v776_v13 }
  0x2d   :  { %697 = vmatpush3.msra.mxu1 %v760_v3  ;;  %694 = vmatmul.mubr.f32.vlgmr.msra.gmra.mxu0 %v778_v14 }
  0x2e   :  { %698 = vmatprep.subr.mxu1 %v762_v4  ;;  %704 = vmatprep.mubr.f32.mxu1 %v776_v13 }
  0x2f   :  { %699 = vmatpush3.msra.mxu1 %v762_v4 }
  0x30   :  { %700 = vmatprep.subr.mxu1 %v764_v5 }
  0x31   :  { %701 = vmatpush3.msra.mxu1 %v764_v5 }
  0x32   :  { %702 = vmatprep.subr.mxu1 %v772_v9 }
  0x33   :  { %703 = vmatpush3.msra.mxu1 %v772_v9 }
  0x34   :  { %705 = vmatmul.mubr.f32.vlgmr.msra.gmra.mxu1 %v778_v14 }
  0xdb   :  { %v651_v39 = vpop.f32.mrf.mxu0 }
  0xdd   :  { %v125_v40 = vpop.f32.mrf.mxu0 }
  0xe0   :  { %v662_v41 = vpop.f32.mrf.mxu1 }
  0xe1   :  { %v233_v44 = vadd.f32 %v662_v41, %v651_v39 }
  0xe2   :  { %v226_v42 = vpop.f32.mrf.mxu1 }
  0xe3   :  { %v673_v43 = vpop.f32.mrf.mxu0  ;;  %v227_v46 = vadd.f32 %v226_v42, %v125_v40 }
  0xe4   :  { %v320_v48 = vadd.f32 %v673_v43, %v233_v44 }
  0xe5   :  { %v312_v47 = vpop.f32.mrf.mxu0 }
  0xe6   :  { %v313_v51 = vadd.f32 %v312_v47, %v227_v46 }
  0xea   :  { %v684_v45 = vpop.f32.mrf.mxu1 }
  0xeb   :  { %v405_v52 = vadd.f32 %v684_v45, %v320_v48 }
  0xec   :  { %v396_v49 = vpop.f32.mrf.mxu1 }
  0xed   :  { %v695_v50 = vpop.f32.mrf.mxu0  ;;  %v397_v53 = vadd.f32 %v396_v49, %v313_v51 }
  0xee   :  { %v494_v55 = vadd.f32 %v695_v50, %v405_v52 }
  0xef   :  { %v487_v54 = vpop.f32.mrf.mxu0 }
  0xf0   :  { %v488_v58 = vadd.f32 %v487_v54, %v397_v53 }
  0xf4   :  { %v706_v57 = vpop.f32.mrf.mxu1 }
  0xf5   :  { %v575_v59 = vadd.f32 %v706_v57, %v494_v55 }
  0xf6   :  { %v568_v61 = vpop.f32.mrf.mxu1 }
  0xf7   :  { %v579_v62 = vadd.f32 %v575_v59, %v36_v56  ;;  %v569_v63 = vadd.f32 %v568_v61, %v488_v58 }
  0xf9   :  { %582 = vst.msk [vmem:[#allocation2 + $0x8] sm:$0xff] %vm32_vm1, %v579_v62  ;;  %v578_v0 = vadd.f32 %v569_v63, %v35_v60 }
  0xfb   :  { %581 = vst.msk [vmem:[#allocation2] sm:$0xff] %vm32_vm1, %v578_v0 }
 0x100   :  { %v587_v2 = vld [vmem:[#allocation2 + $0x8] sm:$0xff] }
 0x101   :  { %v596_v3 = vadd.f32 %v604_v1, %v587_v2 }
 0x102   :  { %v586_v4 = vld [vmem:[#allocation2] sm:$0xff] }
 0x103   :  { %598 = vst.msk [vmem:[%s832_s3 + $0x8] sm:$0xff] %vm32_vm1, %v596_v3  ;;  %v595_v5 = vadd.f32 %v604_v1, %v586_v4 }
 0x105   :  { %597 = vst.msk [vmem:[%s832_s3] sm:$0xff] %vm32_vm1, %v595_v5 }
 0x106   :  { %603 = vsyncpa [#allocation4], 1 }

// kernel: decoder_layer.18
= control target key start
LH: loop header
LB: loop body
LE: loop exit
PB: predicated region body
PF: predicated region fallthrough
CT: control target
= control target key end

     0   :  { %s366_s9 = smov 0   ;;  %s368_s10 = smov 0   ;;  %s402_s0 = inlined_call_operand.vmem [shape: f32[2,8,32], index: 0, kind: input, shape index: {}]   ;;  %s403_s1 = inlined_call_operand.vmem [shape: f32[2,1,128], index: 1, kind: output, shape index: {0}]   ;;  %s404_s2 = inlined_call_operand.vmem [shape: f32[2,1,128], index: 2, kind: output, shape index: {1}]  }
   0x1   :  { %s370_s11 = smov 0  }
   0x2 LB: > { %s25_s12 = sadd.s32 1, %s344_s10  ;;  %p293_p0 = scmp.ge.s32.totalorder %s348_s11, 1  ;;  %s348_s11 = sphi %s370_s11, %s13_s11   ;;  %s344_s10 = sphi %s368_s10, %s406_s10   ;;  %s340_s9 = sphi %s366_s9, %s405_s9  }
   0x3   : > { %p27_p1 = scmp.ge.s32.totalorder %s25_s12, 2  ;;  %p131_p2 = scmp.lt.s32.totalorder %s348_s11, 3 }
   0x5   : > { %s408_s12 = smov (%p27_p1, %s25_s12), 0  ;;  %p132_p3 = pnand %p293_p0, %p131_p2 }
   0x6   : > { %p156_p4 = scmp.lt.s32.totalorder (!%p132_p3), %s340_s9, 1 }
   0x7   : > { %135 = sbr.rel (%p132_p3) target bundleno = 225 (0xe1), region = 24 }
   0xc   : > { %s410_s9 = smov (!%p156_p4, %s340_s9), 1  ;;  %vm177_vm0 = vcmask 261120   ;;  %v350_v4 = vmov 0.0  }
   0xd   : > { %s294_s13 = sshll.u32 %s410_s9, 3  ;;  %s165_s19 = scalar_lea.vmem %s403_s1, %s410_s9 }
   0xe   : > { %s162_s16 = scalar_lea.vmem %s402_s0, %s294_s13  ;;  %173 = vst [vmem:[%s165_s19] sm:$0x1] %v350_v4  ;;  %s168_s22 = scalar_lea.vmem %s404_s2, %s410_s9 }
   0xf   : > { %v175_v0 = vld [vmem:[%s162_s16] sm:$0xff]  ;;  %174 = vst [vmem:[%s168_s22] sm:$0x1] %v350_v4 }
  0x10   : > { %v178_v1 = vsel %vm177_vm0, %v175_v0, 0.0  ;;  %v192_v2 = vmul.f32 %v175_v0, %v175_v0 }
  0x11   : > { %179 = vadd.xlane.f32.xlu0 %v178_v1 }
  0x12   : > { %v193_v3 = vsel %vm177_vm0, %v192_v2, 0.0 }
  0x15   : > { %194 = vadd.xlane.f32.xlu0 %v193_v3  ;;  %v176_v19 = vld [vmem:[%s165_s19] sm:$0x1] }
  0x16   : > { %v191_v22 = vld [vmem:[%s168_s22] sm:$0x1] }
  0x9a   : > { %v180_v5 = vpop.xlane.xlu0 %179 }
  0x9b   : > { %v181_v6 = vrot.slane %v180_v5, 4 }
  0x9d   : > { %v182_v7 = vadd.f32 %v181_v6, %v180_v5 }
  0x9e   : > { %v195_v8 = vpop.xlane.xlu0 %194 }
  0x9f   : > { %v183_v9 = vrot.slane %v182_v7, 2  ;;  %v196_v10 = vrot.slane %v195_v8, 4 }
  0xa1   : > { %v197_v11 = vadd.f32 %v196_v10, %v195_v8  ;;  %v184_v12 = vadd.f32 %v183_v9, %v182_v7 }
  0xa3   : > { %v198_v13 = vrot.slane %v197_v11, 2  ;;  %v185_v14 = vrot.slane %v184_v12, 1 }
  0xa5   : > { %v199_v15 = vadd.f32 %v198_v13, %v197_v11  ;;  %v186_v16 = vadd.f32 %v185_v14, %v184_v12 }
  0xa7   : > { %297 = vpush %v186_v16  ;;  %v200_v17 = vrot.slane %v199_v15, 1 }
  0xa9   : > { %v201_v18 = vadd.f32 %v200_v17, %v199_v15 }
  0xab   : > { %299 = vpush %v201_v18 }
  0xd8   : > { %s298_s23 = spop %297 }
  0xd9   : > { %v188_v20 = vstv %s298_s23 }
  0xda   : > { %v189_v21 = vadd.f32 %v188_v20, %v176_v19 }
  0xdc   : > { %190 = vst [vmem:[%s165_s19] sm:$0x1] %v189_v21  ;;  %s300_s24 = spop %299 }
  0xdd   : > { %v203_v23 = vstv %s300_s24 }
  0xde   : > { %v204_v24 = vadd.f32 %v203_v23, %v191_v22 }
  0xe0   : > { %205 = vst [vmem:[%s168_s22] sm:$0x1] %v204_v24 }
  0xe1 PF: > { %s13_s11 = sadd.s32 1, %s348_s11   ;;  %s405_s9 = smov %s344_s10 }
  0xe2   : > { %p10_p5 = scmp.ge.s32.totalorder %s13_s11, 4   ;;  %s406_s10 = smov %s408_s12 }
  0xe4   :  { %12 = sbr.rel (!%p10_p5) target bundleno = 2 (0x2), region = 70 }

// kernel: decoder_layer.17
= control target key start
LH: loop header
LB: loop body
LE: loop exit
PB: predicated region body
PF: predicated region fallthrough
CT: control target
= control target key end

     0   :  { %vm21_vm0 = vcmask 261120   ;;  %v699_v38 = vmov 0.0   ;;  %s814_s1 = inlined_call_operand.vmem [shape: f32[32,32], index: 1, kind: input, shape index: {}]   ;;  %s815_s0 = inlined_call_operand.vmem [shape: f32[16,32], index: 0, kind: input, shape index: {}]   ;;  %s816_s2 = inlined_call_operand.vmem [shape: f32[1,32], index: 2, kind: input, shape index: {}]   ;;  %s817_s3 = inlined_call_operand.vmem [shape: f32[16,32], index: 3, kind: input, shape index: {}]   ;;  %s818_s4 = inlined_call_operand.vmem [shape: f32[16,32], index: 4, kind: output, shape index: {}]  }
   0x1   :  { %v31_v0 = vld [vmem:[%s814_s1 + $0x18] sm:$0xff]  ;;  %v30_v1 = vld [vmem:[%s814_s1 + $0x10] sm:$0xff]  ;;  %v29_v2 = vld [vmem:[%s814_s1 + $0x8] sm:$0xff]  ;;  %23 = vst.msk [vmem:[#allocation2 + $0x8] sm:$0xff] %vm21_vm0, %v699_v38 }
   0x2   :  { %v734_v3 = vand.u32 4294901760, %v31_v0  ;;  %v736_v4 = vand.u32 4294901760, %v30_v1  ;;  %v738_v5 = vand.u32 4294901760, %v29_v2  ;;  %v28_v6 = vld [vmem:[%s814_s1] sm:$0xff]  ;;  %v27_v8 = vld [vmem:[%s815_s0 + $0x8] sm:$0xff]  ;;  %22 = vst.msk [vmem:[#allocation2] sm:$0xff] %vm21_vm0, %v699_v38 }
   0x3   :  { %v26_v7 = vld [vmem:[%s815_s0] sm:$0xff]  ;;  %v749_v9 = vand.u32 4294901760, %v28_v6  ;;  %v37_v11 = vsel %vm21_vm0, %v27_v8, 0 }
   0x4   :  { %v34_v10 = vsel %vm21_vm0, %v26_v7, 0  ;;  %632 = vmatprep.subr.mxu0 %v734_v3  ;;  %v154_v12 = vsub.f32 %v31_v0, %v734_v3  ;;  %v161_v14 = vsub.f32 %v30_v1, %v736_v4  ;;  %v758_v15 = vand.u32 4294901760, %v37_v11  ;;  %v595_v1 = vld [vmem:[%s816_s2] ss:$0 sm:$0xff] }
   0x5   :  { %v755_v13 = vand.u32 4294901760, %v34_v10  ;;  %633 = vmatpush3.msra.mxu0 %v734_v3  ;;  %v168_v16 = vsub.f32 %v29_v2, %v738_v5  ;;  %v175_v17 = vsub.f32 %v28_v6, %v749_v9  ;;  %v585_v6 = vld [vmem:[%s817_s3] sm:$0xff] }
   0x6   :  { %634 = vmatprep.subr.mxu0 %v736_v4  ;;  %v155_v18 = vand.u32 4294901760, %v154_v12  ;;  %v162_v20 = vand.u32 4294901760, %v161_v14  ;;  %v119_v21 = vsub.f32 %v37_v11, %v758_v15 }
   0x7   :  { %v109_v19 = vsub.f32 %v34_v10, %v755_v13  ;;  %651 = vmatprep.mubr.f32.mxu1 %v755_v13  ;;  %635 = vmatpush3.msra.mxu0 %v736_v4  ;;  %v169_v22 = vand.u32 4294901760, %v168_v16  ;;  %v176_v23 = vand.u32 4294901760, %v175_v17 }
   0x8   :  { %636 = vmatprep.subr.mxu0 %v738_v5  ;;  %v156_v24 = vsub.f32 %v154_v12, %v155_v18  ;;  %v163_v26 = vsub.f32 %v161_v14, %v162_v20  ;;  %v120_v27 = vand.u32 4294901760, %v119_v21  ;;  %v25_v56 = vld [vmem:[#allocation2 + $0x8] sm:$0xff] }
   0x9   :  { %v110_v25 = vand.u32 4294901760, %v109_v19  ;;  %637 = vmatpush3.msra.mxu0 %v738_v5  ;;  %v170_v28 = vsub.f32 %v168_v16, %v169_v22  ;;  %v177_v29 = vsub.f32 %v175_v17, %v176_v23  ;;  %v24_v60 = vld [vmem:[#allocation2] sm:$0xff] }
   0xa   :  { %638 = vmatprep.subr.mxu0 %v749_v9  ;;  %v157_v30 = vand.u32 4294901760, %v156_v24  ;;  %v164_v32 = vand.u32 4294901760, %v163_v26  ;;  %v121_v33 = vsub.f32 %v119_v21, %v120_v27 }
   0xb   :  { %v111_v31 = vsub.f32 %v109_v19, %v110_v25  ;;  %639 = vmatpush3.msra.mxu0 %v749_v9  ;;  %v171_v36 = vand.u32 4294901760, %v170_v28  ;;  %v178_v37 = vand.u32 4294901760, %v177_v29 }
   0xc   :  { %643 = vmatprep.subr.mxu1 %v157_v30  ;;  %654 = vmatprep.subr.mxu0 %v154_v12  ;;  %v122_v35 = vand.u32 4294901760, %v121_v33 }
   0xd   :  { %v112_v34 = vand.u32 4294901760, %v111_v31  ;;  %644 = vmatpush3.msra.mxu1 %v157_v30 }
   0xe   :  { %645 = vmatprep.subr.mxu1 %v164_v32 }
   0xf   :  { %640 = vmatprep.mubr.f32.mxu0 %v112_v34  ;;  %646 = vmatpush3.msra.mxu1 %v164_v32 }
  0x10   :  { %641 = vmatmul.mubr.f32.vlgmr.msra.gmra.mxu0 %v122_v35  ;;  %647 = vmatprep.subr.mxu1 %v171_v36 }
  0x11   :  { %655 = vmatpush3.msra.mxu0 %v154_v12  ;;  %648 = vmatpush3.msra.mxu1 %v171_v36 }
  0x12   :  { %656 = vmatprep.subr.mxu0 %v161_v14  ;;  %649 = vmatprep.subr.mxu1 %v178_v37 }
  0x13   :  { %657 = vmatpush3.msra.mxu0 %v161_v14  ;;  %650 = vmatpush3.msra.mxu1 %v178_v37 }
  0x14   :  { %658 = vmatprep.subr.mxu0 %v168_v16  ;;  %652 = vmatmul.mubr.f32.vlgmr.msra.gmra.mxu1 %v758_v15 }
  0x15   :  { %659 = vmatpush3.msra.mxu0 %v168_v16  ;;  %665 = vmatprep.subr.mxu1 %v734_v3 }
  0x16   :  { %660 = vmatprep.subr.mxu0 %v175_v17  ;;  %662 = vmatprep.mubr.f32.mxu0 %v109_v19 }
  0x17   :  { %661 = vmatpush3.msra.mxu0 %v175_v17  ;;  %666 = vmatpush3.msra.mxu1 %v734_v3 }
  0x18   :  { %663 = vmatmul.mubr.f32.vlgmr.msra.gmra.mxu0 %v119_v21  ;;  %667 = vmatprep.subr.mxu1 %v736_v4 }
  0x19   :  { %676 = vmatprep.subr.mxu0 %v155_v18  ;;  %668 = vmatpush3.msra.mxu1 %v736_v4 }
  0x1a   :  { %677 = vmatpush3.msra.mxu0 %v155_v18  ;;  %669 = vmatprep.subr.mxu1 %v738_v5 }
  0x1b   :  { %678 = vmatprep.subr.mxu0 %v162_v20  ;;  %670 = vmatpush3.msra.mxu1 %v738_v5 }
  0x1c   :  { %679 = vmatpush3.msra.mxu0 %v162_v20  ;;  %671 = vmatprep.subr.mxu1 %v749_v9 }
  0x1d   :  { %680 = vmatprep.subr.mxu0 %v169_v22  ;;  %672 = vmatpush3.msra.mxu1 %v749_v9 }
  0x1e   :  { %673 = vmatprep.mubr.f32.mxu1 %v110_v25  ;;  %681 = vmatpush3.msra.mxu0 %v169_v22 }
  0x1f   :  { %674 = vmatmul.mubr.f32.vlgmr.msra.gmra.mxu1 %v120_v27  ;;  %682 = vmatprep.subr.mxu0 %v176_v23 }
  0x20   :  { %687 = vmatprep.subr.mxu1 %v734_v3  ;;  %683 = vmatpush3.msra.mxu0 %v176_v23 }
  0x21   :  { %684 = vmatprep.mubr.f32.mxu0 %v755_v13  ;;  %688 = vmatpush3.msra.mxu1 %v734_v3  ;;  %v586_v3 = vld [vmem:[%s817_s3 + $0x8] sm:$0xff] }
  0x22   :  { %685 = vmatmul.mubr.f32.vlgmr.msra.gmra.mxu0 %v758_v15  ;;  %689 = vmatprep.subr.mxu1 %v736_v4 }
  0x23   :  { %695 = vmatprep.mubr.f32.mxu1 %v755_v13  ;;  %690 = vmatpush3.msra.mxu1 %v736_v4 }
  0x24   :  { %691 = vmatprep.subr.mxu1 %v738_v5 }
  0x25   :  { %692 = vmatpush3.msra.mxu1 %v738_v5 }
  0x26   :  { %693 = vmatprep.subr.mxu1 %v749_v9 }
  0x27   :  { %694 = vmatpush3.msra.mxu1 %v749_v9 }
  0x28   :  { %696 = vmatmul.mubr.f32.vlgmr.msra.gmra.mxu1 %v758_v15 }
  0xd0   :  { %v642_v39 = vpop.f32.mrf.mxu0 }
  0xd2   :  { %v114_v40 = vpop.f32.mrf.mxu0 }
  0xd4   :  { %v653_v41 = vpop.f32.mrf.mxu1 }
  0xd5   :  { %v222_v44 = vadd.f32 %v653_v41, %v642_v39 }
  0xd6   :  { %v215_v42 = vpop.f32.mrf.mxu1 }
  0xd7   :  { %v216_v46 = vadd.f32 %v215_v42, %v114_v40 }
  0xd8   :  { %v664_v43 = vpop.f32.mrf.mxu0 }
  0xd9   :  { %v309_v48 = vadd.f32 %v664_v43, %v222_v44 }
  0xda   :  { %v301_v47 = vpop.f32.mrf.mxu0 }
  0xdb   :  { %v302_v51 = vadd.f32 %v301_v47, %v216_v46 }
  0xdf   :  { %v675_v45 = vpop.f32.mrf.mxu1 }
  0xe0   :  { %v394_v52 = vadd.f32 %v675_v45, %v309_v48 }
  0xe1   :  { %v385_v49 = vpop.f32.mrf.mxu1 }
  0xe2   :  { %v686_v50 = vpop.f32.mrf.mxu0  ;;  %v386_v53 = vadd.f32 %v385_v49, %v302_v51 }
  0xe3   :  { %v483_v55 = vadd.f32 %v686_v50, %v394_v52 }
  0xe4   :  { %v476_v54 = vpop.f32.mrf.mxu0 }
  0xe5   :  { %v477_v58 = vadd.f32 %v476_v54, %v386_v53 }
  0xe8   :  { %v697_v57 = vpop.f32.mrf.mxu1 }
  0xe9   :  { %v564_v59 = vadd.f32 %v697_v57, %v483_v55 }
  0xea   :  { %v557_v61 = vpop.f32.mrf.mxu1 }
  0xeb   :  { %v568_v62 = vadd.f32 %v564_v59, %v25_v56  ;;  %v558_v63 = vadd.f32 %v557_v61, %v477_v58 }
  0xed   :  { %570 = vst.msk [vmem:[#allocation2 + $0x8] sm:$0xff] %vm21_vm0, %v568_v62  ;;  %v567_v0 = vadd.f32 %v558_v63, %v24_v60 }
  0xef   :  { %569 = vst.msk [vmem:[#allocation2] sm:$0xff] %vm21_vm0, %v567_v0 }
  0xf4   :  { %v575_v2 = vld [vmem:[#allocation2 + $0x8] sm:$0xff] }
  0xf5   :  { %v584_v4 = vadd.f32 %v595_v1, %v575_v2 }
  0xf6   :  { %v574_v5 = vld [vmem:[#allocation2] sm:$0xff] }
  0xf7   :  { %v588_v7 = vadd.f32 %v586_v3, %v584_v4  ;;  %v583_v8 = vadd.f32 %v595_v1, %v574_v5 }
  0xf9   :  { %590 = vst.msk [vmem:[%s818_s4 + $0x8] sm:$0xff] %vm21_vm0, %v588_v7  ;;  %v587_v9 = vadd.f32 %v585_v6, %v583_v8 }
  0xfb   :  { %589 = vst.msk [vmem:[%s818_s4] sm:$0xff] %vm21_vm0, %v587_v9 }

// kernel: decoder_layer.16
= control target key start
LH: loop header
LB: loop body
LE: loop exit
PB: predicated region body
PF: predicated region fallthrough
CT: control target
= control target key end

     0   :  { %s1772_s15 = smov 0   ;;  %s1774_s16 = smov 0   ;;  %s1893_s0 = inlined_call_operand.vmem [shape: f32[2,4,8,8], index: 0, kind: input, shape index: {}]   ;;  %s1894_s1 = inlined_call_operand.vmem [shape: f32[2,4,8,8], index: 1, kind: input, shape index: {}]   ;;  %s1895_s2 = inlined_call_operand.vmem [shape: f32[2,4,8,8], index: 2, kind: input, shape index: {}]   ;;  %s1896_s3 = inlined_call_operand.vmem [shape: s8[1,8,8], index: 3, kind: input, shape index: {}]   ;;  %s1897_s4 = inlined_call_operand.vmem [shape: f32[2,4,8,8], index: 4, kind: output, shape index: {}]  }
   0x1   :  { %s1776_s17 = smov 0   ;;  %s1778_s18 = smov 0  }
   0x2   :  { %s1780_s19 = smov 0  }
   0x3 LB: > { %s36_s20 = sadd.s32 1, %s1733_s17  ;;  %s40_s21 = sadd.s32 1, %s1737_s18  ;;  %s1741_s19 = sphi %s1780_s19, %s14_s19   ;;  %s1737_s18 = sphi %s1778_s18, %s1901_s18   ;;  %s1733_s17 = sphi %s1776_s17, %s1900_s17   ;;  %s1729_s16 = sphi %s1774_s16, %s1899_s16   ;;  %s1725_s15 = sphi %s1772_s15, %s1898_s15  }
   0x4   : > { %p38_p0 = scmp.ge.s32.totalorder %s36_s20, 4  ;;  %p1558_p1 = scmp.ge.s32.totalorder %s1741_s19, 1 }
   0x5   : > { %p256_p2 = scmp.lt.s32.totalorder %s1741_s19, 9 }
   0x6   : > { %s1903_s20 = smov (%p38_p0, %s36_s20), 0  ;;  %s1905_s21 = smov (!%p38_p0, %s40_s21), %s1737_s18 }
   0x7   : > { %p257_p3 = pnand %p1558_p1, %p256_p2  ;;  %p42_p4 = scmp.ge.s32.totalorder %s1905_s21, 2 }
   0x8   : > { %p323_p5 = scmp.lt.s32.totalorder (!%p257_p3), %s1729_s16, 1  ;;  %p325_p6 = scmp.lt.s32.totalorder (!%p257_p3), %s1725_s15, 3 }
   0x9   : > { %s1907_s21 = smov (%p42_p4, %s1905_s21), 0  ;;  %260 = sbr.rel (%p257_p3) target bundleno = 502 (0x1f6), region = 36 }
   0xe   : > { %vm383_vm0 = vcmask 64512   ;;  %v1743_v0 = vmov 0.0   ;;  %vm1744_vm1 = vmmov 0   ;;  %s1909_s16 = smov (!%p323_p5, %s1729_s16), 1  ;;  %s1911_s15 = smov (!%p325_p6, %s1725_s15), 3  ;;  %vm380_vm2 = vcmask 57344  }
   0xf   : > { %1593 = vmatprep.subr.mxu0 %v1743_v0  ;;  %384 = vst.msk [vmem:[#allocation4] sm:$0xff] %vm383_vm0, %v1743_v0  ;;  %1595 = vmatprep.mubr.msk.f32.mxu0 %vm1744_vm1, %v1743_v0  ;;  %s1559_s22 = sshll.u32 %s1909_s16, 2  ;;  %v1745_v17 = vmov -inf   ;;  %v841_v18 = vld [vmem:[%s1896_s3] sm:$0x3]  ;;  %v1746_v24 = vmov 0   ;;  %v860_v43 = vlaneseq }
  0x10   : > { %1598 = vmatprep.subr.mxu1 %v1743_v0  ;;  %1600 = vmatprep.mubr.msk.f32.mxu1 %vm1744_vm1, %v1743_v0  ;;  %s331_s23 = sadd.s32 %s1559_s22, %s1911_s15  ;;  %381 = vst.msk [vmem:[#allocation2] sm:$0x1] %vm380_vm2, %v1745_v17  ;;  %382 = vst.msk [vmem:[#allocation3] sm:$0x1] %vm380_vm2, %v1743_v0  ;;  %vm842_vm3 = vnez %v841_v18 }
  0x11   : > { %s1810_s24 = sshll.u32 %s331_s23, 3  ;;  %v843_v25 = vsel %vm842_vm3, 16843009, %v1746_v24  ;;  %v861_v46 = vshrl.u32 %v860_v43, 7 }
  0x12   : > { %s333_s27 = scalar_lea.vmem %s1893_s0, %s1810_s24  ;;  %s344_s30 = scalar_lea.vmem %s1894_s1, %s1810_s24  ;;  %v844_v31 = vunpack.c.0.s8 %v843_v25 }
  0x13   : > { %v385_v1 = vld [vmem:[%s333_s27] sm:$0xff]  ;;  %s355_s7 = scalar_lea.vmem %s1895_s2, %s1810_s24  ;;  %v1851_v50 = vsub.s32 0, %v861_v46  ;;  %s373_s12 = scalar_lea.vmem %s1897_s4, %s1810_s24 }
  0x14   : > { %v386_v2 = vmul.f32 0.35355338, %v385_v1  ;;  %v387_v3 = vld [vmem:[%s344_s30] sm:$0xff]  ;;  %vm845_vm4 = vcmp.ne.s32.totalorder %v844_v31, 0 }
  0x15   : > { %v880_v4 = vld [vmem:[%s355_s7] sm:$0xff]  ;;  %v390_v5 = vsel %vm383_vm0, %v387_v3, 0 }
  0x16   : > { %881 = vxpose.xlu0.b32.start.end [1/1] (short) (narrow) %v880_v4, 8  ;;  %v393_v6 = vsel %vm383_vm0, %v386_v2, 0  ;;  %v461_v7 = vand.u32 4294901760, %v390_v5 }
  0x17   : > { %v426_v8 = vand.u32 4294901760, %v393_v6  ;;  %v847_v48 = vld [vmem:[#allocation2] sm:$0x1] }
  0x18   : > { %v462_v9 = vsub.f32 %v390_v5, %v461_v7 }
  0x19   : > { %1594 = vmatpush3.xpose.msra.mxu0 %v426_v8  ;;  %v503_v10 = vsub.f32 %v393_v6, %v426_v8 }
  0x1a   : > { %v463_v11 = vand.u32 4294901760, %v462_v9  ;;  %1603 = vmatprep.subr.mxu0 %v1743_v0 }
  0x1b   : > { %v504_v12 = vand.u32 4294901760, %v503_v10 }
  0x1c   : > { %v464_v13 = vsub.f32 %v462_v9, %v463_v11 }
  0x1d   : > { %v505_v14 = vsub.f32 %v503_v10, %v504_v12 }
  0x1e   : > { %v465_v15 = vand.u32 4294901760, %v464_v13  ;;  %v868_v13 = vld [vmem:[#allocation3] sm:$0x1] }
  0x1f   : > { %v506_v16 = vand.u32 4294901760, %v505_v14 }
  0x20   : > { %1596 = vmatmul.mubr.f32.vlgmr.msra.gmra.mxu0 %v465_v15 }
  0x21   : > { %1599 = vmatpush3.xpose.msra.mxu1 %v506_v16  ;;  %1604 = vmatpush3.xpose.msra.mxu0 %v503_v10 }
  0x22   : > { %1605 = vmatprep.mubr.msk.f32.mxu0 %vm1744_vm1, %v1743_v0  ;;  %1608 = vmatprep.subr.mxu1 %v1743_v0 }
  0x23   : > { %1613 = vmatprep.subr.mxu0 %v1743_v0 }
  0x24   : > { %1601 = vmatmul.mubr.f32.vlgmr.msra.gmra.mxu1 %v461_v7  ;;  %1606 = vmatmul.mubr.f32.vlgmr.msra.gmra.mxu0 %v462_v9 }
  0x25   : > { %1609 = vmatpush3.xpose.msra.mxu1 %v426_v8  ;;  %1614 = vmatpush3.xpose.msra.mxu0 %v504_v12 }
  0x26   : > { %1610 = vmatprep.mubr.msk.f32.mxu1 %vm1744_vm1, %v1743_v0  ;;  %1615 = vmatprep.mubr.msk.f32.mxu0 %vm1744_vm1, %v1743_v0 }
  0x27   : > { %1618 = vmatprep.subr.mxu1 %v1743_v0  ;;  %1623 = vmatprep.subr.mxu0 %v1743_v0 }
  0x28   : > { %1611 = vmatmul.mubr.f32.vlgmr.msra.gmra.mxu1 %v463_v11  ;;  %1616 = vmatmul.mubr.f32.vlgmr.msra.gmra.mxu0 %v461_v7 }
  0x29   : > { %1619 = vmatpush3.xpose.msra.mxu1 %v426_v8  ;;  %1620 = vmatprep.mubr.msk.f32.mxu1 %vm1744_vm1, %v1743_v0 }
  0x2a   : > { %1625 = vmatprep.mubr.msk.f32.mxu0 %vm1744_vm1, %v1743_v0  ;;  %1628 = vmatprep.subr.mxu1 %v1743_v0 }
  0x2c   : > { %1621 = vmatmul.mubr.f32.vlgmr.msra.gmra.mxu1 %v461_v7 }
  0x2d   : > { %1630 = vmatprep.mubr.msk.f32.mxu1 %vm1744_vm1, %v1743_v0 }
  0x92   : > { %v897_v51 = vpop.trf.xlu0 }
  0x93   : > { %v914_v55 = vsel %vm383_vm0, %v897_v51, 0 }
  0x94   : > { %v982_v58 = vand.u32 4294901760, %v914_v55 }
  0x96   : > { %v983_v60 = vsub.f32 %v914_v55, %v982_v58 }
  0x98   : > { %v984_v61 = vand.u32 4294901760, %v983_v60 }
  0x9a   : > { %v985_v62 = vsub.f32 %v983_v60, %v984_v61 }
  0x9c   : > { %v986_v3 = vand.u32 4294901760, %v985_v62 }
  0xe0   : > { %v467_v19 = vpop.f32.mrf.mxu0 }
  0xe2   : > { %v1597_v20 = vpop.f32.mrf.mxu0 }
  0xe4   : > { %v543_v21 = vpop.f32.mrf.mxu1  ;;  %v617_v22 = vpop.f32.mrf.mxu0 }
  0xe5   : > { %v544_v23 = vadd.f32 %v543_v21, %v467_v19 }
  0xe6   : > { %v1602_v26 = vpop.f32.mrf.mxu1  ;;  %v1607_v27 = vpop.f32.mrf.mxu0 }
  0xe7   : > { %v618_v28 = vadd.f32 %v617_v22, %v544_v23 }
  0xe8   : > { %v691_v29 = vpop.f32.mrf.mxu1  ;;  %v765_v30 = vpop.f32.mrf.mxu0 }
  0xe9   : > { %v692_v32 = vadd.f32 %v691_v29, %v618_v28 }
  0xea   : > { %v1612_v33 = vpop.f32.mrf.mxu1  ;;  %v1617_v34 = vpop.f32.mrf.mxu0 }
  0xeb   : > { %v766_v35 = vadd.f32 %v765_v30, %v692_v32  ;;  %v1362_v33 = vld [vmem:[#allocation4] sm:$0xff] }
  0xec   : > { %v837_v36 = vpop.f32.mrf.mxu1 }
  0xed   : > { %v838_v37 = vadd.f32 %v837_v36, %v766_v35 }
  0xee   : > { %v1622_v38 = vpop.f32.mrf.mxu1 }
  0xef   : > { %v846_v39 = vsel %vm845_vm4, %v838_v37, -1e+09 }
  0xf0   : > { %v848_v40 = vsel %vm383_vm0, %v846_v39, -inf }
  0xf1   : > { %v849_v41 = vrot.slane %v848_v40, 4 }
  0xf3   : > { %v850_v42 = vmax.f32 %v848_v40, %v849_v41 }
  0xf5   : > { %v851_v44 = vrot.slane %v850_v42, 2 }
  0xf7   : > { %v852_v45 = vmax.f32 %v850_v42, %v851_v44 }
  0xf9   : > { %v853_v47 = vrot.slane %v852_v45, 1 }
  0xfb   : > { %v854_v49 = vmax.f32 %v852_v45, %v853_v47 }
  0xfd   : > { %v855_v52 = vmax.f32 %v847_v48, %v854_v49 }
  0xff   : > { %v856_v53 = vsub.f32 %v847_v48, %v855_v52  ;;  %v863_v54 = vrot.slane %v855_v52, %v1851_v50  ;;  %1372 = vst.msk [vmem:[#allocation2] sm:$0x1] %vm380_vm2, %v855_v52 }
 0x101   : > { %v857_v56 = vmul.f32 1.442695, %v856_v53  ;;  %v865_v57 = vsub.f32 %v846_v39, %v863_v54 }
 0x103   : > { %1697 = vpow2.f32 %v857_v56  ;;  %v866_v59 = vmul.f32 1.442695, %v865_v57 }
 0x105   : > { %1699 = vpow2.f32 %v866_v59 }
 0x110   : > { %v1698_v63 = vpop.eup %1697 }
 0x111   : > { %v1367_v1 = vrot.slane %v1698_v63, %v1851_v50  ;;  %v869_v16 = vmul.f32 %v1698_v63, %v868_v13 }
 0x112   : > { %v1700_v2 = vpop.eup %1699 }
 0x113   : > { %v870_v4 = vsel %vm383_vm0, %v1700_v2, 0.0  ;;  %v947_v5 = vand.u32 4294901760, %v1700_v2  ;;  %v1369_v36 = vmul.f32 %v1367_v1, %v1362_v33 }
 0x114   : > { %v871_v6 = vrot.slane %v870_v4, 4 }
 0x115   : > { %1624 = vmatpush3.msra.mxu0 %v947_v5  ;;  %v1024_v7 = vsub.f32 %v1700_v2, %v947_v5 }
 0x116   : > { %v872_v8 = vadd.f32 %v871_v6, %v870_v4  ;;  %1626 = vmatmul.mubr.f32.vlgmr.msra.gmra.mxu0 %v986_v3  ;;  %1633 = vmatprep.subr.mxu0 %v1743_v0 }
 0x117   : > { %1634 = vmatpush3.msra.mxu0 %v1024_v7  ;;  %1635 = vmatprep.mubr.msk.f32.mxu0 %vm1744_vm1, %v1743_v0  ;;  %v1025_v9 = vand.u32 4294901760, %v1024_v7 }
 0x118   : > { %v873_v10 = vrot.slane %v872_v8, 2  ;;  %1643 = vmatprep.subr.mxu0 %v1743_v0 }
 0x119   : > { %v1026_v11 = vsub.f32 %v1024_v7, %v1025_v9 }
 0x11a   : > { %v874_v12 = vadd.f32 %v873_v10, %v872_v8  ;;  %1636 = vmatmul.mubr.f32.vlgmr.msra.gmra.mxu0 %v983_v60 }
 0x11b   : > { %1644 = vmatpush3.msra.mxu0 %v1025_v9  ;;  %v1027_v14 = vand.u32 4294901760, %v1026_v11  ;;  %1645 = vmatprep.mubr.msk.f32.mxu0 %vm1744_vm1, %v1743_v0 }
 0x11c   : > { %v875_v15 = vrot.slane %v874_v12, 1 }
 0x11d   : > { %1629 = vmatpush3.msra.mxu1 %v1027_v14 }
 0x11e   : > { %v876_v17 = vadd.f32 %v875_v15, %v874_v12  ;;  %1631 = vmatmul.mubr.f32.vlgmr.msra.gmra.mxu1 %v982_v58  ;;  %1638 = vmatprep.subr.mxu1 %v1743_v0 }
 0x11f   : > { %1646 = vmatmul.mubr.f32.vlgmr.msra.gmra.mxu0 %v982_v58  ;;  %1639 = vmatpush3.msra.mxu1 %v947_v5 }
 0x120   : > { %v877_v18 = vadd.f32 %v876_v17, %v869_v16  ;;  %1640 = vmatprep.mubr.msk.f32.mxu1 %vm1744_vm1, %v1743_v0  ;;  %1648 = vmatprep.subr.mxu1 %v1743_v0 }
 0x122   : > { %879 = vst.msk [vmem:[#allocation3] sm:$0x1] %vm380_vm2, %v877_v18  ;;  %1641 = vmatmul.mubr.f32.vlgmr.msra.gmra.mxu1 %v984_v61 }
 0x123   : > { %1649 = vmatpush3.msra.mxu1 %v947_v5  ;;  %1650 = vmatprep.mubr.msk.f32.mxu1 %vm1744_vm1, %v1743_v0 }
 0x126   : > { %1651 = vmatmul.mubr.f32.vlgmr.msra.gmra.mxu1 %v982_v58 }
 0x129   : > { %v1376_v23 = vld [vmem:[#allocation3] sm:$0x1] }
 0x12a   : > { %1701 = vrcp.f32 %v1376_v23 }
 0x137   : > { %v1702_v39 = vpop.eup %1701 }
 0x138   : > { %v1383_v40 = vrot.slane %v1702_v39, %v1851_v50 }
 0x1d6   : > { %v988_v19 = vpop.f32.mrf.mxu0 }
 0x1d8   : > { %v1627_v20 = vpop.f32.mrf.mxu0 }
 0x1da   : > { %v1138_v21 = vpop.f32.mrf.mxu0 }
 0x1dc   : > { %v1637_v22 = vpop.f32.mrf.mxu0 }
 0x1de   : > { %v1064_v24 = vpop.f32.mrf.mxu1 }
 0x1df   : > { %v1065_v25 = vadd.f32 %v1064_v24, %v988_v19  ;;  %v1286_v26 = vpop.f32.mrf.mxu0 }
 0x1e0   : > { %v1632_v27 = vpop.f32.mrf.mxu1 }
 0x1e1   : > { %v1647_v28 = vpop.f32.mrf.mxu0  ;;  %v1139_v29 = vadd.f32 %v1138_v21, %v1065_v25 }
 0x1e2   : > { %v1212_v30 = vpop.f32.mrf.mxu1 }
 0x1e3   : > { %v1213_v31 = vadd.f32 %v1212_v30, %v1139_v29 }
 0x1e4   : > { %v1642_v32 = vpop.f32.mrf.mxu1 }
 0x1e5   : > { %v1287_v34 = vadd.f32 %v1286_v26, %v1213_v31 }
 0x1e6   : > { %v1358_v0 = vpop.f32.mrf.mxu1 }
 0x1e7   : > { %v1359_v35 = vadd.f32 %v1358_v0, %v1287_v34 }
 0x1e8   : > { %v1652_v37 = vpop.f32.mrf.mxu1 }
 0x1e9   : > { %v1370_v38 = vadd.f32 %v1369_v36, %v1359_v35 }
 0x1eb   : > { %1371 = vst.msk [vmem:[#allocation4] sm:$0xff] %vm383_vm0, %v1370_v38 }
 0x1f2   : > { %v1378_v41 = vld [vmem:[#allocation4] sm:$0xff] }
 0x1f3   : > { %v1385_v42 = vmul.f32 %v1383_v40, %v1378_v41 }
 0x1f5   : > { %1386 = vst.msk [vmem:[%s373_s12] sm:$0xff] %vm383_vm0, %v1385_v42 }
 0x1f6 PF: > { %s14_s19 = sadd.s32 1, %s1741_s19   ;;  %s1898_s15 = smov %s1733_s17 }
 0x1f7   : > { %p11_p7 = scmp.ge.s32.totalorder %s14_s19, 10   ;;  %s1899_s16 = smov %s1737_s18 }
 0x1f8   : > { %s1900_s17 = smov %s1903_s20  ;;  %s1901_s18 = smov %s1907_s21 }
 0x1f9   :  { %13 = sbr.rel (!%p11_p7) target bundleno = 3 (0x3), region = 83 }

// kernel: decoder_layer.19
= control target key start
LH: loop header
LB: loop body
LE: loop exit
PB: predicated region body
PF: predicated region fallthrough
CT: control target
= control target key end

     0   :  { %s421_s12 = smov 0   ;;  %s423_s13 = smov 0   ;;  %s460_s0 = inlined_call_operand.vmem [shape: f32[2,8,32], index: 0, kind: input, shape index: {}]   ;;  %s461_s1 = inlined_call_operand.vmem [shape: f32[2,1,128], index: 1, kind: input, shape index: {}]   ;;  %s462_s2 = inlined_call_operand.vmem [shape: f32[2,1,128], index: 2, kind: input, shape index: {}]   ;;  %s463_s3 = inlined_call_operand.vmem [shape: f32[2,8,32], index: 3, kind: output, shape index: {}]  }
   0x1   :  { %s425_s14 = smov 0  }
   0x2 LB: > { %s25_s15 = sadd.s32 1, %s395_s13  ;;  %p340_p0 = scmp.ge.s32.totalorder %s399_s14, 1  ;;  %s399_s14 = sphi %s425_s14, %s13_s14   ;;  %s395_s13 = sphi %s423_s13, %s465_s13   ;;  %s391_s12 = sphi %s421_s12, %s464_s12  }
   0x3   : > { %p27_p1 = scmp.ge.s32.totalorder %s25_s15, 2  ;;  %p171_p2 = scmp.lt.s32.totalorder %s399_s14, 3 }
   0x5   : > { %s467_s15 = smov (%p27_p1, %s25_s15), 0  ;;  %p172_p3 = pnand %p340_p0, %p171_p2 }
   0x6   : > { %p205_p4 = scmp.lt.s32.totalorder (!%p172_p3), %s391_s12, 1 }
   0x7   : > { %175 = sbr.rel (%p172_p3) target bundleno = 142 (0x8e), region = 32 }
   0xc   : > { %s469_s12 = smov (!%p205_p4, %s391_s12), 1  ;;  %vm242_vm0 = vcmask 261120  }
   0xd   : > { %s214_s18 = scalar_lea.vmem %s461_s1, %s469_s12  ;;  %s217_s21 = scalar_lea.vmem %s462_s2, %s469_s12 }
   0xe   : > { %v225_v0 = vld [vmem:[%s214_s18] sm:$0x1]  ;;  %s341_s22 = sshll.u32 %s469_s12, 3 }
   0xf   : > { %v228_v1 = vld [vmem:[%s217_s21] sm:$0x1]  ;;  %345 = vpush %v225_v0  ;;  %s211_s25 = scalar_lea.vmem %s460_s0, %s341_s22  ;;  %s224_s9 = scalar_lea.vmem %s463_s3, %s341_s22 }
  0x10   : > { %347 = vpush %v228_v1  ;;  %v237_v2 = vld [vmem:[%s211_s25] sm:$0xff] }
  0x40   : > { %s346_s26 = spop %345 }
  0x41   : > { %s227_s27 = smul.f32 0.00390625, %s346_s26  ;;  %s348_s28 = spop %347 }
  0x42   : > { %s230_s29 = smul.f32 0.00390625, %s348_s28 }
  0x43   : > { %s231_s30 = smul.f32 %s227_s27, %s227_s27  ;;  %v238_v3 = vstv %s227_s27 }
  0x44   : > { %v239_v4 = vsub.f32 %v237_v2, %v238_v3 }
  0x45   : > { %s232_s4 = ssub.f32 %s230_s29, %s231_s30 }
  0x47   : > { %s233_s5 = sadd.f32 1e-05, %s232_s4 }
  0x49   : > { %v234_v5 = vstv %s233_s5 }
  0x4a   : > { %375 = vrsqrt.f32 %v234_v5 }
  0x57   : > { %v376_v6 = vpop.eup %375 }
  0x58   : > { %349 = vpush %v376_v6 }
  0x89   : > { %s350_s6 = spop %349 }
  0x8a   : > { %v240_v7 = vstv %s350_s6 }
  0x8b   : > { %v241_v8 = vmul.f32 %v240_v7, %v239_v4 }
  0x8d   : > { %243 = vst.msk [vmem:[%s224_s9] sm:$0xff] %vm242_vm0, %v241_v8 }
  0x8e PF: > { %s13_s14 = sadd.s32 1, %s399_s14   ;;  %s464_s12 = smov %s395_s13 }
  0x8f   : > { %p10_p5 = scmp.ge.s32.totalorder %s13_s14, 4   ;;  %s465_s13 = smov %s467_s15 }
  0x91   :  { %12 = sbr.rel (!%p10_p5) target bundleno = 2 (0x2), region = 68 }

// kernel: decoder_layer.20
= control target key start
LH: loop header
LB: loop body
LE: loop exit
PB: predicated region body
PF: predicated region fallthrough
CT: control target
= control target key end

     0   :  { %vm18_vm0 = vcmask 261120   ;;  %v692_v38 = vmov 0.0   ;;  %s796_s1 = inlined_call_operand.vmem [shape: f32[32,32], index: 1, kind: input, shape index: {}]   ;;  %s797_s0 = inlined_call_operand.vmem [shape: f32[16,32], index: 0, kind: input, shape index: {}]   ;;  %s798_s2 = inlined_call_operand.vmem [shape: f32[1,32], index: 2, kind: input, shape index: {}]   ;;  %s799_s3 = inlined_call_operand.vmem [shape: f32[16,32], index: 3, kind: output, shape index: {}]  }
   0x1   :  { %v28_v0 = vld [vmem:[%s796_s1 + $0x18] sm:$0xff]  ;;  %v27_v1 = vld [vmem:[%s796_s1 + $0x10] sm:$0xff]  ;;  %v26_v2 = vld [vmem:[%s796_s1 + $0x8] sm:$0xff]  ;;  %20 = vst.msk [vmem:[#allocation2 + $0x8] sm:$0xff] %vm18_vm0, %v692_v38 }
   0x2   :  { %v722_v3 = vand.u32 4294901760, %v28_v0  ;;  %v724_v4 = vand.u32 4294901760, %v27_v1  ;;  %v726_v5 = vand.u32 4294901760, %v26_v2  ;;  %v25_v6 = vld [vmem:[%s796_s1] sm:$0xff]  ;;  %v24_v8 = vld [vmem:[%s797_s0 + $0x8] sm:$0xff]  ;;  %19 = vst.msk [vmem:[#allocation2] sm:$0xff] %vm18_vm0, %v692_v38 }
   0x3   :  { %v23_v7 = vld [vmem:[%s797_s0] sm:$0xff]  ;;  %v737_v9 = vand.u32 4294901760, %v25_v6  ;;  %v34_v11 = vsel %vm18_vm0, %v24_v8, 0 }
   0x4   :  { %v31_v10 = vsel %vm18_vm0, %v23_v7, 0  ;;  %625 = vmatprep.subr.mxu0 %v722_v3  ;;  %v151_v12 = vsub.f32 %v28_v0, %v722_v3  ;;  %v158_v14 = vsub.f32 %v27_v1, %v724_v4  ;;  %v746_v15 = vand.u32 4294901760, %v34_v11  ;;  %v588_v1 = vld [vmem:[%s798_s2] ss:$0 sm:$0xff] }
   0x5   :  { %v743_v13 = vand.u32 4294901760, %v31_v10  ;;  %626 = vmatpush3.msra.mxu0 %v722_v3  ;;  %v165_v16 = vsub.f32 %v26_v2, %v726_v5  ;;  %v172_v17 = vsub.f32 %v25_v6, %v737_v9 }
   0x6   :  { %627 = vmatprep.subr.mxu0 %v724_v4  ;;  %v152_v18 = vand.u32 4294901760, %v151_v12  ;;  %v159_v20 = vand.u32 4294901760, %v158_v14  ;;  %v116_v21 = vsub.f32 %v34_v11, %v746_v15 }
   0x7   :  { %v106_v19 = vsub.f32 %v31_v10, %v743_v13  ;;  %644 = vmatprep.mubr.f32.mxu1 %v743_v13  ;;  %628 = vmatpush3.msra.mxu0 %v724_v4  ;;  %v166_v22 = vand.u32 4294901760, %v165_v16  ;;  %v173_v23 = vand.u32 4294901760, %v172_v17 }
   0x8   :  { %629 = vmatprep.subr.mxu0 %v726_v5  ;;  %v153_v24 = vsub.f32 %v151_v12, %v152_v18  ;;  %v160_v26 = vsub.f32 %v158_v14, %v159_v20  ;;  %v117_v27 = vand.u32 4294901760, %v116_v21  ;;  %v22_v56 = vld [vmem:[#allocation2 + $0x8] sm:$0xff] }
   0x9   :  { %v107_v25 = vand.u32 4294901760, %v106_v19  ;;  %630 = vmatpush3.msra.mxu0 %v726_v5  ;;  %v167_v28 = vsub.f32 %v165_v16, %v166_v22  ;;  %v174_v29 = vsub.f32 %v172_v17, %v173_v23  ;;  %v21_v60 = vld [vmem:[#allocation2] sm:$0xff] }
   0xa   :  { %631 = vmatprep.subr.mxu0 %v737_v9  ;;  %v154_v30 = vand.u32 4294901760, %v153_v24  ;;  %v161_v32 = vand.u32 4294901760, %v160_v26  ;;  %v118_v33 = vsub.f32 %v116_v21, %v117_v27 }
   0xb   :  { %v108_v31 = vsub.f32 %v106_v19, %v107_v25  ;;  %632 = vmatpush3.msra.mxu0 %v737_v9  ;;  %v168_v36 = vand.u32 4294901760, %v167_v28  ;;  %v175_v37 = vand.u32 4294901760, %v174_v29 }
   0xc   :  { %636 = vmatprep.subr.mxu1 %v154_v30  ;;  %647 = vmatprep.subr.mxu0 %v151_v12  ;;  %v119_v35 = vand.u32 4294901760, %v118_v33 }
   0xd   :  { %v109_v34 = vand.u32 4294901760, %v108_v31  ;;  %637 = vmatpush3.msra.mxu1 %v154_v30 }
   0xe   :  { %638 = vmatprep.subr.mxu1 %v161_v32 }
   0xf   :  { %633 = vmatprep.mubr.f32.mxu0 %v109_v34  ;;  %639 = vmatpush3.msra.mxu1 %v161_v32 }
  0x10   :  { %634 = vmatmul.mubr.f32.vlgmr.msra.gmra.mxu0 %v119_v35  ;;  %640 = vmatprep.subr.mxu1 %v168_v36 }
  0x11   :  { %648 = vmatpush3.msra.mxu0 %v151_v12  ;;  %641 = vmatpush3.msra.mxu1 %v168_v36 }
  0x12   :  { %649 = vmatprep.subr.mxu0 %v158_v14  ;;  %642 = vmatprep.subr.mxu1 %v175_v37 }
  0x13   :  { %650 = vmatpush3.msra.mxu0 %v158_v14  ;;  %643 = vmatpush3.msra.mxu1 %v175_v37 }
  0x14   :  { %651 = vmatprep.subr.mxu0 %v165_v16  ;;  %645 = vmatmul.mubr.f32.vlgmr.msra.gmra.mxu1 %v746_v15 }
  0x15   :  { %652 = vmatpush3.msra.mxu0 %v165_v16  ;;  %658 = vmatprep.subr.mxu1 %v722_v3 }
  0x16   :  { %653 = vmatprep.subr.mxu0 %v172_v17  ;;  %655 = vmatprep.mubr.f32.mxu0 %v106_v19 }
  0x17   :  { %654 = vmatpush3.msra.mxu0 %v172_v17  ;;  %659 = vmatpush3.msra.mxu1 %v722_v3 }
  0x18   :  { %656 = vmatmul.mubr.f32.vlgmr.msra.gmra.mxu0 %v116_v21  ;;  %660 = vmatprep.subr.mxu1 %v724_v4 }
  0x19   :  { %669 = vmatprep.subr.mxu0 %v152_v18  ;;  %661 = vmatpush3.msra.mxu1 %v724_v4 }
  0x1a   :  { %670 = vmatpush3.msra.mxu0 %v152_v18  ;;  %662 = vmatprep.subr.mxu1 %v726_v5 }
  0x1b   :  { %671 = vmatprep.subr.mxu0 %v159_v20  ;;  %663 = vmatpush3.msra.mxu1 %v726_v5 }
  0x1c   :  { %672 = vmatpush3.msra.mxu0 %v159_v20  ;;  %664 = vmatprep.subr.mxu1 %v737_v9 }
  0x1d   :  { %673 = vmatprep.subr.mxu0 %v166_v22  ;;  %665 = vmatpush3.msra.mxu1 %v737_v9 }
  0x1e   :  { %666 = vmatprep.mubr.f32.mxu1 %v107_v25  ;;  %674 = vmatpush3.msra.mxu0 %v166_v22 }
  0x1f   :  { %667 = vmatmul.mubr.f32.vlgmr.msra.gmra.mxu1 %v117_v27  ;;  %675 = vmatprep.subr.mxu0 %v173_v23 }
  0x20   :  { %680 = vmatprep.subr.mxu1 %v722_v3  ;;  %676 = vmatpush3.msra.mxu0 %v173_v23 }
  0x21   :  { %677 = vmatprep.mubr.f32.mxu0 %v743_v13  ;;  %681 = vmatpush3.msra.mxu1 %v722_v3 }
  0x22   :  { %678 = vmatmul.mubr.f32.vlgmr.msra.gmra.mxu0 %v746_v15  ;;  %682 = vmatprep.subr.mxu1 %v724_v4 }
  0x23   :  { %688 = vmatprep.mubr.f32.mxu1 %v743_v13  ;;  %683 = vmatpush3.msra.mxu1 %v724_v4 }
  0x24   :  { %684 = vmatprep.subr.mxu1 %v726_v5 }
  0x25   :  { %685 = vmatpush3.msra.mxu1 %v726_v5 }
  0x26   :  { %686 = vmatprep.subr.mxu1 %v737_v9 }
  0x27   :  { %687 = vmatpush3.msra.mxu1 %v737_v9 }
  0x28   :  { %689 = vmatmul.mubr.f32.vlgmr.msra.gmra.mxu1 %v746_v15 }
  0xd0   :  { %v635_v39 = vpop.f32.mrf.mxu0 }
  0xd2   :  { %v111_v40 = vpop.f32.mrf.mxu0 }
  0xd4   :  { %v646_v41 = vpop.f32.mrf.mxu1 }
  0xd5   :  { %v219_v44 = vadd.f32 %v646_v41, %v635_v39 }
  0xd6   :  { %v212_v42 = vpop.f32.mrf.mxu1 }
  0xd7   :  { %v213_v46 = vadd.f32 %v212_v42, %v111_v40 }
  0xd8   :  { %v657_v43 = vpop.f32.mrf.mxu0 }
  0xd9   :  { %v306_v48 = vadd.f32 %v657_v43, %v219_v44 }
  0xda   :  { %v298_v47 = vpop.f32.mrf.mxu0 }
  0xdb   :  { %v299_v51 = vadd.f32 %v298_v47, %v213_v46 }
  0xdf   :  { %v668_v45 = vpop.f32.mrf.mxu1 }
  0xe0   :  { %v391_v52 = vadd.f32 %v668_v45, %v306_v48 }
  0xe1   :  { %v382_v49 = vpop.f32.mrf.mxu1 }
  0xe2   :  { %v679_v50 = vpop.f32.mrf.mxu0  ;;  %v383_v53 = vadd.f32 %v382_v49, %v299_v51 }
  0xe3   :  { %v480_v55 = vadd.f32 %v679_v50, %v391_v52 }
  0xe4   :  { %v473_v54 = vpop.f32.mrf.mxu0 }
  0xe5   :  { %v474_v58 = vadd.f32 %v473_v54, %v383_v53 }
  0xe8   :  { %v690_v57 = vpop.f32.mrf.mxu1 }
  0xe9   :  { %v561_v59 = vadd.f32 %v690_v57, %v480_v55 }
  0xea   :  { %v554_v61 = vpop.f32.mrf.mxu1 }
  0xeb   :  { %v565_v62 = vadd.f32 %v561_v59, %v22_v56  ;;  %v555_v63 = vadd.f32 %v554_v61, %v474_v58 }
  0xed   :  { %567 = vst.msk [vmem:[#allocation2 + $0x8] sm:$0xff] %vm18_vm0, %v565_v62  ;;  %v564_v0 = vadd.f32 %v555_v63, %v21_v60 }
  0xef   :  { %566 = vst.msk [vmem:[#allocation2] sm:$0xff] %vm18_vm0, %v564_v0 }
  0xf4   :  { %v572_v2 = vld [vmem:[#allocation2 + $0x8] sm:$0xff] }
  0xf5   :  { %v581_v3 = vadd.f32 %v588_v1, %v572_v2 }
  0xf6   :  { %v571_v4 = vld [vmem:[#allocation2] sm:$0xff] }
  0xf7   :  { %583 = vst.msk [vmem:[%s799_s3 + $0x8] sm:$0xff] %vm18_vm0, %v581_v3  ;;  %v580_v5 = vadd.f32 %v588_v1, %v571_v4 }
  0xf9   :  { %582 = vst.msk [vmem:[%s799_s3] sm:$0xff] %vm18_vm0, %v580_v5 }

// kernel: decoder_layer.21
= control target key start
LH: loop header
LB: loop body
LE: loop exit
PB: predicated region body
PF: predicated region fallthrough
CT: control target
= control target key end

     0   :  { %vm35_vm0 = vcmask 261120   ;;  %vm18_vm1 = vcmask 523264   ;;  %v831_v52 = vmov 0.0   ;;  %s1015_s1 = inlined_call_operand.vmem [shape: f32[32,64], index: 1, kind: input, shape index: {}]   ;;  %s1016_s0 = inlined_call_operand.vmem [shape: f32[32,32], index: 0, kind: input, shape index: {}]   ;;  %s1017_s2 = inlined_call_operand.vmem [shape: f32[1,64], index: 2, kind: input, shape index: {}]   ;;  %s1018_s3 = inlined_call_operand.vmem [shape: f32[32,64], index: 3, kind: output, shape index: {}]  }
   0x1   :  { %v34_v0 = vld [vmem:[%s1015_s1 + $0x18] sm:$0xff]  ;;  %v33_v1 = vld [vmem:[%s1015_s1 + $0x10] sm:$0xff]  ;;  %v32_v2 = vld [vmem:[%s1015_s1 + $0x8] sm:$0xff]  ;;  %20 = vst.msk [vmem:[#allocation2 + $0x8] sm:$0xff] %vm18_vm1, %v831_v52 }
   0x2   :  { %v861_v3 = vand.u32 4294901760, %v34_v0  ;;  %v863_v4 = vand.u32 4294901760, %v33_v1  ;;  %v865_v5 = vand.u32 4294901760, %v32_v2  ;;  %v31_v6 = vld [vmem:[%s1015_s1] sm:$0xff]  ;;  %v28_v8 = vld [vmem:[%s1016_s0 + $0x8] sm:$0xff]  ;;  %v29_v12 = vld [vmem:[%s1016_s0 + $0x10] sm:$0xff] }
   0x3   :  { %v27_v7 = vld [vmem:[%s1016_s0] sm:$0xff]  ;;  %v876_v9 = vand.u32 4294901760, %v31_v6  ;;  %v40_v11 = vsel %vm35_vm0, %v28_v8, 0  ;;  %v30_v13 = vld [vmem:[%s1016_s0 + $0x18] sm:$0xff]  ;;  %v43_v19 = vsel %vm35_vm0, %v29_v12, 0  ;;  %19 = vst.msk [vmem:[#allocation2] sm:$0xff] %vm18_vm1, %v831_v52 }
   0x4   :  { %v37_v10 = vsel %vm35_vm0, %v27_v7, 0  ;;  %746 = vmatprep.subr.mxu0 %v861_v3  ;;  %v183_v14 = vsub.f32 %v34_v0, %v861_v3  ;;  %v890_v16 = vand.u32 4294901760, %v40_v11  ;;  %v190_v17 = vsub.f32 %v33_v1, %v863_v4  ;;  %21 = vst.msk [vmem:[#allocation2 + $0x10] sm:$0xff] %vm18_vm1, %v831_v52  ;;  %22 = vst.msk [vmem:[#allocation2 + $0x18] sm:$0xff] %vm18_vm1, %v831_v52 }
   0x5   :  { %v888_v15 = vand.u32 4294901760, %v37_v10  ;;  %747 = vmatpush3.msra.mxu0 %v861_v3  ;;  %v197_v18 = vsub.f32 %v32_v2, %v865_v5  ;;  %v46_v20 = vsel %vm35_vm0, %v30_v13, 0  ;;  %v204_v21 = vsub.f32 %v31_v6, %v876_v9 }
   0x6   :  { %748 = vmatprep.subr.mxu0 %v863_v4  ;;  %v899_v22 = vand.u32 4294901760, %v183_v14  ;;  %v905_v24 = vsub.f32 %v40_v11, %v890_v16  ;;  %v907_v25 = vand.u32 4294901760, %v190_v17  ;;  %v913_v27 = vand.u32 4294901760, %v43_v19 }
   0x7   :  { %v902_v23 = vsub.f32 %v37_v10, %v888_v15  ;;  %768 = vmatprep.mubr.f32.mxu1 %v888_v15  ;;  %749 = vmatpush3.msra.mxu0 %v863_v4  ;;  %v911_v26 = vand.u32 4294901760, %v197_v18  ;;  %v915_v28 = vand.u32 4294901760, %v46_v20  ;;  %v917_v29 = vand.u32 4294901760, %v204_v21 }
   0x8   :  { %750 = vmatprep.subr.mxu0 %v865_v5  ;;  %v185_v30 = vsub.f32 %v183_v14, %v899_v22  ;;  %v129_v32 = vand.u32 4294901760, %v905_v24  ;;  %v192_v33 = vsub.f32 %v190_v17, %v907_v25  ;;  %v927_v35 = vsub.f32 %v43_v19, %v913_v27 }
   0x9   :  { %v119_v31 = vand.u32 4294901760, %v902_v23  ;;  %751 = vmatpush3.msra.mxu0 %v865_v5  ;;  %v199_v34 = vsub.f32 %v197_v18, %v911_v26  ;;  %v930_v36 = vsub.f32 %v46_v20, %v915_v28  ;;  %v206_v43 = vsub.f32 %v204_v21, %v917_v29  ;;  %v24_v20 = vld [vmem:[#allocation2 + $0x8] sm:$0xff] }
   0xa   :  { %752 = vmatprep.subr.mxu0 %v876_v9  ;;  %v186_v37 = vand.u32 4294901760, %v185_v30  ;;  %v130_v39 = vsub.f32 %v905_v24, %v129_v32  ;;  %v193_v40 = vand.u32 4294901760, %v192_v33  ;;  %v139_v41 = vand.u32 4294901760, %v927_v35 }
   0xb   :  { %v120_v38 = vsub.f32 %v902_v23, %v119_v31  ;;  %753 = vmatpush3.msra.mxu0 %v876_v9  ;;  %v149_v42 = vand.u32 4294901760, %v930_v36  ;;  %v200_v46 = vand.u32 4294901760, %v199_v34  ;;  %v207_v51 = vand.u32 4294901760, %v206_v43 }
   0xc   :  { %760 = vmatprep.subr.mxu1 %v186_v37  ;;  %v131_v45 = vand.u32 4294901760, %v130_v39  ;;  %774 = vmatprep.subr.mxu0 %v183_v14  ;;  %v140_v47 = vsub.f32 %v927_v35, %v139_v41 }
   0xd   :  { %v121_v44 = vand.u32 4294901760, %v120_v38  ;;  %761 = vmatpush3.msra.mxu1 %v186_v37  ;;  %v150_v48 = vsub.f32 %v930_v36, %v149_v42 }
   0xe   :  { %762 = vmatprep.subr.mxu1 %v193_v40  ;;  %v141_v49 = vand.u32 4294901760, %v140_v47 }
   0xf   :  { %754 = vmatprep.mubr.f32.mxu0 %v121_v44  ;;  %763 = vmatpush3.msra.mxu1 %v193_v40  ;;  %v151_v50 = vand.u32 4294901760, %v150_v48 }
  0x10   :  { %755 = vmatmul.mubr.f32.vlgmr.msra.gmra.mxu0 %v131_v45  ;;  %764 = vmatprep.subr.mxu1 %v200_v46 }
  0x11   :  { %775 = vmatpush3.msra.mxu0 %v183_v14  ;;  %757 = vmatprep.mubr.f32.mxu0 %v141_v49 }
  0x12   :  { %776 = vmatprep.subr.mxu0 %v190_v17  ;;  %765 = vmatpush3.msra.mxu1 %v200_v46 }
  0x13   :  { %777 = vmatpush3.msra.mxu0 %v190_v17  ;;  %766 = vmatprep.subr.mxu1 %v207_v51 }
  0x14   :  { %758 = vmatmul.mubr.f32.gmra.mxu0 %v151_v50  ;;  %778 = vmatprep.subr.mxu0 %v197_v18 }
  0x15   :  { %767 = vmatpush3.msra.mxu1 %v207_v51  ;;  %779 = vmatpush3.msra.mxu0 %v197_v18 }
  0x16   :  { %769 = vmatmul.mubr.f32.vlgmr.msra.gmra.mxu1 %v890_v16  ;;  %780 = vmatprep.subr.mxu0 %v204_v21 }
  0x17   :  { %788 = vmatprep.subr.mxu1 %v861_v3  ;;  %781 = vmatpush3.msra.mxu0 %v204_v21 }
  0x18   :  { %782 = vmatprep.mubr.f32.mxu0 %v902_v23  ;;  %789 = vmatpush3.msra.mxu1 %v861_v3 }
  0x19   :  { %783 = vmatmul.mubr.f32.vlgmr.msra.gmra.mxu0 %v905_v24  ;;  %790 = vmatprep.subr.mxu1 %v863_v4 }
  0x1a   :  { %802 = vmatprep.subr.mxu0 %v899_v22  ;;  %771 = vmatprep.mubr.f32.mxu1 %v913_v27 }
  0x1b   :  { %791 = vmatpush3.msra.mxu1 %v863_v4  ;;  %803 = vmatpush3.msra.mxu0 %v899_v22 }
  0x1c   :  { %772 = vmatmul.mubr.f32.gmra.mxu1 %v915_v28  ;;  %792 = vmatprep.subr.mxu1 %v865_v5 }
  0x1d   :  { %804 = vmatprep.subr.mxu0 %v907_v25  ;;  %785 = vmatprep.mubr.f32.mxu0 %v927_v35 }
  0x1e   :  { %793 = vmatpush3.msra.mxu1 %v865_v5  ;;  %805 = vmatpush3.msra.mxu0 %v907_v25 }
  0x1f   :  { %794 = vmatprep.subr.mxu1 %v876_v9  ;;  %786 = vmatmul.mubr.f32.gmra.mxu0 %v930_v36  ;;  %v25_v36 = vld [vmem:[#allocation2 + $0x10] sm:$0xff] }
  0x20   :  { %806 = vmatprep.subr.mxu0 %v911_v26  ;;  %795 = vmatpush3.msra.mxu1 %v876_v9 }
  0x21   :  { %796 = vmatprep.mubr.f32.mxu1 %v119_v31  ;;  %807 = vmatpush3.msra.mxu0 %v911_v26  ;;  %v23_v26 = vld [vmem:[#allocation2] sm:$0xff]  ;;  %v26_v31 = vld [vmem:[#allocation2 + $0x18] sm:$0xff] }
  0x22   :  { %797 = vmatmul.mubr.f32.vlgmr.msra.gmra.mxu1 %v129_v32  ;;  %808 = vmatprep.subr.mxu0 %v917_v29 }
  0x23   :  { %816 = vmatprep.subr.mxu1 %v861_v3  ;;  %809 = vmatpush3.msra.mxu0 %v917_v29 }
  0x24   :  { %810 = vmatprep.mubr.f32.mxu0 %v888_v15  ;;  %817 = vmatpush3.msra.mxu1 %v861_v3 }
  0x25   :  { %811 = vmatmul.mubr.f32.vlgmr.msra.gmra.mxu0 %v890_v16  ;;  %818 = vmatprep.subr.mxu1 %v863_v4 }
  0x26   :  { %799 = vmatprep.mubr.f32.mxu1 %v139_v41  ;;  %819 = vmatpush3.msra.mxu1 %v863_v4  ;;  %v697_v41 = vld [vmem:[%s1017_s2] ss:$0 sm:$0xff] }
  0x27   :  { %813 = vmatprep.mubr.f32.mxu0 %v913_v27  ;;  %800 = vmatmul.mubr.f32.gmra.mxu1 %v149_v42 }
  0x28   :  { %820 = vmatprep.subr.mxu1 %v865_v5  ;;  %824 = vmatprep.mubr.f32.mxu1 %v888_v15 }
  0x29   :  { %821 = vmatpush3.msra.mxu1 %v865_v5  ;;  %814 = vmatmul.mubr.f32.gmra.mxu0 %v915_v28 }
  0x2a   :  { %822 = vmatprep.subr.mxu1 %v876_v9 }
  0x2b   :  { %823 = vmatpush3.msra.mxu1 %v876_v9 }
  0x2c   :  { %825 = vmatmul.mubr.f32.vlgmr.msra.gmra.mxu1 %v890_v16 }
  0x2d   :  { %827 = vmatprep.mubr.f32.mxu1 %v913_v27 }
  0x30   :  { %828 = vmatmul.mubr.f32.gmra.mxu1 %v915_v28 }
  0xd0   :  { %v756_v53 = vpop.f32.mrf.mxu0 }
  0xd2   :  { %v123_v54 = vpop.f32.mrf.mxu0 }
  0xd4   :  { %v759_v55 = vpop.f32.mrf.mxu0 }
  0xd6   :  { %v143_v56 = vpop.f32.mrf.mxu0  ;;  %v770_v57 = vpop.f32.mrf.mxu1 }
  0xd7   :  { %v251_v0 = vadd.f32 %v770_v57, %v756_v53 }
  0xd8   :  { %v244_v58 = vpop.f32.mrf.mxu1 }
  0xd9   :  { %v784_v59 = vpop.f32.mrf.mxu0  ;;  %v245_v3 = vadd.f32 %v244_v58, %v123_v54 }
  0xda   :  { %v350_v5 = vadd.f32 %v784_v59, %v251_v0 }
  0xdb   :  { %v342_v61 = vpop.f32.mrf.mxu0 }
  0xdc   :  { %v773_v60 = vpop.f32.mrf.mxu1  ;;  %v343_v8 = vadd.f32 %v342_v61, %v245_v3 }
  0xdd   :  { %v263_v6 = vadd.f32 %v773_v60, %v759_v55 }
  0xde   :  { %v256_v62 = vpop.f32.mrf.mxu1 }
  0xdf   :  { %v787_v63 = vpop.f32.mrf.mxu0  ;;  %v257_v9 = vadd.f32 %v256_v62, %v143_v56 }
  0xe0   :  { %v364_v13 = vadd.f32 %v787_v63, %v263_v6 }
  0xe1   :  { %v356_v1 = vpop.f32.mrf.mxu0 }
  0xe2   :  { %v798_v2 = vpop.f32.mrf.mxu1  ;;  %v357_v17 = vadd.f32 %v356_v1, %v257_v9 }
  0xe3   :  { %v449_v10 = vadd.f32 %v798_v2, %v350_v5 }
  0xe4   :  { %v440_v4 = vpop.f32.mrf.mxu1 }
  0xe5   :  { %v812_v7 = vpop.f32.mrf.mxu0  ;;  %v441_v14 = vadd.f32 %v440_v4, %v343_v8 }
  0xe6   :  { %v554_v18 = vadd.f32 %v812_v7, %v449_v10 }
  0xe7   :  { %v547_v11 = vpop.f32.mrf.mxu0  ;;  %v801_v12 = vpop.f32.mrf.mxu1 }
  0xe8   :  { %v465_v19 = vadd.f32 %v801_v12, %v364_v13  ;;  %v548_v22 = vadd.f32 %v547_v11, %v441_v14 }
  0xe9   :  { %v456_v15 = vpop.f32.mrf.mxu1  ;;  %v815_v16 = vpop.f32.mrf.mxu0 }
  0xea   :  { %v457_v23 = vadd.f32 %v456_v15, %v357_v17  ;;  %v566_v28 = vadd.f32 %v815_v16, %v465_v19 }
  0xeb   :  { %v559_v25 = vpop.f32.mrf.mxu0 }
  0xec   :  { %v826_v21 = vpop.f32.mrf.mxu1  ;;  %v560_v33 = vadd.f32 %v559_v25, %v457_v23 }
  0xed   :  { %v647_v24 = vadd.f32 %v826_v21, %v554_v18 }
  0xee   :  { %v640_v27 = vpop.f32.mrf.mxu1 }
  0xef   :  { %v663_v29 = vadd.f32 %v647_v24, %v24_v20  ;;  %v641_v30 = vadd.f32 %v640_v27, %v548_v22 }
  0xf0   :  { %v829_v32 = vpop.f32.mrf.mxu1 }
  0xf1   :  { %668 = vst.msk [vmem:[#allocation2 + $0x8] sm:$0xff] %vm18_vm1, %v663_v29  ;;  %v662_v34 = vadd.f32 %v641_v30, %v23_v26  ;;  %v659_v35 = vadd.f32 %v829_v32, %v566_v28 }
  0xf2   :  { %v652_v37 = vpop.f32.mrf.mxu1 }
  0xf3   :  { %667 = vst.msk [vmem:[#allocation2] sm:$0xff] %vm18_vm1, %v662_v34  ;;  %v665_v38 = vadd.f32 %v659_v35, %v26_v31  ;;  %v653_v39 = vadd.f32 %v652_v37, %v560_v33 }
  0xf5   :  { %670 = vst.msk [vmem:[#allocation2 + $0x18] sm:$0xff] %vm18_vm1, %v665_v38  ;;  %v664_v40 = vadd.f32 %v653_v39, %v25_v36 }
  0xf7   :  { %669 = vst.msk [vmem:[#allocation2 + $0x10] sm:$0xff] %vm18_vm1, %v664_v40 }
  0xf8   :  { %v675_v42 = vld [vmem:[#allocation2 + $0x8] sm:$0xff] }
  0xf9   :  { %v686_v43 = vadd.f32 %v697_v41, %v675_v42 }
  0xfa   :  { %v674_v44 = vld [vmem:[#allocation2] sm:$0xff] }
  0xfb   :  { %690 = vst.msk [vmem:[%s1018_s3 + $0x8] sm:$0xff] %vm18_vm1, %v686_v43  ;;  %v685_v45 = vadd.f32 %v697_v41, %v674_v44 }
  0xfc   :  { %v677_v46 = vld [vmem:[#allocation2 + $0x18] sm:$0xff] }
  0xfd   :  { %689 = vst.msk [vmem:[%s1018_s3] sm:$0xff] %vm18_vm1, %v685_v45  ;;  %v688_v47 = vadd.f32 %v697_v41, %v677_v46 }
  0xfe   :  { %v676_v48 = vld [vmem:[#allocation2 + $0x10] sm:$0xff] }
  0xff   :  { %692 = vst.msk [vmem:[%s1018_s3 + $0x18] sm:$0xff] %vm18_vm1, %v688_v47  ;;  %v687_v49 = vadd.f32 %v697_v41, %v676_v48 }
 0x101   :  { %691 = vst.msk [vmem:[%s1018_s3 + $0x10] sm:$0xff] %vm18_vm1, %v687_v49 }

// kernel: decoder_layer.26
= control target key start
LH: loop header
LB: loop body
LE: loop exit
PB: predicated region body
PF: predicated region fallthrough
CT: control target
= control target key end

     0   :  { %vm29_vm0 = vcmask 261120   ;;  %vm18_vm1 = vcmask 523264   ;;  %v695_v38 = vmov 0.0   ;;  %s797_s1 = inlined_call_operand.vmem [shape: f32[32,64], index: 1, kind: input, shape index: {}]   ;;  %s798_s0 = inlined_call_operand.vmem [shape: f32[16,32], index: 0, kind: input, shape index: {}]   ;;  %s799_s2 = inlined_call_operand.vmem [shape: f32[1,64], index: 2, kind: input, shape index: {}]   ;;  %s800_s3 = inlined_call_operand.vmem [shape: f32[16,64], index: 3, kind: output, shape index: {}]  }
   0x1   :  { %v28_v0 = vld [vmem:[%s797_s1 + $0x18] sm:$0xff]  ;;  %v27_v1 = vld [vmem:[%s797_s1 + $0x10] sm:$0xff]  ;;  %v26_v2 = vld [vmem:[%s797_s1 + $0x8] sm:$0xff]  ;;  %20 = vst.msk [vmem:[#allocation2 + $0x8] sm:$0xff] %vm18_vm1, %v695_v38 }
   0x2   :  { %v725_v3 = vand.u32 4294901760, %v28_v0  ;;  %v727_v4 = vand.u32 4294901760, %v27_v1  ;;  %v729_v5 = vand.u32 4294901760, %v26_v2  ;;  %v25_v6 = vld [vmem:[%s797_s1] sm:$0xff]  ;;  %v24_v8 = vld [vmem:[%s798_s0 + $0x8] sm:$0xff]  ;;  %19 = vst.msk [vmem:[#allocation2] sm:$0xff] %vm18_vm1, %v695_v38 }
   0x3   :  { %v23_v7 = vld [vmem:[%s798_s0] sm:$0xff]  ;;  %v740_v9 = vand.u32 4294901760, %v25_v6  ;;  %v34_v11 = vsel %vm29_vm0, %v24_v8, 0 }
   0x4   :  { %v31_v10 = vsel %vm29_vm0, %v23_v7, 0  ;;  %628 = vmatprep.subr.mxu0 %v725_v3  ;;  %v151_v12 = vsub.f32 %v28_v0, %v725_v3  ;;  %v746_v14 = vand.u32 4294901760, %v34_v11  ;;  %v158_v15 = vsub.f32 %v27_v1, %v727_v4  ;;  %v591_v1 = vld [vmem:[%s799_s2] ss:$0 sm:$0xff] }
   0x5   :  { %v744_v13 = vand.u32 4294901760, %v31_v10  ;;  %629 = vmatpush3.msra.mxu0 %v725_v3  ;;  %v165_v16 = vsub.f32 %v26_v2, %v729_v5  ;;  %v172_v17 = vsub.f32 %v25_v6, %v740_v9 }
   0x6   :  { %630 = vmatprep.subr.mxu0 %v727_v4  ;;  %v152_v18 = vand.u32 4294901760, %v151_v12  ;;  %v159_v20 = vand.u32 4294901760, %v158_v15  ;;  %v116_v21 = vsub.f32 %v34_v11, %v746_v14 }
   0x7   :  { %v106_v19 = vsub.f32 %v31_v10, %v744_v13  ;;  %647 = vmatprep.mubr.f32.mxu1 %v744_v13  ;;  %631 = vmatpush3.msra.mxu0 %v727_v4  ;;  %v166_v22 = vand.u32 4294901760, %v165_v16  ;;  %v173_v23 = vand.u32 4294901760, %v172_v17 }
   0x8   :  { %632 = vmatprep.subr.mxu0 %v729_v5  ;;  %v153_v24 = vsub.f32 %v151_v12, %v152_v18  ;;  %v160_v26 = vsub.f32 %v158_v15, %v159_v20  ;;  %v117_v27 = vand.u32 4294901760, %v116_v21  ;;  %v22_v56 = vld [vmem:[#allocation2 + $0x8] sm:$0xff] }
   0x9   :  { %v107_v25 = vand.u32 4294901760, %v106_v19  ;;  %633 = vmatpush3.msra.mxu0 %v729_v5  ;;  %v167_v28 = vsub.f32 %v165_v16, %v166_v22  ;;  %v174_v29 = vsub.f32 %v172_v17, %v173_v23  ;;  %v21_v60 = vld [vmem:[#allocation2] sm:$0xff] }
   0xa   :  { %634 = vmatprep.subr.mxu0 %v740_v9  ;;  %v154_v30 = vand.u32 4294901760, %v153_v24  ;;  %v161_v32 = vand.u32 4294901760, %v160_v26  ;;  %v118_v33 = vsub.f32 %v116_v21, %v117_v27 }
   0xb   :  { %v108_v31 = vsub.f32 %v106_v19, %v107_v25  ;;  %635 = vmatpush3.msra.mxu0 %v740_v9  ;;  %v168_v36 = vand.u32 4294901760, %v167_v28  ;;  %v175_v37 = vand.u32 4294901760, %v174_v29 }
   0xc   :  { %639 = vmatprep.subr.mxu1 %v154_v30  ;;  %650 = vmatprep.subr.mxu0 %v151_v12  ;;  %v119_v35 = vand.u32 4294901760, %v118_v33 }
   0xd   :  { %v109_v34 = vand.u32 4294901760, %v108_v31  ;;  %640 = vmatpush3.msra.mxu1 %v154_v30 }
   0xe   :  { %641 = vmatprep.subr.mxu1 %v161_v32 }
   0xf   :  { %636 = vmatprep.mubr.f32.mxu0 %v109_v34  ;;  %642 = vmatpush3.msra.mxu1 %v161_v32 }
  0x10   :  { %637 = vmatmul.mubr.f32.vlgmr.msra.gmra.mxu0 %v119_v35  ;;  %643 = vmatprep.subr.mxu1 %v168_v36 }
  0x11   :  { %651 = vmatpush3.msra.mxu0 %v151_v12  ;;  %644 = vmatpush3.msra.mxu1 %v168_v36 }
  0x12   :  { %652 = vmatprep.subr.mxu0 %v158_v15  ;;  %645 = vmatprep.subr.mxu1 %v175_v37 }
  0x13   :  { %653 = vmatpush3.msra.mxu0 %v158_v15  ;;  %646 = vmatpush3.msra.mxu1 %v175_v37 }
  0x14   :  { %654 = vmatprep.subr.mxu0 %v165_v16  ;;  %648 = vmatmul.mubr.f32.vlgmr.msra.gmra.mxu1 %v746_v14 }
  0x15   :  { %655 = vmatpush3.msra.mxu0 %v165_v16  ;;  %661 = vmatprep.subr.mxu1 %v725_v3 }
  0x16   :  { %656 = vmatprep.subr.mxu0 %v172_v17  ;;  %658 = vmatprep.mubr.f32.mxu0 %v106_v19 }
  0x17   :  { %657 = vmatpush3.msra.mxu0 %v172_v17  ;;  %662 = vmatpush3.msra.mxu1 %v725_v3 }
  0x18   :  { %659 = vmatmul.mubr.f32.vlgmr.msra.gmra.mxu0 %v116_v21  ;;  %663 = vmatprep.subr.mxu1 %v727_v4 }
  0x19   :  { %672 = vmatprep.subr.mxu0 %v152_v18  ;;  %664 = vmatpush3.msra.mxu1 %v727_v4 }
  0x1a   :  { %673 = vmatpush3.msra.mxu0 %v152_v18  ;;  %665 = vmatprep.subr.mxu1 %v729_v5 }
  0x1b   :  { %674 = vmatprep.subr.mxu0 %v159_v20  ;;  %666 = vmatpush3.msra.mxu1 %v729_v5 }
  0x1c   :  { %675 = vmatpush3.msra.mxu0 %v159_v20  ;;  %667 = vmatprep.subr.mxu1 %v740_v9 }
  0x1d   :  { %676 = vmatprep.subr.mxu0 %v166_v22  ;;  %668 = vmatpush3.msra.mxu1 %v740_v9 }
  0x1e   :  { %669 = vmatprep.mubr.f32.mxu1 %v107_v25  ;;  %677 = vmatpush3.msra.mxu0 %v166_v22 }
  0x1f   :  { %670 = vmatmul.mubr.f32.vlgmr.msra.gmra.mxu1 %v117_v27  ;;  %678 = vmatprep.subr.mxu0 %v173_v23 }
  0x20   :  { %683 = vmatprep.subr.mxu1 %v725_v3  ;;  %679 = vmatpush3.msra.mxu0 %v173_v23 }
  0x21   :  { %680 = vmatprep.mubr.f32.mxu0 %v744_v13  ;;  %684 = vmatpush3.msra.mxu1 %v725_v3 }
  0x22   :  { %681 = vmatmul.mubr.f32.vlgmr.msra.gmra.mxu0 %v746_v14  ;;  %685 = vmatprep.subr.mxu1 %v727_v4 }
  0x23   :  { %691 = vmatprep.mubr.f32.mxu1 %v744_v13  ;;  %686 = vmatpush3.msra.mxu1 %v727_v4 }
  0x24   :  { %687 = vmatprep.subr.mxu1 %v729_v5 }
  0x25   :  { %688 = vmatpush3.msra.mxu1 %v729_v5 }
  0x26   :  { %689 = vmatprep.subr.mxu1 %v740_v9 }
  0x27   :  { %690 = vmatpush3.msra.mxu1 %v740_v9 }
  0x28   :  { %692 = vmatmul.mubr.f32.vlgmr.msra.gmra.mxu1 %v746_v14 }
  0xd0   :  { %v638_v39 = vpop.f32.mrf.mxu0 }
  0xd2   :  { %v111_v40 = vpop.f32.mrf.mxu0 }
  0xd4   :  { %v649_v41 = vpop.f32.mrf.mxu1 }
  0xd5   :  { %v219_v44 = vadd.f32 %v649_v41, %v638_v39 }
  0xd6   :  { %v212_v42 = vpop.f32.mrf.mxu1 }
  0xd7   :  { %v213_v46 = vadd.f32 %v212_v42, %v111_v40 }
  0xd8   :  { %v660_v43 = vpop.f32.mrf.mxu0 }
  0xd9   :  { %v306_v48 = vadd.f32 %v660_v43, %v219_v44 }
  0xda   :  { %v298_v47 = vpop.f32.mrf.mxu0 }
  0xdb   :  { %v299_v51 = vadd.f32 %v298_v47, %v213_v46 }
  0xdf   :  { %v671_v45 = vpop.f32.mrf.mxu1 }
  0xe0   :  { %v391_v52 = vadd.f32 %v671_v45, %v306_v48 }
  0xe1   :  { %v382_v49 = vpop.f32.mrf.mxu1 }
  0xe2   :  { %v682_v50 = vpop.f32.mrf.mxu0  ;;  %v383_v53 = vadd.f32 %v382_v49, %v299_v51 }
  0xe3   :  { %v480_v55 = vadd.f32 %v682_v50, %v391_v52 }
  0xe4   :  { %v473_v54 = vpop.f32.mrf.mxu0 }
  0xe5   :  { %v474_v58 = vadd.f32 %v473_v54, %v383_v53 }
  0xe8   :  { %v693_v57 = vpop.f32.mrf.mxu1 }
  0xe9   :  { %v561_v59 = vadd.f32 %v693_v57, %v480_v55 }
  0xea   :  { %v554_v61 = vpop.f32.mrf.mxu1 }
  0xeb   :  { %v565_v62 = vadd.f32 %v561_v59, %v22_v56  ;;  %v555_v63 = vadd.f32 %v554_v61, %v474_v58 }
  0xed   :  { %568 = vst.msk [vmem:[#allocation2 + $0x8] sm:$0xff] %vm18_vm1, %v565_v62  ;;  %v564_v0 = vadd.f32 %v555_v63, %v21_v60 }
  0xef   :  { %567 = vst.msk [vmem:[#allocation2] sm:$0xff] %vm18_vm1, %v564_v0 }
  0xf4   :  { %v573_v2 = vld [vmem:[#allocation2 + $0x8] sm:$0xff] }
  0xf5   :  { %v582_v3 = vadd.f32 %v591_v1, %v573_v2 }
  0xf6   :  { %v572_v4 = vld [vmem:[#allocation2] sm:$0xff] }
  0xf7   :  { %v584_v5 = vmax.f32 %v582_v3, 0.0  ;;  %v581_v6 = vadd.f32 %v591_v1, %v572_v4 }
  0xf9   :  { %586 = vst.msk [vmem:[%s800_s3 + $0x8] sm:$0xff] %vm18_vm1, %v584_v5  ;;  %v583_v7 = vmax.f32 %v581_v6, 0.0 }
  0xfb   :  { %585 = vst.msk [vmem:[%s800_s3] sm:$0xff] %vm18_vm1, %v583_v7 }

// kernel: decoder_layer.27
= control target key start
LH: loop header
LB: loop body
LE: loop exit
PB: predicated region body
PF: predicated region fallthrough
CT: control target
= control target key end

     0   :  { %vm36_vm0 = vcmask 523264   ;;  %vm21_vm1 = vcmask 261120   ;;  %v828_v62 = vmov 0.0   ;;  %s1085_s1 = inlined_call_operand.vmem [shape: f32[64,32], index: 1, kind: input, shape index: {}]   ;;  %s1086_s0 = inlined_call_operand.vmem [shape: f32[16,64], index: 0, kind: input, shape index: {}]   ;;  %s1087_s2 = inlined_call_operand.vmem [shape: f32[1,32], index: 2, kind: input, shape index: {}]   ;;  %s1088_s3 = inlined_call_operand.vmem [shape: f32[16,32], index: 3, kind: input, shape index: {}]   ;;  %s1089_s4 = inlined_call_operand.vmem [shape: f32[16,32], index: 4, kind: output, shape index: {}]  }
   0x1   :  { %v35_v0 = vld [vmem:[%s1085_s1 + $0x38] sm:$0xff]  ;;  %v34_v1 = vld [vmem:[%s1085_s1 + $0x30] sm:$0xff]  ;;  %v33_v2 = vld [vmem:[%s1085_s1 + $0x28] sm:$0xff]  ;;  %23 = vst.msk [vmem:[#allocation2 + $0x8] sm:$0xff] %vm21_vm1, %v828_v62 }
   0x2   :  { %v863_v3 = vand.u32 4294901760, %v35_v0  ;;  %v865_v4 = vand.u32 4294901760, %v34_v1  ;;  %v867_v5 = vand.u32 4294901760, %v33_v2  ;;  %v32_v6 = vld [vmem:[%s1085_s1 + $0x20] sm:$0xff]  ;;  %v31_v7 = vld [vmem:[%s1085_s1 + $0x18] sm:$0xff]  ;;  %v30_v8 = vld [vmem:[%s1085_s1 + $0x10] sm:$0xff] }
   0x3   :  { %v878_v9 = vand.u32 4294901760, %v32_v6  ;;  %v880_v10 = vand.u32 4294901760, %v31_v7  ;;  %v882_v11 = vand.u32 4294901760, %v30_v8  ;;  %v29_v12 = vld [vmem:[%s1085_s1 + $0x8] sm:$0xff]  ;;  %v28_v13 = vld [vmem:[%s1085_s1] sm:$0xff]  ;;  %22 = vst.msk [vmem:[#allocation2] sm:$0xff] %vm21_vm1, %v828_v62 }
   0x4   :  { %v26_v14 = vld [vmem:[%s1086_s0] sm:$0xff]  ;;  %713 = vmatprep.subr.mxu0 %v863_v3  ;;  %v895_v15 = vsub.f32 %v35_v0, %v863_v3  ;;  %v898_v16 = vsub.f32 %v34_v1, %v865_v4  ;;  %v900_v17 = vand.u32 4294901760, %v29_v12  ;;  %v903_v18 = vsub.f32 %v33_v2, %v867_v5  ;;  %v27_v19 = vld [vmem:[%s1086_s0 + $0x8] sm:$0xff] }
   0x5   :  { %714 = vmatpush3.msra.mxu0 %v863_v3  ;;  %v909_v20 = vand.u32 4294901760, %v28_v13  ;;  %v912_v21 = vsub.f32 %v32_v6, %v878_v9  ;;  %v38_v22 = vsel %vm36_vm0, %v26_v14, 0  ;;  %v41_v23 = vsel %vm36_vm0, %v27_v19, 0 }
   0x6   :  { %715 = vmatprep.subr.mxu0 %v865_v4  ;;  %v918_v24 = vand.u32 4294901760, %v895_v15  ;;  %v921_v25 = vand.u32 4294901760, %v898_v16  ;;  %v924_v26 = vand.u32 4294901760, %v903_v18  ;;  %v926_v27 = vand.u32 4294901760, %v38_v22 }
   0x7   :  { %716 = vmatpush3.msra.mxu0 %v865_v4  ;;  %v930_v28 = vand.u32 4294901760, %v912_v21  ;;  %v932_v29 = vand.u32 4294901760, %v41_v23  ;;  %v935_v30 = vsub.f32 %v31_v7, %v880_v10  ;;  %v938_v31 = vsub.f32 %v30_v8, %v882_v11 }
   0x8   :  { %717 = vmatprep.subr.mxu0 %v867_v5  ;;  %v156_v32 = vsub.f32 %v895_v15, %v918_v24  ;;  %v163_v33 = vsub.f32 %v898_v16, %v921_v25  ;;  %v170_v34 = vsub.f32 %v903_v18, %v924_v26  ;;  %v948_v35 = vsub.f32 %v38_v22, %v926_v27 }
   0x9   :  { %718 = vmatpush3.msra.mxu0 %v867_v5  ;;  %v952_v36 = vand.u32 4294901760, %v935_v30  ;;  %v955_v37 = vsub.f32 %v41_v23, %v932_v29  ;;  %748 = vmatprep.mubr.f32.mxu1 %v926_v27  ;;  %v177_v40 = vsub.f32 %v912_v21, %v930_v28  ;;  %v967_v44 = vand.u32 4294901760, %v938_v31 }
   0xa   :  { %719 = vmatprep.subr.mxu0 %v878_v9  ;;  %v157_v38 = vand.u32 4294901760, %v156_v32  ;;  %v164_v39 = vand.u32 4294901760, %v163_v33  ;;  %v118_v41 = vand.u32 4294901760, %v948_v35  ;;  %v171_v45 = vand.u32 4294901760, %v170_v34 }
   0xb   :  { %720 = vmatpush3.msra.mxu0 %v878_v9  ;;  %v184_v42 = vsub.f32 %v935_v30, %v952_v36  ;;  %v128_v43 = vand.u32 4294901760, %v955_v37  ;;  %v196_v47 = vsub.f32 %v29_v12, %v900_v17  ;;  %v203_v48 = vsub.f32 %v28_v13, %v909_v20 }
   0xc   :  { %721 = vmatprep.subr.mxu0 %v880_v10  ;;  %732 = vmatprep.subr.mxu1 %v157_v38  ;;  %v119_v46 = vsub.f32 %v948_v35, %v118_v41  ;;  %v178_v50 = vand.u32 4294901760, %v177_v40  ;;  %v191_v52 = vsub.f32 %v938_v31, %v967_v44 }
   0xd   :  { %722 = vmatpush3.msra.mxu0 %v880_v10  ;;  %733 = vmatpush3.msra.mxu1 %v157_v38  ;;  %v129_v49 = vsub.f32 %v955_v37, %v128_v43  ;;  %v980_v51 = vand.u32 4294901760, %v196_v47  ;;  %v985_v53 = vand.u32 4294901760, %v203_v48  ;;  %v185_v55 = vand.u32 4294901760, %v184_v42 }
   0xe   :  { %723 = vmatprep.subr.mxu0 %v882_v11  ;;  %734 = vmatprep.subr.mxu1 %v164_v39  ;;  %v120_v54 = vand.u32 4294901760, %v119_v46  ;;  %v192_v58 = vand.u32 4294901760, %v191_v52 }
   0xf   :  { %724 = vmatpush3.msra.mxu0 %v882_v11  ;;  %735 = vmatpush3.msra.mxu1 %v164_v39  ;;  %v130_v56 = vand.u32 4294901760, %v129_v49  ;;  %v198_v57 = vsub.f32 %v196_v47, %v980_v51  ;;  %v205_v59 = vsub.f32 %v203_v48, %v985_v53 }
  0x10   :  { %725 = vmatprep.subr.mxu0 %v900_v17  ;;  %736 = vmatprep.subr.mxu1 %v171_v45 }
  0x11   :  { %726 = vmatpush3.msra.mxu0 %v900_v17  ;;  %737 = vmatpush3.msra.mxu1 %v171_v45  ;;  %v199_v60 = vand.u32 4294901760, %v198_v57  ;;  %v206_v61 = vand.u32 4294901760, %v205_v59 }
  0x12   :  { %727 = vmatprep.subr.mxu0 %v909_v20  ;;  %738 = vmatprep.subr.mxu1 %v178_v50 }
  0x13   :  { %728 = vmatpush3.msra.mxu0 %v909_v20  ;;  %739 = vmatpush3.msra.mxu1 %v178_v50 }
  0x14   :  { %729 = vmatprep.mubr.f32.mxu0 %v120_v54  ;;  %740 = vmatprep.subr.mxu1 %v185_v55 }
  0x15   :  { %751 = vmatprep.subr.mxu0 %v895_v15  ;;  %730 = vmatmul.mubr.f32.vlgmr.msra.gmra.mxu0 %v130_v56 }
  0x16   :  { %741 = vmatpush3.msra.mxu1 %v185_v55  ;;  %752 = vmatpush3.msra.mxu0 %v895_v15 }
  0x17   :  { %742 = vmatprep.subr.mxu1 %v192_v58  ;;  %753 = vmatprep.subr.mxu0 %v898_v16 }
  0x18   :  { %743 = vmatpush3.msra.mxu1 %v192_v58  ;;  %754 = vmatpush3.msra.mxu0 %v898_v16  ;;  %v25_v16 = vld [vmem:[#allocation2 + $0x8] sm:$0xff] }
  0x19   :  { %744 = vmatprep.subr.mxu1 %v199_v60  ;;  %755 = vmatprep.subr.mxu0 %v903_v18 }
  0x1a   :  { %745 = vmatpush3.msra.mxu1 %v199_v60  ;;  %756 = vmatpush3.msra.mxu0 %v903_v18 }
  0x1b   :  { %746 = vmatprep.subr.mxu1 %v206_v61  ;;  %757 = vmatprep.subr.mxu0 %v912_v21 }
  0x1c   :  { %747 = vmatpush3.msra.mxu1 %v206_v61  ;;  %758 = vmatpush3.msra.mxu0 %v912_v21 }
  0x1d   :  { %749 = vmatmul.mubr.f32.vlgmr.msra.gmra.mxu1 %v932_v29  ;;  %759 = vmatprep.subr.mxu0 %v935_v30 }
  0x1e   :  { %770 = vmatprep.subr.mxu1 %v863_v3  ;;  %760 = vmatpush3.msra.mxu0 %v935_v30 }
  0x1f   :  { %771 = vmatpush3.msra.mxu1 %v863_v3  ;;  %761 = vmatprep.subr.mxu0 %v938_v31 }
  0x20   :  { %772 = vmatprep.subr.mxu1 %v865_v4  ;;  %762 = vmatpush3.msra.mxu0 %v938_v31 }
  0x21   :  { %773 = vmatpush3.msra.mxu1 %v865_v4  ;;  %763 = vmatprep.subr.mxu0 %v196_v47 }
  0x22   :  { %774 = vmatprep.subr.mxu1 %v867_v5  ;;  %764 = vmatpush3.msra.mxu0 %v196_v47 }
  0x23   :  { %775 = vmatpush3.msra.mxu1 %v867_v5  ;;  %765 = vmatprep.subr.mxu0 %v203_v48 }
  0x24   :  { %776 = vmatprep.subr.mxu1 %v878_v9  ;;  %766 = vmatpush3.msra.mxu0 %v203_v48 }
  0x25   :  { %767 = vmatprep.mubr.f32.mxu0 %v948_v35  ;;  %777 = vmatpush3.msra.mxu1 %v878_v9 }
  0x26   :  { %768 = vmatmul.mubr.f32.vlgmr.msra.gmra.mxu0 %v955_v37  ;;  %778 = vmatprep.subr.mxu1 %v880_v10 }
  0x27   :  { %789 = vmatprep.subr.mxu0 %v918_v24  ;;  %779 = vmatpush3.msra.mxu1 %v880_v10 }
  0x28   :  { %790 = vmatpush3.msra.mxu0 %v918_v24  ;;  %780 = vmatprep.subr.mxu1 %v882_v11 }
  0x29   :  { %791 = vmatprep.subr.mxu0 %v921_v25  ;;  %781 = vmatpush3.msra.mxu1 %v882_v11 }
  0x2a   :  { %792 = vmatpush3.msra.mxu0 %v921_v25  ;;  %782 = vmatprep.subr.mxu1 %v900_v17  ;;  %v652_v25 = vld [vmem:[%s1087_s2] ss:$0 sm:$0xff] }
  0x2b   :  { %793 = vmatprep.subr.mxu0 %v924_v26  ;;  %783 = vmatpush3.msra.mxu1 %v900_v17 }
  0x2c   :  { %794 = vmatpush3.msra.mxu0 %v924_v26  ;;  %784 = vmatprep.subr.mxu1 %v909_v20 }
  0x2d   :  { %795 = vmatprep.subr.mxu0 %v930_v28  ;;  %785 = vmatpush3.msra.mxu1 %v909_v20 }
  0x2e   :  { %786 = vmatprep.mubr.f32.mxu1 %v118_v41  ;;  %796 = vmatpush3.msra.mxu0 %v930_v28 }
  0x2f   :  { %787 = vmatmul.mubr.f32.vlgmr.msra.gmra.mxu1 %v128_v43  ;;  %797 = vmatprep.subr.mxu0 %v952_v36 }
  0x30   :  { %808 = vmatprep.subr.mxu1 %v863_v3  ;;  %798 = vmatpush3.msra.mxu0 %v952_v36 }
  0x31   :  { %809 = vmatpush3.msra.mxu1 %v863_v3  ;;  %799 = vmatprep.subr.mxu0 %v967_v44 }
  0x32   :  { %810 = vmatprep.subr.mxu1 %v865_v4  ;;  %800 = vmatpush3.msra.mxu0 %v967_v44 }
  0x33   :  { %811 = vmatpush3.msra.mxu1 %v865_v4  ;;  %801 = vmatprep.subr.mxu0 %v980_v51 }
  0x34   :  { %812 = vmatprep.subr.mxu1 %v867_v5  ;;  %802 = vmatpush3.msra.mxu0 %v980_v51 }
  0x35   :  { %813 = vmatpush3.msra.mxu1 %v867_v5  ;;  %803 = vmatprep.subr.mxu0 %v985_v53 }
  0x36   :  { %814 = vmatprep.subr.mxu1 %v878_v9  ;;  %804 = vmatpush3.msra.mxu0 %v985_v53 }
  0x37   :  { %805 = vmatprep.mubr.f32.mxu0 %v926_v27  ;;  %815 = vmatpush3.msra.mxu1 %v878_v9 }
  0x38   :  { %806 = vmatmul.mubr.f32.vlgmr.msra.gmra.mxu0 %v932_v29  ;;  %816 = vmatprep.subr.mxu1 %v880_v10 }
  0x39   :  { %817 = vmatpush3.msra.mxu1 %v880_v10  ;;  %824 = vmatprep.mubr.f32.mxu1 %v926_v27  ;;  %v643_v27 = vld [vmem:[%s1088_s3 + $0x8] sm:$0xff] }
  0x3a   :  { %818 = vmatprep.subr.mxu1 %v882_v11 }
  0x3b   :  { %819 = vmatpush3.msra.mxu1 %v882_v11 }
  0x3c   :  { %820 = vmatprep.subr.mxu1 %v900_v17 }
  0x3d   :  { %821 = vmatpush3.msra.mxu1 %v900_v17 }
  0x3e   :  { %822 = vmatprep.subr.mxu1 %v909_v20 }
  0x3f   :  { %823 = vmatpush3.msra.mxu1 %v909_v20  ;;  %v24_v20 = vld [vmem:[#allocation2] sm:$0xff] }
  0x40   :  { %825 = vmatmul.mubr.f32.vlgmr.msra.gmra.mxu1 %v932_v29  ;;  %v642_v29 = vld [vmem:[%s1088_s3] sm:$0xff] }
  0xd5   :  { %v731_v63 = vpop.f32.mrf.mxu0 }
  0xd7   :  { %v122_v0 = vpop.f32.mrf.mxu0 }
  0xdd   :  { %v750_v1 = vpop.f32.mrf.mxu1 }
  0xde   :  { %v250_v6 = vadd.f32 %v750_v1, %v731_v63 }
  0xdf   :  { %v243_v3 = vpop.f32.mrf.mxu1 }
  0xe0   :  { %v244_v8 = vadd.f32 %v243_v3, %v122_v0 }
  0xe6   :  { %v769_v2 = vpop.f32.mrf.mxu0 }
  0xe7   :  { %v345_v9 = vadd.f32 %v769_v2, %v250_v6 }
  0xe8   :  { %v337_v4 = vpop.f32.mrf.mxu0 }
  0xe9   :  { %v338_v11 = vadd.f32 %v337_v4, %v244_v8 }
  0xef   :  { %v788_v5 = vpop.f32.mrf.mxu1 }
  0xf0   :  { %v434_v12 = vadd.f32 %v788_v5, %v345_v9 }
  0xf1   :  { %v425_v10 = vpop.f32.mrf.mxu1 }
  0xf2   :  { %v426_v14 = vadd.f32 %v425_v10, %v338_v11 }
  0xf8   :  { %v807_v7 = vpop.f32.mrf.mxu0 }
  0xf9   :  { %v535_v15 = vadd.f32 %v807_v7, %v434_v12 }
  0xfa   :  { %v528_v13 = vpop.f32.mrf.mxu0 }
  0xfb   :  { %v529_v18 = vadd.f32 %v528_v13, %v426_v14 }
 0x100   :  { %v826_v17 = vpop.f32.mrf.mxu1 }
 0x101   :  { %v620_v19 = vadd.f32 %v826_v17, %v535_v15 }
 0x102   :  { %v613_v21 = vpop.f32.mrf.mxu1 }
 0x103   :  { %v624_v22 = vadd.f32 %v620_v19, %v25_v16  ;;  %v614_v23 = vadd.f32 %v613_v21, %v529_v18 }
 0x105   :  { %627 = vst.msk [vmem:[#allocation2 + $0x8] sm:$0xff] %vm21_vm1, %v624_v22  ;;  %v623_v24 = vadd.f32 %v614_v23, %v24_v20 }
 0x107   :  { %626 = vst.msk [vmem:[#allocation2] sm:$0xff] %vm21_vm1, %v623_v24 }
 0x10c   :  { %v632_v26 = vld [vmem:[#allocation2 + $0x8] sm:$0xff] }
 0x10d   :  { %v641_v28 = vadd.f32 %v652_v25, %v632_v26 }
 0x10e   :  { %v631_v30 = vld [vmem:[#allocation2] sm:$0xff] }
 0x10f   :  { %v645_v31 = vadd.f32 %v643_v27, %v641_v28  ;;  %v640_v32 = vadd.f32 %v652_v25, %v631_v30 }
 0x111   :  { %647 = vst.msk [vmem:[%s1089_s4 + $0x8] sm:$0xff] %vm21_vm1, %v645_v31  ;;  %v644_v33 = vadd.f32 %v642_v29, %v640_v32 }
 0x113   :  { %646 = vst.msk [vmem:[%s1089_s4] sm:$0xff] %vm21_vm1, %v644_v33 }

// kernel: decoder_layer.29
= control target key start
LH: loop header
LB: loop body
LE: loop exit
PB: predicated region body
PF: predicated region fallthrough
CT: control target
= control target key end

     0   :  { %8 = vsyncpa [#allocation3], 0  ;;  %s620_s0 = inlined_call_operand.vmem [shape: f32[2,8,32], index: 0, kind: input, shape index: {}]   ;;  %s621_s1 = inlined_call_operand.vmem [shape: f32[2,1,128], index: 1, kind: input, shape index: {}]   ;;  %s622_s2 = inlined_call_operand.vmem [shape: f32[2,1,128], index: 2, kind: input, shape index: {}]   ;;  %s623_s3 = inlined_call_operand.hbm [shape: f32[2,8,32], index: 3, kind: output, shape index: {}]  }
   0x1   :  { %10 = vsyncpa [#allocation3 + $0x1], 0  ;;  %s515_s12 = smov 0   ;;  %s517_s13 = smov 0  }
   0x2   :  { %s519_s14 = smov 0   ;;  %s521_s15 = smov 0  }
   0x3   :  { %s523_s16 = smov 0   ;;  %s525_s17 = smov 0  }
   0x4 LB: > { %s342_s18 = sadd.s32 4294967295, %s492_s17   ;;  %s343_s19 = sadd.s32 4294967294, %s492_s17   ;;  %s492_s17 = sphi %s525_s17, %s16_s17   ;;  %s488_s16 = sphi %s523_s16, %s630_s16   ;;  %s484_s15 = sphi %s521_s15, %s629_s15   ;;  %s480_s14 = sphi %s519_s14, %s628_s14   ;;  %s476_s13 = sphi %s517_s13, %s627_s13   ;;  %s472_s12 = sphi %s515_s12, %s626_s12  }
   0x5   : > { %s28_s20 = sadd.s32 1, %s488_s16  ;;  %s117_s21 = sadd.s32 1, %s480_s14 }
   0x6   : > { %p30_p0 = scmp.ge.s32.totalorder %s28_s20, 2  ;;  %p127_p1 = scmp.ne.s32.totalorder %s480_s14, %s476_s13 }
   0x7   : > { %p128_p2 = scmp.eq.s32.totalorder %s342_s18, 1  ;;  %p133_p3 = scmp.ne.s32.totalorder %s476_s13, %s472_s12 }
   0x8   : > { %s632_s20 = smov (%p30_p0, %s28_s20), 0  ;;  %p134_p5 = scmp.eq.s32.totalorder %s343_s19, 1 }
   0x9   : > { %p555_p4 = por %p128_p2, %p127_p1  ;;  %s112_s23 = ssub.s32 %s488_s16, %s632_s20 }
   0xa   : > { %p346_p6 = scmp.ge.s32.totalorder %s492_s17, 1  ;;  %p115_p7 = scmp.eq.s32.totalorder %s112_s23, 0 }
   0xb   : > { %p562_p8 = por %p134_p5, %p133_p3  ;;  %p174_p9 = scmp.lt.s32.totalorder %s492_s17, 3 }
   0xc   : > { %s568_s25 = scalar_select %p115_p7, %s480_s14, %s117_s21  }
   0xd   : > { %p175_p10 = pnand %p346_p6, %p174_p9 }
   0xe   : > { %p206_p11 = scmp.lt.s32.totalorder (!%p175_p10), %s484_s15, 1 }
   0xf   : > { %178 = sbr.rel (%p175_p10) target bundleno = 163 (0xa3), region = 32 }
  0x14   : > { %s207_s26 = scalar_select %p206_p11, %s484_s15, 1  ;;  %vm236_vm0 = vcmask 261120  }
  0x16   : > { %s215_s29 = scalar_lea.vmem %s621_s1, %s207_s26  ;;  %s218_s5 = scalar_lea.vmem %s622_s2, %s207_s26 }
  0x17   : > { %v219_v0 = vld [vmem:[%s215_s29] sm:$0x1]  ;;  %s348_s6 = sshll.u32 %s207_s26, 3  ;;  %s203_s26 = sand.u32 1, %s476_s13  }
  0x18   : > { %v222_v1 = vld [vmem:[%s218_s5] sm:$0x1]  ;;  %353 = vpush %v219_v0  ;;  %s212_s9 = scalar_lea.vmem %s620_s0, %s348_s6  ;;  %s347_s28 = sshll.u32 %s203_s26, 3 }
  0x19   : > { %355 = vpush %v222_v1  ;;  %v231_v2 = vld [vmem:[%s212_s9] sm:$0xff]  ;;  %s350_s29 = sshll.u32 %s484_s15, 7  ;;  %s205_s30 = scalar_lea.vmem [#allocation2], %s347_s28 }
  0x1a   : > { %s253_s4 = sshll.u32 %s205_s30, 4  ;;  %s251_s8 = scalar_lea.hbm %s623_s3, %s350_s29  ;;  %s254_s4 = int_to_ptr.vmem [resolvable:$true] %s253_s4 }
  0x1b   : > { %s239_s9 = scalar_lea.sflag [#allocation3], %s203_s26 }
  0x49   : > { %s354_s10 = spop %353 }
  0x4a   : > { %s221_s11 = smul.f32 0.00390625, %s354_s10  ;;  %s356_s18 = spop %355 }
  0x4b   : > { %s224_s19 = smul.f32 0.00390625, %s356_s18  ;;  %s416_s10 = scalar_lea.vmem %s254_s4, 128 }
  0x4c   : > { %s225_s21 = smul.f32 %s221_s11, %s221_s11  ;;  %v232_v3 = vstv %s221_s11  ;;  %p417_p12 = scmp.ne.s32.totalorder %s254_s4, %s416_s10 }
  0x4d   : > { %v233_v4 = vsub.f32 %v231_v2, %v232_v3  ;;  %s494_s11 = smov [#allocation2]  }
  0x4e   : > { %s226_s23 = ssub.f32 %s224_s19, %s225_s21  ;;  %p418_p13 = pnand %p417_p12, %p555_p4 }
  0x4f   : > { %s420_s15 = sshll.u32 %s494_s11, 4  ;;  %s421_s15 = int_to_ptr.vmem [resolvable:$false] %s420_s15 }
  0x50   : > { %s227_s27 = sadd.f32 1e-05, %s226_s23  ;;  %p419_p0 = pneg %p418_p13 }
  0x51   : > { %s422_s18 = scalar_lea.vmem %s421_s15, 256  ;;  %p423_p1 = scmp.lt.s32.totalorder %s254_s4, %s421_s15 }
  0x52   : > { %v228_v5 = vstv %s227_s27  ;;  %p424_p2 = scmp.lt.s32.totalorder %s422_s18, %s416_s10 }
  0x53   : > { %414 = vrsqrt.f32 %v228_v5 }
  0x54   : > { %p425_p3 = por %p424_p2, %p423_p1 }
  0x56   : > { %p426_p5 = pnand %p425_p3, %p419_p0 }
  0x60   : > { %v415_v6 = vpop.eup %414 }
  0x61   : > { %357 = vpush %v415_v6 }
  0x92   : > { %s358_s5 = spop %357 }
  0x93   : > { %v234_v7 = vstv %s358_s5 }
  0x94   : > { %v235_v8 = vmul.f32 %v234_v7, %v233_v4 }
  0x96   : > { %237 = vst.msk [vmem:[%s205_s30] sm:$0xff] %vm236_vm0, %v235_v8 }
  0x97   : > { %429 = shalt.err (!%p426_p5)
}
  0x98   : > { %s430_s19 = scalar_lea.hbm %s251_s8, 128  ;;  %s434_s27 = scalar_lea.hbm %s623_s3, 256 }
  0x99   : > { %p431_p6 = scmp.ne.s32.totalorder %s251_s8, %s430_s19  ;;  %p435_p10 = scmp.lt.s32.totalorder %s251_s8, %s623_s3 }
  0x9a   : > { %p436_p11 = scmp.lt.s32.totalorder %s434_s27, %s430_s19 }
  0x9b   : > { %p432_p7 = pnand %p431_p6, %p555_p4 }
  0x9c   : > { %p437_p12 = por %p436_p11, %p435_p10 }
  0x9d   : > { %p433_p9 = pneg %p432_p7 }
  0x9f   : > { %p438_p13 = pnand %p437_p12, %p433_p9 }
  0xa1   : > { %441 = shalt.err (!%p438_p13)
}
  0xa2   : > { %359 = dma.vmem_to_hbm [thread:$0]  (%p555_p4), %s254_s4, 128, %s251_s8, %s239_s9  }
  0xa3 PF: > { %p365_p0 = scmp.ge.s32.totalorder %s492_s17, 2  ;;  %s265_s29 = sand.u32 1, %s472_s12  }
  0xa4   : > { %s266_s30 = scalar_lea.sflag [#allocation3], %s265_s29 }
  0xa5   : > { %p362_p1 = pnand %p365_p0, %p562_p8 }
  0xa7   : > { %p363_p2 = pneg %p362_p1 }
  0xa9   : > { %467 = dma.done.wait (%p363_p2), %s266_s30, 128  }
  0xaa   : > { %469 = vsyncadd (%p363_p2), %s266_s30, 4294967168  ;;  %s16_s17 = sadd.s32 1, %s492_s17   ;;  %s626_s12 = smov %s476_s13 }
  0xab   : > { %p13_p3 = scmp.ge.s32.totalorder %s16_s17, 4   ;;  %s627_s13 = smov %s480_s14 }
  0xac   : > { %s628_s14 = smov %s568_s25  ;;  %s629_s15 = smov %s488_s16 }
  0xad   : > { %s630_s16 = smov %s632_s20  ;;  %15 = sbr.rel (!%p13_p3) target bundleno = 4 (0x4), region = 73 }
  0xb2   :  { %271 = vsyncpa [#allocation3], 1 }
  0xb3   :  { %273 = vsyncpa [#allocation3 + $0x1], 1 }

// kernel: decoder_layer.22
= control target key start
LH: loop header
LB: loop body
LE: loop exit
PB: predicated region body
PF: predicated region fallthrough
CT: control target
= control target key end

     0   :  { %s1920_s15 = smov 0   ;;  %s1922_s16 = smov 0   ;;  %s2053_s0 = inlined_call_operand.vmem [shape: f32[2,4,8,8], index: 0, kind: input, shape index: {}]   ;;  %s2054_s1 = inlined_call_operand.vmem [shape: f32[2,4,16,8], index: 1, kind: input, shape index: {}]   ;;  %s2055_s2 = inlined_call_operand.vmem [shape: f32[2,4,16,8], index: 2, kind: input, shape index: {}]   ;;  %s2056_s3 = inlined_call_operand.vmem [shape: s8[2,16,8], index: 3, kind: input, shape index: {}]   ;;  %s2057_s4 = inlined_call_operand.vmem [shape: f32[2,4,8,8], index: 4, kind: output, shape index: {}]  }
   0x1   :  { %s1924_s17 = smov 0   ;;  %s1926_s18 = smov 0  }
   0x2   :  { %s1928_s19 = smov 0  }
   0x3 LB: > { %s36_s20 = sadd.s32 1, %s1881_s17  ;;  %s40_s21 = sadd.s32 1, %s1885_s18  ;;  %s1889_s19 = sphi %s1928_s19, %s14_s19   ;;  %s1885_s18 = sphi %s1926_s18, %s2061_s18   ;;  %s1881_s17 = sphi %s1924_s17, %s2060_s17   ;;  %s1877_s16 = sphi %s1922_s16, %s2059_s16   ;;  %s1873_s15 = sphi %s1920_s15, %s2058_s15  }
   0x4   : > { %p38_p0 = scmp.ge.s32.totalorder %s36_s20, 4  ;;  %p1675_p1 = scmp.ge.s32.totalorder %s1889_s19, 1 }
   0x5   : > { %p270_p2 = scmp.lt.s32.totalorder %s1889_s19, 9 }
   0x6   : > { %s2063_s20 = smov (%p38_p0, %s36_s20), 0  ;;  %s2065_s21 = smov (!%p38_p0, %s40_s21), %s1885_s18 }
   0x7   : > { %p271_p3 = pnand %p1675_p1, %p270_p2  ;;  %p42_p4 = scmp.ge.s32.totalorder %s2065_s21, 2 }
   0x8   : > { %p346_p5 = scmp.lt.s32.totalorder (!%p271_p3), %s1877_s16, 1  ;;  %p348_p6 = scmp.lt.s32.totalorder (!%p271_p3), %s1873_s15, 3 }
   0x9   : > { %s2067_s21 = smov (%p42_p4, %s2065_s21), 0  ;;  %274 = sbr.rel (%p271_p3) target bundleno = 511 (0x1ff), region = 36 }
   0xe   : > { %s2069_s16 = smov (!%p346_p5, %s1877_s16), 1  ;;  %s2071_s15 = smov (!%p348_p6, %s1873_s15), 3  ;;  %vm418_vm0 = vcmask 64512   ;;  %vm415_vm1 = vcmask 57344   ;;  %v1891_v24 = vmov -inf   ;;  %v1892_v25 = vmov 0.0  }
   0xf   : > { %s1676_s22 = sshll.u32 %s2069_s16, 2  ;;  %s1679_s23 = sshll.u32 %s2069_s16, 3  ;;  %416 = vst.msk [vmem:[#allocation2] sm:$0x1] %vm415_vm1, %v1891_v24  ;;  %417 = vst.msk [vmem:[#allocation3] sm:$0x1] %vm415_vm1, %v1892_v25  ;;  %v950_v62 = vlaneseq }
  0x10   : > { %s1956_s24 = sadd.s32 %s1676_s22, %s2071_s15  ;;  %s1678_s25 = sshll.u32 %s2071_s15, 1  ;;  %419 = vst.msk [vmem:[#allocation4] sm:$0xff] %vm418_vm0, %v1892_v25  ;;  %vm1893_vm2 = vmmov 0   ;;  %v1894_v33 = vmov 0   ;;  %vm1009_vm7 = vcmask 130048  }
  0x11   : > { %s1677_s26 = sshll.u32 %s1956_s24, 3  ;;  %s367_s27 = sadd.s32 %s1679_s23, %s1678_s25 }
  0x12   : > { %s356_s30 = scalar_lea.vmem %s2053_s0, %s1677_s26  ;;  %s1680_s5 = sshll.u32 %s367_s27, 3 }
  0x13   : > { %v420_v0 = vld [vmem:[%s356_s30] sm:$0xff]  ;;  %s369_s8 = scalar_lea.vmem %s2054_s1, %s1680_s5  ;;  %s383_s11 = scalar_lea.vmem %s2055_s2, %s1680_s5 }
  0x14   : > { %v421_v1 = vmul.f32 0.35355338, %v420_v0  ;;  %v422_v2 = vld [vmem:[%s369_s8] sm:$0xff]  ;;  %v423_v3 = vld [vmem:[%s369_s8 + $0x8] sm:$0xff]  ;;  %s396_s14 = scalar_lea.vmem %s2056_s3, %s1676_s22  ;;  %s408_s22 = scalar_lea.vmem %s2057_s4, %s1677_s26 }
  0x15   : > { %v975_v4 = vld [vmem:[%s383_s11] sm:$0xff]  ;;  %v426_v6 = vsel %vm418_vm0, %v422_v2, 0  ;;  %v429_v7 = vsel %vm418_vm0, %v423_v3, 0  ;;  %v976_v11 = vld [vmem:[%s383_s11 + $0x8] sm:$0xff] }
  0x16   : > { %v432_v5 = vsel %vm418_vm0, %v421_v1, 0  ;;  %977 = vxpose.xlu0.b32.start [1/2] (short) (narrow) %v975_v4, 8  ;;  %v500_v9 = vand.u32 4294901760, %v426_v6  ;;  %v510_v10 = vand.u32 4294901760, %v429_v7  ;;  %v924_v26 = vld [vmem:[%s396_s14 + $0x2] sm:$0x3] }
  0x17   : > { %v465_v8 = vand.u32 4294901760, %v432_v5  ;;  %v923_v28 = vld [vmem:[%s396_s14] sm:$0x3]  ;;  %vm926_vm3 = vnez %v924_v26  ;;  %v951_v1 = vshrl.u32 %v950_v62, 7 }
  0x18   : > { %v501_v12 = vsub.f32 %v426_v6, %v500_v9  ;;  %v511_v13 = vsub.f32 %v429_v7, %v510_v10  ;;  %1734 = vmatprep.mubr.f32.mxu1 %v500_v9  ;;  %vm925_vm4 = vnez %v923_v28  ;;  %v928_v34 = vsel %vm926_vm3, 16843009, %v1894_v33  ;;  %v935_v3 = vld [vmem:[#allocation2] sm:$0x1] }
  0x19   : > { %1727 = vmatprep.subr.mxu0 %v465_v8  ;;  %v552_v14 = vsub.f32 %v432_v5, %v465_v8  ;;  %v927_v39 = vsel %vm925_vm4, 16843009, %v1894_v33  ;;  %v930_v41 = vunpack.c.0.s8 %v928_v34  ;;  %v1991_v5 = vsub.s32 0, %v951_v1 }
  0x1a   : > { %1728 = vmatpush3.xpose.msra.mxu0 %v465_v8  ;;  %978 = vxpose.xlu0.b32.end [2/2] (short) (narrow) %v976_v11, 8  ;;  %v502_v15 = vand.u32 4294901760, %v501_v12  ;;  %v512_v16 = vand.u32 4294901760, %v511_v13  ;;  %v929_v46 = vunpack.c.0.s8 %v927_v39 }
  0x1b   : > { %v553_v17 = vand.u32 4294901760, %v552_v14  ;;  %1737 = vmatprep.subr.mxu0 %v552_v14  ;;  %vm932_vm5 = vcmp.ne.s32.totalorder %v930_v41, 0 }
  0x1c   : > { %v503_v18 = vsub.f32 %v501_v12, %v502_v15  ;;  %v513_v19 = vsub.f32 %v511_v13, %v512_v16  ;;  %vm931_vm6 = vcmp.ne.s32.totalorder %v929_v46, 0 }
  0x1d   : > { %v554_v20 = vsub.f32 %v552_v14, %v553_v17 }
  0x1e   : > { %v504_v21 = vand.u32 4294901760, %v503_v18  ;;  %v514_v22 = vand.u32 4294901760, %v513_v19 }
  0x1f   : > { %v555_v23 = vand.u32 4294901760, %v554_v20 }
  0x20   : > { %1729 = vmatprep.mubr.f32.mxu0 %v504_v21 }
  0x21   : > { %1732 = vmatprep.subr.mxu1 %v555_v23  ;;  %1730 = vmatmul.mubr.f32.vlgmr.msra.gmra.mxu0 %v514_v22 }
  0x22   : > { %1733 = vmatpush3.xpose.msra.mxu1 %v555_v23  ;;  %1738 = vmatpush3.xpose.msra.mxu0 %v552_v14 }
  0x23   : > { %1739 = vmatprep.mubr.f32.mxu0 %v501_v12  ;;  %1742 = vmatprep.subr.mxu1 %v465_v8 }
  0x24   : > { %1747 = vmatprep.subr.mxu0 %v553_v17 }
  0x25   : > { %1735 = vmatmul.mubr.f32.vlgmr.msra.gmra.mxu1 %v510_v10  ;;  %1740 = vmatmul.mubr.f32.vlgmr.msra.gmra.mxu0 %v511_v13 }
  0x26   : > { %1743 = vmatpush3.xpose.msra.mxu1 %v465_v8  ;;  %1748 = vmatpush3.xpose.msra.mxu0 %v553_v17 }
  0x27   : > { %1744 = vmatprep.mubr.f32.mxu1 %v502_v15  ;;  %1749 = vmatprep.mubr.f32.mxu0 %v500_v9 }
  0x28   : > { %1752 = vmatprep.subr.mxu1 %v465_v8  ;;  %1757 = vmatprep.subr.mxu0 %v1892_v25 }
  0x29   : > { %1745 = vmatmul.mubr.f32.vlgmr.msra.gmra.mxu1 %v512_v16  ;;  %1750 = vmatmul.mubr.f32.vlgmr.msra.gmra.mxu0 %v510_v10 }
  0x2a   : > { %1753 = vmatpush3.xpose.msra.mxu1 %v465_v8  ;;  %1754 = vmatprep.mubr.f32.mxu1 %v500_v9 }
  0x2b   : > { %1764 = vmatprep.subr.mxu1 %v1892_v25  ;;  %1761 = vmatprep.mubr.msk.f32.mxu0 %vm1893_vm2, %v1892_v25 }
  0x2d   : > { %1755 = vmatmul.mubr.f32.vlgmr.msra.gmra.mxu1 %v510_v10 }
  0x2e   : > { %1768 = vmatprep.mubr.msk.f32.mxu1 %vm1893_vm2, %v1892_v25 }
  0x92   : > { %v993_v9 = vpop.trf.xlu0 }
  0x93   : > { %v1011_v13 = vsel %vm1009_vm7, %v993_v9, 0 }
  0x94   : > { %v1995_v16 = vand.u32 4294901760, %v1011_v13 }
  0x96   : > { %v1081_v17 = vsub.f32 %v1011_v13, %v1995_v16 }
  0x98   : > { %v1082_v18 = vand.u32 4294901760, %v1081_v17 }
  0x9a   : > { %v1083_v20 = vsub.f32 %v1081_v17, %v1082_v18 }
  0xe1   : > { %v1731_v27 = vpop.f32.mrf.mxu0 }
  0xe3   : > { %v506_v29 = vpop.f32.mrf.mxu0 }
  0xe5   : > { %v1736_v30 = vpop.f32.mrf.mxu1  ;;  %v1741_v32 = vpop.f32.mrf.mxu0 }
  0xe6   : > { %v599_v31 = vadd.f32 %v1736_v30, %v1731_v27  ;;  %v1084_v30 = vand.u32 4294901760, %v1083_v20 }
  0xe7   : > { %v592_v35 = vpop.f32.mrf.mxu1  ;;  %v672_v38 = vpop.f32.mrf.mxu0 }
  0xe8   : > { %v680_v36 = vadd.f32 %v1741_v32, %v599_v31  ;;  %v593_v37 = vadd.f32 %v592_v35, %v506_v29 }
  0xe9   : > { %v1746_v40 = vpop.f32.mrf.mxu1  ;;  %v1751_v44 = vpop.f32.mrf.mxu0 }
  0xea   : > { %v673_v42 = vadd.f32 %v672_v38, %v593_v37  ;;  %v762_v43 = vadd.f32 %v1746_v40, %v680_v36 }
  0xeb   : > { %v753_v45 = vpop.f32.mrf.mxu1  ;;  %v835_v49 = vpop.f32.mrf.mxu0 }
  0xec   : > { %v842_v47 = vadd.f32 %v1751_v44, %v762_v43  ;;  %v754_v48 = vadd.f32 %v753_v45, %v673_v42  ;;  %v961_v42 = vld [vmem:[#allocation3] sm:$0x1] }
  0xed   : > { %v1756_v50 = vpop.f32.mrf.mxu1 }
  0xee   : > { %v836_v51 = vadd.f32 %v835_v49, %v754_v48  ;;  %v920_v52 = vadd.f32 %v1756_v50, %v842_v47 }
  0xef   : > { %v913_v53 = vpop.f32.mrf.mxu1 }
  0xf0   : > { %v934_v54 = vsel %vm932_vm5, %v920_v52, -1e+09  ;;  %v914_v55 = vadd.f32 %v913_v53, %v836_v51 }
  0xf1   : > { %v937_v57 = vsel %vm418_vm0, %v934_v54, -inf }
  0xf2   : > { %v933_v56 = vsel %vm931_vm6, %v914_v55, -1e+09 }
  0xf3   : > { %v936_v58 = vsel %vm418_vm0, %v933_v56, -inf }
  0xf4   : > { %v938_v59 = vmax.f32 %v936_v58, %v937_v57 }
  0xf6   : > { %v939_v60 = vrot.slane %v938_v59, 4 }
  0xf8   : > { %v940_v61 = vmax.f32 %v938_v59, %v939_v60 }
  0xfa   : > { %v941_v63 = vrot.slane %v940_v61, 2 }
  0xfc   : > { %v942_v0 = vmax.f32 %v940_v61, %v941_v63 }
  0xfe   : > { %v943_v2 = vrot.slane %v942_v0, 1 }
 0x100   : > { %v944_v4 = vmax.f32 %v942_v0, %v943_v2 }
 0x102   : > { %v945_v6 = vmax.f32 %v935_v3, %v944_v4 }
 0x104   : > { %v946_v7 = vsub.f32 %v935_v3, %v945_v6  ;;  %v953_v8 = vrot.slane %v945_v6, %v1991_v5  ;;  %1482 = vst.msk [vmem:[#allocation2] sm:$0x1] %vm415_vm1, %v945_v6 }
 0x106   : > { %v947_v10 = vmul.f32 1.442695, %v946_v7  ;;  %v955_v11 = vsub.f32 %v933_v56, %v953_v8  ;;  %v956_v12 = vsub.f32 %v934_v54, %v953_v8 }
 0x108   : > { %1843 = vpow2.f32 %v947_v10  ;;  %v957_v14 = vmul.f32 1.442695, %v955_v11  ;;  %v959_v15 = vmul.f32 1.442695, %v956_v12 }
 0x10a   : > { %1845 = vpow2.f32 %v957_v14 }
 0x10b   : > { %1847 = vpow2.f32 %v959_v15 }
 0x115   : > { %v1998_v19 = vpop.eup %1843 }
 0x116   : > { %v1477_v21 = vrot.slane %v1998_v19, %v1991_v5  ;;  %v962_v45 = vmul.f32 %v1998_v19, %v961_v42 }
 0x117   : > { %v1846_v22 = vpop.eup %1845 }
 0x118   : > { %v1848_v23 = vpop.eup %1847  ;;  %v963_v24 = vsel %vm418_vm0, %v1846_v22, 0.0  ;;  %v1045_v26 = vand.u32 4294901760, %v1846_v22 }
 0x119   : > { %v964_v27 = vsel %vm418_vm0, %v1848_v23, 0.0  ;;  %v1042_v28 = vand.u32 4294901760, %v1848_v23 }
 0x11a   : > { %v965_v29 = vadd.f32 %v964_v27, %v963_v24  ;;  %v1127_v31 = vsub.f32 %v1846_v22, %v1045_v26 }
 0x11b   : > { %1758 = vmatpush3.msra.mxu0 %v1042_v28  ;;  %v1120_v32 = vsub.f32 %v1848_v23, %v1042_v28 }
 0x11c   : > { %v966_v33 = vrot.slane %v965_v29, 4  ;;  %1759 = vmatprep.subr.mxu0 %v1892_v25  ;;  %v1128_v34 = vand.u32 4294901760, %v1127_v31 }
 0x11d   : > { %1760 = vmatpush3.msra.mxu0 %v1045_v26  ;;  %v1121_v35 = vand.u32 4294901760, %v1120_v32 }
 0x11e   : > { %v967_v36 = vadd.f32 %v966_v33, %v965_v29  ;;  %1762 = vmatmul.mubr.f32.vlgmr.msra.gmra.mxu0 %v1084_v30  ;;  %1771 = vmatprep.subr.mxu0 %v1892_v25  ;;  %v1129_v38 = vsub.f32 %v1127_v31, %v1128_v34 }
 0x11f   : > { %1772 = vmatpush3.msra.mxu0 %v1120_v32  ;;  %1775 = vmatprep.mubr.msk.f32.mxu0 %vm1893_vm2, %v1892_v25  ;;  %v1122_v37 = vsub.f32 %v1120_v32, %v1121_v35 }
 0x120   : > { %v968_v39 = vrot.slane %v967_v36, 2  ;;  %1773 = vmatprep.subr.mxu0 %v1892_v25  ;;  %v1130_v43 = vand.u32 4294901760, %v1129_v38 }
 0x121   : > { %1774 = vmatpush3.msra.mxu0 %v1127_v31  ;;  %v1123_v40 = vand.u32 4294901760, %v1122_v37 }
 0x122   : > { %v969_v41 = vadd.f32 %v968_v39, %v967_v36  ;;  %1776 = vmatmul.mubr.f32.vlgmr.msra.gmra.mxu0 %v1081_v17  ;;  %1785 = vmatprep.subr.mxu0 %v1892_v25 }
 0x123   : > { %1765 = vmatpush3.msra.mxu1 %v1123_v40  ;;  %1786 = vmatpush3.msra.mxu0 %v1121_v35 }
 0x124   : > { %v970_v44 = vrot.slane %v969_v41, 1  ;;  %1766 = vmatprep.subr.mxu1 %v1892_v25  ;;  %1787 = vmatprep.subr.mxu0 %v1892_v25 }
 0x125   : > { %1767 = vmatpush3.msra.mxu1 %v1130_v43  ;;  %1788 = vmatpush3.msra.mxu0 %v1128_v34 }
 0x126   : > { %v971_v46 = vadd.f32 %v970_v44, %v969_v41  ;;  %1789 = vmatprep.mubr.msk.f32.mxu0 %vm1893_vm2, %v1892_v25  ;;  %1769 = vmatmul.mubr.f32.vlgmr.msra.gmra.mxu1 %v1995_v16 }
 0x127   : > { %1778 = vmatprep.subr.mxu1 %v1892_v25  ;;  %1790 = vmatmul.mubr.f32.vlgmr.msra.gmra.mxu0 %v1995_v16 }
 0x128   : > { %v972_v47 = vadd.f32 %v971_v46, %v962_v45  ;;  %1779 = vmatpush3.msra.mxu1 %v1042_v28  ;;  %1782 = vmatprep.mubr.msk.f32.mxu1 %vm1893_vm2, %v1892_v25 }
 0x129   : > { %1780 = vmatprep.subr.mxu1 %v1892_v25 }
 0x12a   : > { %974 = vst.msk [vmem:[#allocation3] sm:$0x1] %vm415_vm1, %v972_v47  ;;  %1781 = vmatpush3.msra.mxu1 %v1045_v26 }
 0x12b   : > { %1783 = vmatmul.mubr.f32.vlgmr.msra.gmra.mxu1 %v1082_v18  ;;  %1792 = vmatprep.subr.mxu1 %v1892_v25 }
 0x12c   : > { %1793 = vmatpush3.msra.mxu1 %v1042_v28  ;;  %1796 = vmatprep.mubr.msk.f32.mxu1 %vm1893_vm2, %v1892_v25 }
 0x12d   : > { %1794 = vmatprep.subr.mxu1 %v1892_v25  ;;  %v1472_v25 = vld [vmem:[#allocation4] sm:$0xff] }
 0x12e   : > { %1795 = vmatpush3.msra.mxu1 %v1045_v26  ;;  %v1479_v1 = vmul.f32 %v1477_v21, %v1472_v25 }
 0x12f   : > { %1797 = vmatmul.mubr.f32.vlgmr.msra.gmra.mxu1 %v1995_v16 }
 0x131   : > { %v1486_v53 = vld [vmem:[#allocation3] sm:$0x1] }
 0x132   : > { %1849 = vrcp.f32 %v1486_v53 }
 0x13f   : > { %v1850_v4 = vpop.eup %1849 }
 0x140   : > { %v1493_v6 = vrot.slane %v1850_v4, %v1991_v5 }
 0x1de   : > { %v1086_v48 = vpop.f32.mrf.mxu0 }
 0x1e0   : > { %v1763_v49 = vpop.f32.mrf.mxu0 }
 0x1e2   : > { %v1243_v50 = vpop.f32.mrf.mxu0 }
 0x1e4   : > { %v1777_v51 = vpop.f32.mrf.mxu0 }
 0x1e6   : > { %v1167_v52 = vpop.f32.mrf.mxu1 }
 0x1e7   : > { %v1168_v54 = vadd.f32 %v1167_v52, %v1086_v48  ;;  %v1395_v55 = vpop.f32.mrf.mxu0 }
 0x1e8   : > { %v1770_v56 = vpop.f32.mrf.mxu1 }
 0x1e9   : > { %v1791_v57 = vpop.f32.mrf.mxu0  ;;  %v1244_v58 = vadd.f32 %v1243_v50, %v1168_v54 }
 0x1eb   : > { %v1318_v59 = vpop.f32.mrf.mxu1 }
 0x1ec   : > { %v1319_v60 = vadd.f32 %v1318_v59, %v1244_v58 }
 0x1ed   : > { %v1784_v61 = vpop.f32.mrf.mxu1 }
 0x1ee   : > { %v1396_v62 = vadd.f32 %v1395_v55, %v1319_v60 }
 0x1ef   : > { %v1468_v63 = vpop.f32.mrf.mxu1 }
 0x1f0   : > { %v1469_v0 = vadd.f32 %v1468_v63, %v1396_v62 }
 0x1f1   : > { %v1798_v2 = vpop.f32.mrf.mxu1 }
 0x1f2   : > { %v1480_v3 = vadd.f32 %v1479_v1, %v1469_v0 }
 0x1f4   : > { %1481 = vst.msk [vmem:[#allocation4] sm:$0xff] %vm418_vm0, %v1480_v3 }
 0x1fb   : > { %v1488_v7 = vld [vmem:[#allocation4] sm:$0xff] }
 0x1fc   : > { %v1495_v8 = vmul.f32 %v1493_v6, %v1488_v7 }
 0x1fe   : > { %1496 = vst.msk [vmem:[%s408_s22] sm:$0xff] %vm418_vm0, %v1495_v8 }
 0x1ff PF: > { %s14_s19 = sadd.s32 1, %s1889_s19   ;;  %s2058_s15 = smov %s1881_s17 }
 0x200   : > { %p11_p7 = scmp.ge.s32.totalorder %s14_s19, 10   ;;  %s2059_s16 = smov %s1885_s18 }
 0x201   : > { %s2060_s17 = smov %s2063_s20  ;;  %s2061_s18 = smov %s2067_s21 }
 0x202   :  { %13 = sbr.rel (!%p11_p7) target bundleno = 3 (0x3), region = 83 }

</bundles_post_ra>
